<compile_context>
chip_gen: v7x
topology: tpu7x:2x2x1
jax: 0.10.0
libtpu: 0.0.40
codegen_flags: <defaults>
</compile_context>

<pallas_src>
import functools

import jax
import jax.numpy as jnp
from jax.experimental import pallas as pl
from jax.experimental.pallas import tpu as pltpu


# ---------------------------------------------------------------------------
# VMEM budget / tiling helpers
# ---------------------------------------------------------------------------

def _vmem_limit_bytes():
    """Generation-aware scoped-VMEM budget (v5e/v6e: 128 MiB phys, v7x: 64 MiB)."""
    try:
        cap = int(pltpu.get_tpu_info().vmem_capacity_bytes)
    except Exception:
        cap = 64 * 1024 * 1024
    return max(32 * 1024 * 1024, min(cap * 3 // 4, 100 * 1024 * 1024))


_VMEM_LIMIT = _vmem_limit_bytes()


def _compiler_params(*semantics):
    return pltpu.CompilerParams(dimension_semantics=semantics,
                                vmem_limit_bytes=_VMEM_LIMIT)


def _row_tile_cap(cin, cout, budget=_VMEM_LIMIT):
    """Footprint-aware cap on the row tile of matmul-style kernels:
    double-buffered bf16 in/out tiles + resident bf16 weights + f32 acc."""
    fixed = cin * cout * 2 + 8 * cout * 4
    per_row = 2 * (cin + cout) * 2 + cout * 4
    avail = budget // 2 - fixed
    return int(max(64, min(1024, avail // max(per_row, 1))))


def _choose_row_tile(m, cap):
    """Return (tile, m_padded): tile divides m_padded, tile multiple of 8 or == m."""
    cap = max(8, cap)
    if m <= cap:
        return m, m
    start = cap - (cap % 8)
    for t in range(start, 7, -8):
        if m % t == 0:
            return t, m
    m_pad = ((m + start - 1) // start) * start       # masked tail via row padding
    return start, m_pad


def _pad_rows(x, axis, new_size):
    if x.shape[axis] == new_size:
        return x
    pads = [(0, 0)] * x.ndim
    pads[axis] = (0, new_size - x.shape[axis])
    return jnp.pad(x, pads)


def _band_rows(ho, wo, target_m=256):
    """Rows per conv3x3 band: divisor of Ho, band M = rows*Wo near `target_m`,
    and rows*Wo a multiple of 8 (or the full Ho) so output stores are unmasked."""
    want = max(1, min(ho, max(1, target_m // max(wo, 1))))
    for r in range(want, 0, -1):
        if ho % r == 0 and ((r * wo) % 8 == 0 or r == ho):
            return r
    return ho


# ---------------------------------------------------------------------------
# Pallas kernels
# ---------------------------------------------------------------------------

def _pointwise_kernel(x_ref, w_ref, s_ref, b_ref, o_ref):
    """1x1 conv (matmul) + folded BN + ReLU on one (TM, Cin) row tile (bf16 I/O)."""
    acc = jnp.dot(x_ref[...], w_ref[...], preferred_element_type=jnp.float32)
    o_ref[...] = jnp.maximum(acc * s_ref[...] + b_ref[...], 0.0).astype(o_ref.dtype)


def pointwise_conv_bn_relu(x2d, w, scale, bias):
    """x2d: (M, Cin) bf16 -> (M, Cout) bf16, M-tiled so DMA pipelines with compute."""
    m, cin = x2d.shape
    cout = w.shape[1]
    tm, m_pad = _choose_row_tile(m, _row_tile_cap(cin, cout))
    xp = _pad_rows(x2d, 0, m_pad)
    out = pl.pallas_call(
        _pointwise_kernel,
        out_shape=jax.ShapeDtypeStruct((m_pad, cout), jnp.bfloat16),
        grid=(m_pad // tm,),
        in_specs=[
            pl.BlockSpec((tm, cin), lambda i: (i, 0)),
            pl.BlockSpec((cin, cout), lambda i: (0, 0)),
            pl.BlockSpec((1, cout), lambda i: (0, 0)),
            pl.BlockSpec((1, cout), lambda i: (0, 0)),
        ],
        out_specs=pl.BlockSpec((tm, cout), lambda i: (i, 0)),
        compiler_params=_compiler_params("parallel"),
    )(xp, w, scale, bias)
    return out if m_pad == m else out[:m]


def _conv3x3_kernel(*refs, stride, use_se, rows, wo, inv_hw):
    """3x3 grouped conv (9 dense-tap matmuls, f32 accumulate) + BN + ReLU for one
    band of `rows` output rows; optional fused SE pooling + gate in the epilogue."""
    it = iter(refs)
    if stride == 1:
        phases = (next(it),)
    else:
        phases = (next(it), next(it), next(it), next(it))   # ee, eo, oe, oo
    w_ref = next(it)
    s_ref = next(it)
    b_ref = next(it)
    if use_se:
        w1_ref, b1_ref, w2_ref, b2_ref = next(it), next(it), next(it), next(it)
    o_ref = next(it)
    if use_se:
        gate_ref = next(it)
        se_ref = next(it)

    band = pl.program_id(1)
    row0 = pl.multiple_of(band * rows, rows)

    acc = jnp.zeros(o_ref.shape, jnp.float32)                # (rows*wo, Cout)
    for kh in range(3):
        for kw in range(3):
            if stride == 1:
                src, r0, c0 = phases[0], row0 + kh, kw
            else:
                src = phases[2 * (kh % 2) + (kw % 2)]
                r0, c0 = row0 + kh // 2, kw // 2
            patch = src[pl.ds(r0, rows), c0:c0 + wo, :]       # (rows, wo, C) bf16
            acc = acc + jnp.dot(patch.reshape(rows * wo, -1), w_ref[kh, kw],
                                preferred_element_type=jnp.float32)
    y = jnp.maximum(acc * s_ref[...] + b_ref[...], 0.0)       # f32
    o_ref[...] = y.astype(o_ref.dtype)

    if use_se:
        @pl.when(band == 0)
        def _():
            se_ref[...] = jnp.zeros_like(se_ref)

        se_ref[...] += jnp.sum(y, axis=0, keepdims=True)      # (1, Cout) f32

        @pl.when(band == pl.num_programs(1) - 1)
        def _():
            pooled = se_ref[...] * inv_hw
            h = jnp.dot(pooled.astype(jnp.bfloat16), w1_ref[...],
                        preferred_element_type=jnp.float32) + b1_ref[...]
            h = jnp.maximum(h, 0.0)
            g = jnp.dot(h.astype(jnp.bfloat16), w2_ref[...],
                        preferred_element_type=jnp.float32) + b2_ref[...]
            gate_ref[...] = jax.nn.sigmoid(g).astype(gate_ref.dtype)


def conv3x3_bn_relu_se(x_pad, w_taps, scale, bias, *, stride, se=None):
    """x_pad: (N, Hp, Wp, C) zero-padded NHWC bf16; w_taps: (3, 3, C, Cout) dense
    block-diagonal tap weights (bf16).  Returns (xb (N, Ho*Wo, Cout) bf16,
    gate (N, 1, Cout) f32 or None).  The (parity-split) padded image stays resident
    in VMEM across the band axis; SE pooling is fused into the conv epilogue."""
    assert stride in (1, 2)
    n, hp, wp, c = x_pad.shape
    cout = w_taps.shape[-1]
    ho = (hp - 3) // stride + 1
    wo = (wp - 3) // stride + 1
    rows = _band_rows(ho, wo)
    nb = ho // rows
    use_se = se is not None

    if stride == 1:
        xs = [x_pad]
    else:
        # One-time row/column parity split -> all in-kernel reads are contiguous.
        xs = [x_pad[:, 0::2, 0::2, :], x_pad[:, 0::2, 1::2, :],
              x_pad[:, 1::2, 0::2, :], x_pad[:, 1::2, 1::2, :]]
    in_specs = [pl.BlockSpec((None,) + a.shape[1:], lambda i, b: (i, 0, 0, 0))
                for a in xs]
    args = list(xs) + [w_taps, scale, bias]
    in_specs += [pl.BlockSpec(w_taps.shape, lambda i, b: (0, 0, 0, 0)),
                 pl.BlockSpec((1, cout), lambda i, b: (0, 0)),
                 pl.BlockSpec((1, cout), lambda i, b: (0, 0))]
    if use_se:
        w1, b1, w2, b2 = se
        cse = w1.shape[1]
        args += [w1, b1, w2, b2]
        in_specs += [pl.BlockSpec((cout, cse), lambda i, b: (0, 0)),
                     pl.BlockSpec((1, cse), lambda i, b: (0, 0)),
                     pl.BlockSpec((cse, cout), lambda i, b: (0, 0)),
                     pl.BlockSpec((1, cout), lambda i, b: (0, 0))]

    xb_shape = jax.ShapeDtypeStruct((n, ho * wo, cout), jnp.bfloat16)
    xb_spec = pl.BlockSpec((None, rows * wo, cout), lambda i, b: (i, b, 0))
    kernel = functools.partial(_conv3x3_kernel, stride=stride, use_se=use_se,
                               rows=rows, wo=wo, inv_hw=1.0 / (ho * wo))

    if use_se:
        xb, gate = pl.pallas_call(
            kernel,
            out_shape=(xb_shape, jax.ShapeDtypeStruct((n, 1, cout), jnp.float32)),
            grid=(n, nb),
            in_specs=in_specs,
            out_specs=(xb_spec,
                       pl.BlockSpec((None, 1, cout), lambda i, b: (i, 0, 0))),
            scratch_shapes=[pltpu.VMEM((1, cout), jnp.float32)],
            compiler_params=_compiler_params("parallel", "arbitrary"),
        )(*args)
        return xb, gate

    xb = pl.pallas_call(
        kernel,
        out_shape=xb_shape,
        grid=(n, nb),
        in_specs=in_specs,
        out_specs=xb_spec,
        compiler_params=_compiler_params("parallel", "parallel"),
    )(*args)
    return xb, None


def _head_kernel(*refs, use_se, use_proj):
    """Fused: SE gate scale -> conv_c (1x1) + BN -> (+ projected/identity shortcut)
       -> residual add -> ReLU, on one (TM, .) row tile (bf16 I/O, f32 math)."""
    it = iter(refs)
    xb_ref = next(it)
    gate_ref = next(it) if use_se else None
    sc_ref = next(it)
    wc_ref = next(it)
    s_c_ref = next(it)
    b_c_ref = next(it)
    if use_proj:
        wp_ref = next(it)
        s_p_ref = next(it)
        b_p_ref = next(it)
    o_ref = next(it)

    xb = xb_ref[...]
    if use_se:
        xb = xb * gate_ref[...].astype(xb.dtype)
    main = jnp.dot(xb, wc_ref[...], preferred_element_type=jnp.float32)
    main = main * s_c_ref[...] + b_c_ref[...]
    if use_proj:
        short = jnp.dot(sc_ref[...], wp_ref[...], preferred_element_type=jnp.float32)
        short = short * s_p_ref[...] + b_p_ref[...]
    else:
        short = sc_ref[...].astype(jnp.float32)
    o_ref[...] = jnp.maximum(main + short, 0.0).astype(o_ref.dtype)


def head_fused(xb3, gate, sc3, wc, scale_c, bias_c, proj=None):
    """xb3: (N, HW, w_b) bf16, sc3: (N, HW, Csc) bf16 shortcut input,
       gate: (N, 1, w_b) f32 or None, proj: optional (wp, scale_p, bias_p)."""
    n, hw, wb = xb3.shape
    w_out = wc.shape[1]
    csc = sc3.shape[-1]
    use_se = gate is not None
    use_proj = proj is not None

    tm, hw_pad = _choose_row_tile(hw, _row_tile_cap(wb + csc, w_out))
    xb3p = _pad_rows(xb3, 1, hw_pad)
    sc3p = _pad_rows(sc3, 1, hw_pad)

    args = [xb3p]
    in_specs = [pl.BlockSpec((None, tm, wb), lambda i, t: (i, t, 0))]
    if use_se:
        args.append(gate)
        in_specs.append(pl.BlockSpec((None, 1, wb), lambda i, t: (i, 0, 0)))
    args.append(sc3p)
    in_specs.append(pl.BlockSpec((None, tm, csc), lambda i, t: (i, t, 0)))
    args += [wc, scale_c, bias_c]
    in_specs += [pl.BlockSpec((wb, w_out), lambda i, t: (0, 0)),
                 pl.BlockSpec((1, w_out), lambda i, t: (0, 0)),
                 pl.BlockSpec((1, w_out), lambda i, t: (0, 0))]
    if use_proj:
        wp, scale_p, bias_p = proj
        args += [wp, scale_p, bias_p]
        in_specs += [pl.BlockSpec((csc, w_out), lambda i, t: (0, 0)),
                     pl.BlockSpec((1, w_out), lambda i, t: (0, 0)),
                     pl.BlockSpec((1, w_out), lambda i, t: (0, 0))]

    kernel = functools.partial(_head_kernel, use_se=use_se, use_proj=use_proj)
    out = pl.pallas_call(
        kernel,
        out_shape=jax.ShapeDtypeStruct((n, hw_pad, w_out), jnp.bfloat16),
        grid=(n, hw_pad // tm),
        in_specs=in_specs,
        out_specs=pl.BlockSpec((None, tm, w_out), lambda i, t: (i, t, 0)),
        compiler_params=_compiler_params("parallel", "parallel"),
    )(*args)
    return out if hw_pad == hw else out[:, :hw, :]


# ---------------------------------------------------------------------------
# Param init (kernel-ready: bf16 weights, folded BN, precomputed dense taps)
# ---------------------------------------------------------------------------

def _fold_bn(gamma, beta, mean, var, eps=1e-5):
    scale = gamma / jnp.sqrt(var + eps)
    bias = beta - mean * scale
    return (scale.reshape(1, -1).astype(jnp.float32),
            bias.reshape(1, -1).astype(jnp.float32))


def _init_bn(key, c):
    k1, k2, k3, k4 = jax.random.split(key, 4)
    gamma = 1.0 + 0.1 * jax.random.normal(k1, (c,), jnp.float32)
    beta = 0.1 * jax.random.normal(k2, (c,), jnp.float32)
    mean = 0.1 * jax.random.normal(k3, (c,), jnp.float32)
    var = 0.5 + jax.random.uniform(k4, (c,), jnp.float32)
    return _fold_bn(gamma, beta, mean, var)


def _dense_tap_weights(wg):
    """Grouped weights (G, 3, 3, gw, cpg) -> per-tap dense block-diagonal weights
    (3, 3, C, Cout) so each tap is one lane-dense (C, Cout) matmul.
    NOTE: the block-diagonal expansion costs G x the minimal FLOPs; fine on
    v6e/v7x MXUs, chunk per-group channel blocks if conv_b goes MXU-bound on v5e."""
    g, kh, kw, gw, cpg = wg.shape
    eye = jnp.eye(g, dtype=wg.dtype)
    dense = jnp.einsum("gh,gabij->abgihj", eye, wg)        # (3,3,G,gw,G,cpg)
    return dense.reshape(kh, kw, g * gw, g * cpg)          # (3,3,C,Cout)


def _init_block_params(key, w_in, w_out, stride, bottleneck_ratio, group_width,
                       se_ratio):
    w_b = int(round(w_out * bottleneck_ratio))
    assert w_b % group_width == 0, "bottleneck width must divide by group_width"
    g = w_b // group_width
    keys = jax.random.split(key, 12)
    p = {}
    p["conv_a_w"] = (0.1 * jax.random.normal(keys[0], (w_in, w_b),
                                             jnp.float32)).astype(jnp.bfloat16)
    p["bn_a"] = _init_bn(keys[1], w_b)
    wg = 0.1 * jax.random.normal(keys[2], (g, 3, 3, group_width, w_b // g),
                                 jnp.float32)
    p["conv_b_taps"] = _dense_tap_weights(wg).astype(jnp.bfloat16)
    p["bn_b"] = _init_bn(keys[3], w_b)
    p["conv_c_w"] = (0.1 * jax.random.normal(keys[4], (w_b, w_out),
                                             jnp.float32)).astype(jnp.bfloat16)
    p["bn_c"] = _init_bn(keys[5], w_out)
    if se_ratio is not None:
        w_se = max(1, int(round(w_in * se_ratio)))
        p["se_w1"] = (0.1 * jax.random.normal(keys[6], (w_b, w_se),
                                              jnp.float32)).astype(jnp.bfloat16)
        p["se_b1"] = 0.1 * jax.random.normal(keys[7], (1, w_se), jnp.float32)
        p["se_w2"] = (0.1 * jax.random.normal(keys[8], (w_se, w_b),
                                              jnp.float32)).astype(jnp.bfloat16)
        p["se_b2"] = 0.1 * jax.random.normal(keys[9], (1, w_b), jnp.float32)
    if stride != 1 or w_in != w_out:
        p["proj_w"] = (0.1 * jax.random.normal(keys[10], (w_in, w_out),
                                               jnp.float32)).astype(jnp.bfloat16)
        p["bn_proj"] = _init_bn(keys[11], w_out)
    return p


def init_stage_params(key, in_channels, out_channels, stride, depth,
                      bottleneck_ratio, group_width, se_ratio):
    keys = jax.random.split(key, depth)
    params = []
    for i in range(depth):
        params.append(_init_block_params(
            keys[i], in_channels if i == 0 else out_channels, out_channels,
            stride if i == 0 else 1, bottleneck_ratio, group_width, se_ratio))
    return params


# ---------------------------------------------------------------------------
# Block / Stage forward (NHWC + bf16 internally)
# ---------------------------------------------------------------------------

def _block_forward(x, p, stride):
    n, h, w, cin = x.shape
    w_b = p["conv_a_w"].shape[1]
    w_out = p["conv_c_w"].shape[1]

    # --- 1x1 conv_a + BN + ReLU (M-tiled, bf16 activations) ---
    xa = pointwise_conv_bn_relu(x.reshape(n * h * w, cin),
                                p["conv_a_w"], p["bn_a"][0], p["bn_a"][1])
    xa = xa.reshape(n, h, w, w_b)

    # --- 3x3 grouped conv_b (stride) + BN + ReLU, SE pooling fused in epilogue ---
    # TODO(synk): the 1-pixel halo pad is still a separate (bf16) copy between two
    # mem-bound kernels; fold it into conv_a's stores if profiles show it matters.
    x_pad = jnp.pad(xa, ((0, 0), (1, 1), (1, 1), (0, 0)))
    se = (p["se_w1"], p["se_b1"], p["se_w2"], p["se_b2"]) if "se_w1" in p else None
    xb3, gate = conv3x3_bn_relu_se(x_pad, p["conv_b_taps"],
                                   p["bn_b"][0], p["bn_b"][1],
                                   stride=stride, se=se)
    ho = (h - 1) // stride + 1
    wo = (w - 1) // stride + 1
    hw2 = ho * wo

    # --- shortcut input + fused conv_c / proj / residual-add / ReLU head ---
    if "proj_w" in p:
        xs = x[:, ::stride, ::stride, :] if stride != 1 else x
        sc3 = xs.reshape(n, hw2, cin)
        proj = (p["proj_w"], p["bn_proj"][0], p["bn_proj"][1])
    else:
        assert stride == 1 and cin == w_out
        sc3 = x.reshape(n, hw2, w_out)
        proj = None

    out3 = head_fused(xb3, gate, sc3, p["conv_c_w"], p["bn_c"][0], p["bn_c"][1],
                      proj=proj)
    return out3.reshape(n, ho, wo, w_out)


def stage_forward(x_nchw, params, stride):
    # NCHW at the module boundary (PyTorch semantics); NHWC + bf16 inside.
    x = jnp.transpose(x_nchw, (0, 2, 3, 1)).astype(jnp.bfloat16)
    for i, p in enumerate(params):
        x = _block_forward(x, p, stride if i == 0 else 1)
    return jnp.transpose(x, (0, 3, 1, 2)).astype(jnp.float32)


# ---------------------------------------------------------------------------
# Demo
# ---------------------------------------------------------------------------

if __name__ == "__main__":
    in_channels, out_channels = 16, 32
    stride, depth = 2, 2
    bottleneck_ratio, group_width, se_ratio = 1.0, 8, 0.25

    key = jax.random.PRNGKey(0)
    k_params, k_x = jax.random.split(key)
    params = init_stage_params(k_params, in_channels, out_channels, stride, depth,
                               bottleneck_ratio, group_width, se_ratio)

    x = jax.random.normal(k_x, (2, in_channels, 8, 8), jnp.float32)   # NCHW

    fwd = jax.jit(functools.partial(stage_forward, stride=stride))
    y = fwd(x, params)
    jax.block_until_ready(y)
    assert y.shape == (2, out_channels, 4, 4), y.shape
    print("KERNEL_OK")
</pallas_src>

<mosaic_0001>
module attributes {stable_mosaic.version = 11 : i64} {
  func.func @_pointwise_kernel(%arg0: i32, %arg1: memref<128x16xbf16, #tpu.memory_space<vmem>>, %arg2: memref<16x32xbf16, #tpu.memory_space<vmem>>, %arg3: memref<1x32xf32, #tpu.memory_space<vmem>>, %arg4: memref<1x32xf32, #tpu.memory_space<vmem>>, %arg5: memref<128x32xbf16, #tpu.memory_space<vmem>>) attributes {dimension_semantics = [#tpu.dimension_semantics<parallel>], iteration_bounds = array<i64: 1>, scalar_prefetch = 0 : i64, scratch_operands = 0 : i64, tpu.core_type = #tpu.core_type<tc>, window_params = [{transform_indices = @transform_0, window_bounds = array<i64: 128, 16>}, {pipeline_mode = #tpu.pipeline_mode<synchronous>, transform_indices = @transform_1, window_bounds = array<i64: 16, 32>}, {pipeline_mode = #tpu.pipeline_mode<synchronous>, transform_indices = @transform_2, window_bounds = array<i64: 1, 32>}, {pipeline_mode = #tpu.pipeline_mode<synchronous>, transform_indices = @transform_3, window_bounds = array<i64: 1, 32>}, {transform_indices = @transform_4, window_bounds = array<i64: 128, 32>}]} {
    %c0 = arith.constant 0 : index
    %c0_0 = arith.constant 0 : index
    %0 = vector.load %arg1[%c0, %c0_0] : memref<128x16xbf16, #tpu.memory_space<vmem>>, vector<128x16xbf16>
    %c0_1 = arith.constant 0 : index
    %c0_2 = arith.constant 0 : index
    %1 = vector.load %arg2[%c0_1, %c0_2] : memref<16x32xbf16, #tpu.memory_space<vmem>>, vector<16x32xbf16>
    %cst = arith.constant dense<0.000000e+00> : vector<128x32xf32>
    %2 = tpu.matmul %0, %1, %cst {dimension_numbers = #tpu.dot_dimension_numbers<[1], [0], [0], [1], [0, 0, 1, 1], [], []>} : vector<128x16xbf16>, vector<16x32xbf16>, vector<128x32xf32> -> vector<128x32xf32>
    %c0_3 = arith.constant 0 : index
    %c0_4 = arith.constant 0 : index
    %3 = vector.load %arg3[%c0_3, %c0_4] : memref<1x32xf32, #tpu.memory_space<vmem>>, vector<1x32xf32>
    %4 = vector.broadcast %3 : vector<1x32xf32> to vector<128x32xf32>
    %5 = arith.mulf %2, %4 : vector<128x32xf32>
    %c0_5 = arith.constant 0 : index
    %c0_6 = arith.constant 0 : index
    %6 = vector.load %arg4[%c0_5, %c0_6] : memref<1x32xf32, #tpu.memory_space<vmem>>, vector<1x32xf32>
    %7 = vector.broadcast %6 : vector<1x32xf32> to vector<128x32xf32>
    %8 = arith.addf %5, %7 : vector<128x32xf32>
    %cst_7 = arith.constant 0.000000e+00 : f32
    %9 = vector.broadcast %cst_7 : f32 to vector<128x32xf32>
    %10 = arith.maximumf %8, %9 : vector<128x32xf32>
    %11 = arith.truncf %10 : vector<128x32xf32> to vector<128x32xbf16>
    %c0_8 = arith.constant 0 : index
    %c0_9 = arith.constant 0 : index
    %12 = vector.load %arg5[%c0_8, %c0_9] : memref<128x32xbf16, #tpu.memory_space<vmem>>, vector<128x32xbf16>
    tpu.vector_store %arg5[%c0_8, %c0_9], %11 {strides = array<i32>} : memref<128x32xbf16, #tpu.memory_space<vmem>>, vector<128x32xbf16>,
    return
  }
  func.func @transform_0(%arg0: i32) -> (i32, i32) {
    %c0_i32 = arith.constant 0 : i32
    %c0_i32_0 = arith.constant 0 : i32
    return %arg0, %c0_i32 : i32, i32
  }
  func.func @transform_1(%arg0: i32) -> (i32, i32) {
    %c0_i32 = arith.constant 0 : i32
    %c0_i32_0 = arith.constant 0 : i32
    %c0_i32_1 = arith.constant 0 : i32
    return %c0_i32, %c0_i32_0 : i32, i32
  }
  func.func @transform_2(%arg0: i32) -> (i32, i32) {
    %c0_i32 = arith.constant 0 : i32
    %c0_i32_0 = arith.constant 0 : i32
    %c0_i32_1 = arith.constant 0 : i32
    return %c0_i32, %c0_i32_0 : i32, i32
  }
  func.func @transform_3(%arg0: i32) -> (i32, i32) {
    %c0_i32 = arith.constant 0 : i32
    %c0_i32_0 = arith.constant 0 : i32
    %c0_i32_1 = arith.constant 0 : i32
    return %c0_i32, %c0_i32_0 : i32, i32
  }
  func.func @transform_4(%arg0: i32) -> (i32, i32) {
    %c0_i32 = arith.constant 0 : i32
    %c0_i32_0 = arith.constant 0 : i32
    return %arg0, %c0_i32 : i32, i32
  }
}

module attributes {stable_mosaic.version = 11 : i64} {
  func.func @_conv3x3_kernel(%arg0: i32, %arg1: i32, %arg2: memref<1x5x5x32xbf16, #tpu.memory_space<vmem>>, %arg3: memref<1x5x5x32xbf16, #tpu.memory_space<vmem>>, %arg4: memref<1x5x5x32xbf16, #tpu.memory_space<vmem>>, %arg5: memref<1x5x5x32xbf16, #tpu.memory_space<vmem>>, %arg6: memref<3x3x32x32xbf16, #tpu.memory_space<vmem>>, %arg7: memref<1x32xf32, #tpu.memory_space<vmem>>, %arg8: memref<1x32xf32, #tpu.memory_space<vmem>>, %arg9: memref<32x4xbf16, #tpu.memory_space<vmem>>, %arg10: memref<1x4xf32, #tpu.memory_space<vmem>>, %arg11: memref<4x32xbf16, #tpu.memory_space<vmem>>, %arg12: memref<1x32xf32, #tpu.memory_space<vmem>>, %arg13: memref<1x16x32xbf16, #tpu.memory_space<vmem>>, %arg14: memref<1x1x32xf32, #tpu.memory_space<vmem>>, %arg15: memref<1x32xf32, #tpu.memory_space<vmem>>) attributes {dimension_semantics = [#tpu.dimension_semantics<parallel>, #tpu.dimension_semantics<arbitrary>], iteration_bounds = array<i64: 2, 1>, scalar_prefetch = 0 : i64, scratch_operands = 1 : i64, tpu.core_type = #tpu.core_type<tc>, window_params = [{transform_indices = @transform_0, window_bounds = array<i64: 1, 5, 5, 32>}, {transform_indices = @transform_1, window_bounds = array<i64: 1, 5, 5, 32>}, {transform_indices = @transform_2, window_bounds = array<i64: 1, 5, 5, 32>}, {transform_indices = @transform_3, window_bounds = array<i64: 1, 5, 5, 32>}, {pipeline_mode = #tpu.pipeline_mode<synchronous>, transform_indices = @transform_4, window_bounds = array<i64: 3, 3, 32, 32>}, {pipeline_mode = #tpu.pipeline_mode<synchronous>, transform_indices = @transform_5, window_bounds = array<i64: 1, 32>}, {pipeline_mode = #tpu.pipeline_mode<synchronous>, transform_indices = @transform_6, window_bounds = array<i64: 1, 32>}, {pipeline_mode = #tpu.pipeline_mode<synchronous>, transform_indices = @transform_7, window_bounds = array<i64: 32, 4>}, {pipeline_mode = #tpu.pipeline_mode<synchronous>, transform_indices = @transform_8, window_bounds = array<i64: 1, 4>}, {pipeline_mode = #tpu.pipeline_mode<synchronous>, transform_indices = @transform_9, window_bounds = array<i64: 4, 32>}, {pipeline_mode = #tpu.pipeline_mode<synchronous>, transform_indices = @transform_10, window_bounds = array<i64: 1, 32>}, {transform_indices = @transform_11, window_bounds = array<i64: 1, 16, 32>}, {transform_indices = @transform_12, window_bounds = array<i64: 1, 1, 32>}]} {
    %c4_i32 = arith.constant 4 : i32
    %0 = arith.muli %arg1, %c4_i32 : i32
    %1 = tpu.assume_multiple %0, 4 : i32
    %cst = arith.constant 0.000000e+00 : f32
    %2 = vector.broadcast %cst : f32 to vector<16x32xf32>
    %c0_i32 = arith.constant 0 : i32
    %3 = arith.addi %1, %c0_i32 : i32
    %c0 = arith.constant 0 : index
    %4 = arith.index_cast %3 : i32 to index
    %c0_0 = arith.constant 0 : index
    %c0_1 = arith.constant 0 : index
    %5 = vector.load %arg2[%c0, %4, %c0_0, %c0_1] : memref<1x5x5x32xbf16, #tpu.memory_space<vmem>>, vector<1x4x4x32xbf16>
    %6 = vector.shape_cast %5 : vector<1x4x4x32xbf16> to vector<4x4x32xbf16>
    %7 = vector.shape_cast %6 : vector<4x4x32xbf16> to vector<16x32xbf16>
    %c0_2 = arith.constant 0 : index
    %c0_3 = arith.constant 0 : index
    %c0_4 = arith.constant 0 : index
    %c0_5 = arith.constant 0 : index
    %8 = vector.load %arg6[%c0_2, %c0_3, %c0_4, %c0_5] : memref<3x3x32x32xbf16, #tpu.memory_space<vmem>>, vector<1x1x32x32xbf16>
    %9 = vector.shape_cast %8 : vector<1x1x32x32xbf16> to vector<32x32xbf16>
    %cst_6 = arith.constant dense<0.000000e+00> : vector<16x32xf32>
    %10 = tpu.matmul %7, %9, %cst_6 {dimension_numbers = #tpu.dot_dimension_numbers<[1], [0], [0], [1], [0, 0, 1, 1], [], []>} : vector<16x32xbf16>, vector<32x32xbf16>, vector<16x32xf32> -> vector<16x32xf32>
    %11 = arith.addf %2, %10 : vector<16x32xf32>
    %c0_i32_7 = arith.constant 0 : i32
    %12 = arith.addi %1, %c0_i32_7 : i32
    %c0_8 = arith.constant 0 : index
    %13 = arith.index_cast %12 : i32 to index
    %c0_9 = arith.constant 0 : index
    %c0_10 = arith.constant 0 : index
    %14 = vector.load %arg3[%c0_8, %13, %c0_9, %c0_10] : memref<1x5x5x32xbf16, #tpu.memory_space<vmem>>, vector<1x4x4x32xbf16>
    %15 = vector.shape_cast %14 : vector<1x4x4x32xbf16> to vector<4x4x32xbf16>
    %16 = vector.shape_cast %15 : vector<4x4x32xbf16> to vector<16x32xbf16>
    %c0_11 = arith.constant 0 : index
    %c1 = arith.constant 1 : index
    %c0_12 = arith.constant 0 : index
    %c0_13 = arith.constant 0 : index
    %17 = vector.load %arg6[%c0_11, %c1, %c0_12, %c0_13] : memref<3x3x32x32xbf16, #tpu.memory_space<vmem>>, vector<1x1x32x32xbf16>
    %18 = vector.shape_cast %17 : vector<1x1x32x32xbf16> to vector<32x32xbf16>
    %cst_14 = arith.constant dense<0.000000e+00> : vector<16x32xf32>
    %19 = tpu.matmul %16, %18, %cst_14 {dimension_numbers = #tpu.dot_dimension_numbers<[1], [0], [0], [1], [0, 0, 1, 1], [], []>} : vector<16x32xbf16>, vector<32x32xbf16>, vector<16x32xf32> -> vector<16x32xf32>
    %20 = arith.addf %11, %19 : vector<16x32xf32>
    %c0_i32_15 = arith.constant 0 : i32
    %21 = arith.addi %1, %c0_i32_15 : i32
    %c0_16 = arith.constant 0 : index
    %22 = arith.index_cast %21 : i32 to index
    %c1_17 = arith.constant 1 : index
    %c0_18 = arith.constant 0 : index
    %23 = vector.load %arg2[%c0_16, %22, %c1_17, %c0_18] : memref<1x5x5x32xbf16, #tpu.memory_space<vmem>>, vector<1x4x4x32xbf16>
    %24 = vector.shape_cast %23 : vector<1x4x4x32xbf16> to vector<4x4x32xbf16>
    %25 = vector.shape_cast %24 : vector<4x4x32xbf16> to vector<16x32xbf16>
    %c0_19 = arith.constant 0 : index
    %c2 = arith.constant 2 : index
    %c0_20 = arith.constant 0 : index
    %c0_21 = arith.constant 0 : index
    %26 = vector.load %arg6[%c0_19, %c2, %c0_20, %c0_21] : memref<3x3x32x32xbf16, #tpu.memory_space<vmem>>, vector<1x1x32x32xbf16>
    %27 = vector.shape_cast %26 : vector<1x1x32x32xbf16> to vector<32x32xbf16>
    %cst_22 = arith.constant dense<0.000000e+00> : vector<16x32xf32>
    %28 = tpu.matmul %25, %27, %cst_22 {dimension_numbers = #tpu.dot_dimension_numbers<[1], [0], [0], [1], [0, 0, 1, 1], [], []>} : vector<16x32xbf16>, vector<32x32xbf16>, vector<16x32xf32> -> vector<16x32xf32>
    %29 = arith.addf %20, %28 : vector<16x32xf32>
    %c0_i32_23 = arith.constant 0 : i32
    %30 = arith.addi %1, %c0_i32_23 : i32
    %c0_24 = arith.constant 0 : index
    %31 = arith.index_cast %30 : i32 to index
    %c0_25 = arith.constant 0 : index
    %c0_26 = arith.constant 0 : index
    %32 = vector.load %arg4[%c0_24, %31, %c0_25, %c0_26] : memref<1x5x5x32xbf16, #tpu.memory_space<vmem>>, vector<1x4x4x32xbf16>
    %33 = vector.shape_cast %32 : vector<1x4x4x32xbf16> to vector<4x4x32xbf16>
    %34 = vector.shape_cast %33 : vector<4x4x32xbf16> to vector<16x32xbf16>
    %c1_27 = arith.constant 1 : index
    %c0_28 = arith.constant 0 : index
    %c0_29 = arith.constant 0 : index
    %c0_30 = arith.constant 0 : index
    %35 = vector.load %arg6[%c1_27, %c0_28, %c0_29, %c0_30] : memref<3x3x32x32xbf16, #tpu.memory_space<vmem>>, vector<1x1x32x32xbf16>
    %36 = vector.shape_cast %35 : vector<1x1x32x32xbf16> to vector<32x32xbf16>
    %cst_31 = arith.constant dense<0.000000e+00> : vector<16x32xf32>
    %37 = tpu.matmul %34, %36, %cst_31 {dimension_numbers = #tpu.dot_dimension_numbers<[1], [0], [0], [1], [0, 0, 1, 1], [], []>} : vector<16x32xbf16>, vector<32x32xbf16>, vector<16x32xf32> -> vector<16x32xf32>
    %38 = arith.addf %29, %37 : vector<16x32xf32>
    %c0_i32_32 = arith.constant 0 : i32
    %39 = arith.addi %1, %c0_i32_32 : i32
    %c0_33 = arith.constant 0 : index
    %40 = arith.index_cast %39 : i32 to index
    %c0_34 = arith.constant 0 : index
    %c0_35 = arith.constant 0 : index
    %41 = vector.load %arg5[%c0_33, %40, %c0_34, %c0_35] : memref<1x5x5x32xbf16, #tpu.memory_space<vmem>>, vector<1x4x4x32xbf16>
    %42 = vector.shape_cast %41 : vector<1x4x4x32xbf16> to vector<4x4x32xbf16>
    %43 = vector.shape_cast %42 : vector<4x4x32xbf16> to vector<16x32xbf16>
    %c1_36 = arith.constant 1 : index
    %c1_37 = arith.constant 1 : index
    %c0_38 = arith.constant 0 : index
    %c0_39 = arith.constant 0 : index
    %44 = vector.load %arg6[%c1_36, %c1_37, %c0_38, %c0_39] : memref<3x3x32x32xbf16, #tpu.memory_space<vmem>>, vector<1x1x32x32xbf16>
    %45 = vector.shape_cast %44 : vector<1x1x32x32xbf16> to vector<32x32xbf16>
    %cst_40 = arith.constant dense<0.000000e+00> : vector<16x32xf32>
    %46 = tpu.matmul %43, %45, %cst_40 {dimension_numbers = #tpu.dot_dimension_numbers<[1], [0], [0], [1], [0, 0, 1, 1], [], []>} : vector<16x32xbf16>, vector<32x32xbf16>, vector<16x32xf32> -> vector<16x32xf32>
    %47 = arith.addf %38, %46 : vector<16x32xf32>
    %c0_i32_41 = arith.constant 0 : i32
    %48 = arith.addi %1, %c0_i32_41 : i32
    %c0_42 = arith.constant 0 : index
    %49 = arith.index_cast %48 : i32 to index
    %c1_43 = arith.constant 1 : index
    %c0_44 = arith.constant 0 : index
    %50 = vector.load %arg4[%c0_42, %49, %c1_43, %c0_44] : memref<1x5x5x32xbf16, #tpu.memory_space<vmem>>, vector<1x4x4x32xbf16>
    %51 = vector.shape_cast %50 : vector<1x4x4x32xbf16> to vector<4x4x32xbf16>
    %52 = vector.shape_cast %51 : vector<4x4x32xbf16> to vector<16x32xbf16>
    %c1_45 = arith.constant 1 : index
    %c2_46 = arith.constant 2 : index
    %c0_47 = arith.constant 0 : index
    %c0_48 = arith.constant 0 : index
    %53 = vector.load %arg6[%c1_45, %c2_46, %c0_47, %c0_48] : memref<3x3x32x32xbf16, #tpu.memory_space<vmem>>, vector<1x1x32x32xbf16>
    %54 = vector.shape_cast %53 : vector<1x1x32x32xbf16> to vector<32x32xbf16>
    %cst_49 = arith.constant dense<0.000000e+00> : vector<16x32xf32>
    %55 = tpu.matmul %52, %54, %cst_49 {dimension_numbers = #tpu.dot_dimension_numbers<[1], [0], [0], [1], [0, 0, 1, 1], [], []>} : vector<16x32xbf16>, vector<32x32xbf16>, vector<16x32xf32> -> vector<16x32xf32>
    %56 = arith.addf %47, %55 : vector<16x32xf32>
    %c1_i32 = arith.constant 1 : i32
    %57 = arith.addi %1, %c1_i32 : i32
    %c0_50 = arith.constant 0 : index
    %58 = arith.index_cast %57 : i32 to index
    %c0_51 = arith.constant 0 : index
    %c0_52 = arith.constant 0 : index
    %59 = vector.load %arg2[%c0_50, %58, %c0_51, %c0_52] : memref<1x5x5x32xbf16, #tpu.memory_space<vmem>>, vector<1x4x4x32xbf16>
    %60 = vector.shape_cast %59 : vector<1x4x4x32xbf16> to vector<4x4x32xbf16>
    %61 = vector.shape_cast %60 : vector<4x4x32xbf16> to vector<16x32xbf16>
    %c2_53 = arith.constant 2 : index
    %c0_54 = arith.constant 0 : index
    %c0_55 = arith.constant 0 : index
    %c0_56 = arith.constant 0 : index
    %62 = vector.load %arg6[%c2_53, %c0_54, %c0_55, %c0_56] : memref<3x3x32x32xbf16, #tpu.memory_space<vmem>>, vector<1x1x32x32xbf16>
    %63 = vector.shape_cast %62 : vector<1x1x32x32xbf16> to vector<32x32xbf16>
    %cst_57 = arith.constant dense<0.000000e+00> : vector<16x32xf32>
    %64 = tpu.matmul %61, %63, %cst_57 {dimension_numbers = #tpu.dot_dimension_numbers<[1], [0], [0], [1], [0, 0, 1, 1], [], []>} : vector<16x32xbf16>, vector<32x32xbf16>, vector<16x32xf32> -> vector<16x32xf32>
    %65 = arith.addf %56, %64 : vector<16x32xf32>
    %c1_i32_58 = arith.constant 1 : i32
    %66 = arith.addi %1, %c1_i32_58 : i32
    %c0_59 = arith.constant 0 : index
    %67 = arith.index_cast %66 : i32 to index
    %c0_60 = arith.constant 0 : index
    %c0_61 = arith.constant 0 : index
    %68 = vector.load %arg3[%c0_59, %67, %c0_60, %c0_61] : memref<1x5x5x32xbf16, #tpu.memory_space<vmem>>, vector<1x4x4x32xbf16>
    %69 = vector.shape_cast %68 : vector<1x4x4x32xbf16> to vector<4x4x32xbf16>
    %70 = vector.shape_cast %69 : vector<4x4x32xbf16> to vector<16x32xbf16>
    %c2_62 = arith.constant 2 : index
    %c1_63 = arith.constant 1 : index
    %c0_64 = arith.constant 0 : index
    %c0_65 = arith.constant 0 : index
    %71 = vector.load %arg6[%c2_62, %c1_63, %c0_64, %c0_65] : memref<3x3x32x32xbf16, #tpu.memory_space<vmem>>, vector<1x1x32x32xbf16>
    %72 = vector.shape_cast %71 : vector<1x1x32x32xbf16> to vector<32x32xbf16>
    %cst_66 = arith.constant dense<0.000000e+00> : vector<16x32xf32>
    %73 = tpu.matmul %70, %72, %cst_66 {dimension_numbers = #tpu.dot_dimension_numbers<[1], [0], [0], [1], [0, 0, 1, 1], [], []>} : vector<16x32xbf16>, vector<32x32xbf16>, vector<16x32xf32> -> vector<16x32xf32>
    %74 = arith.addf %65, %73 : vector<16x32xf32>
    %c1_i32_67 = arith.constant 1 : i32
    %75 = arith.addi %1, %c1_i32_67 : i32
    %c0_68 = arith.constant 0 : index
    %76 = arith.index_cast %75 : i32 to index
    %c1_69 = arith.constant 1 : index
    %c0_70 = arith.constant 0 : index
    %77 = vector.load %arg2[%c0_68, %76, %c1_69, %c0_70] : memref<1x5x5x32xbf16, #tpu.memory_space<vmem>>, vector<1x4x4x32xbf16>
    %78 = vector.shape_cast %77 : vector<1x4x4x32xbf16> to vector<4x4x32xbf16>
    %79 = vector.shape_cast %78 : vector<4x4x32xbf16> to vector<16x32xbf16>
    %c2_71 = arith.constant 2 : index
    %c2_72 = arith.constant 2 : index
    %c0_73 = arith.constant 0 : index
    %c0_74 = arith.constant 0 : index
    %80 = vector.load %arg6[%c2_71, %c2_72, %c0_73, %c0_74] : memref<3x3x32x32xbf16, #tpu.memory_space<vmem>>, vector<1x1x32x32xbf16>
    %81 = vector.shape_cast %80 : vector<1x1x32x32xbf16> to vector<32x32xbf16>
    %cst_75 = arith.constant dense<0.000000e+00> : vector<16x32xf32>
    %82 = tpu.matmul %79, %81, %cst_75 {dimension_numbers = #tpu.dot_dimension_numbers<[1], [0], [0], [1], [0, 0, 1, 1], [], []>} : vector<16x32xbf16>, vector<32x32xbf16>, vector<16x32xf32> -> vector<16x32xf32>
    %83 = arith.addf %74, %82 : vector<16x32xf32>
    %c0_76 = arith.constant 0 : index
    %c0_77 = arith.constant 0 : index
    %84 = vector.load %arg7[%c0_76, %c0_77] : memref<1x32xf32, #tpu.memory_space<vmem>>, vector<1x32xf32>
    %85 = vector.broadcast %84 : vector<1x32xf32> to vector<16x32xf32>
    %86 = arith.mulf %83, %85 : vector<16x32xf32>
    %c0_78 = arith.constant 0 : index
    %c0_79 = arith.constant 0 : index
    %87 = vector.load %arg8[%c0_78, %c0_79] : memref<1x32xf32, #tpu.memory_space<vmem>>, vector<1x32xf32>
    %88 = vector.broadcast %87 : vector<1x32xf32> to vector<16x32xf32>
    %89 = arith.addf %86, %88 : vector<16x32xf32>
    %cst_80 = arith.constant 0.000000e+00 : f32
    %90 = vector.broadcast %cst_80 : f32 to vector<16x32xf32>
    %91 = arith.maximumf %89, %90 : vector<16x32xf32>
    %92 = arith.truncf %91 : vector<16x32xf32> to vector<16x32xbf16>
    %c0_81 = arith.constant 0 : index
    %c0_82 = arith.constant 0 : index
    %c0_83 = arith.constant 0 : index
    %93 = vector.load %arg13[%c0_81, %c0_82, %c0_83] : memref<1x16x32xbf16, #tpu.memory_space<vmem>>, vector<1x16x32xbf16>
    %94 = vector.shape_cast %93 : vector<1x16x32xbf16> to vector<16x32xbf16>
    %95 = vector.shape_cast %92 : vector<16x32xbf16> to vector<1x16x32xbf16>
    tpu.vector_store %arg13[%c0_81, %c0_82, %c0_83], %95 {strides = array<i32>} : memref<1x16x32xbf16, #tpu.memory_space<vmem>>, vector<1x16x32xbf16>,
    %c0_i32_84 = arith.constant 0 : i32
    %96 = arith.cmpi eq, %arg1, %c0_i32_84 : i32
    %97 = arith.extui %96 : i1 to i32
    %c0_i32_85 = arith.constant 0 : i32
    %98 = arith.cmpi ne, %97, %c0_i32_85 : i32
    scf.if %98 {
      %cst_93 = arith.constant 0.000000e+00 : f32
      %107 = vector.broadcast %cst_93 : f32 to vector<1x32xf32>
      %c0_94 = arith.constant 0 : index
      %c0_95 = arith.constant 0 : index
      %108 = vector.load %arg15[%c0_94, %c0_95] : memref<1x32xf32, #tpu.memory_space<vmem>>, vector<1x32xf32>
      tpu.vector_store %arg15[%c0_94, %c0_95], %107 {strides = array<i32>} : memref<1x32xf32, #tpu.memory_space<vmem>>, vector<1x32xf32>,
    } else {
    }
    %c0_86 = arith.constant 0 : index
    %c0_87 = arith.constant 0 : index
    %99 = vector.load %arg15[%c0_86, %c0_87] : memref<1x32xf32, #tpu.memory_space<vmem>>, vector<1x32xf32>
    %cst_88 = arith.constant dense<0.000000e+00> : vector<32xf32>
    %100 = vector.multi_reduction <add>, %91, %cst_88 [0] : vector<16x32xf32> to vector<32xf32>
    %101 = vector.shape_cast %100 : vector<32xf32> to vector<1x32xf32>
    %102 = arith.addf %99, %101 : vector<1x32xf32>
    %c0_89 = arith.constant 0 : index
    %c0_90 = arith.constant 0 : index
    %103 = vector.load %arg15[%c0_89, %c0_90] : memref<1x32xf32, #tpu.memory_space<vmem>>, vector<1x32xf32>
    tpu.vector_store %arg15[%c0_89, %c0_90], %102 {strides = array<i32>} : memref<1x32xf32, #tpu.memory_space<vmem>>, vector<1x32xf32>,
    %c0_i32_91 = arith.constant 0 : i32
    %104 = arith.cmpi eq, %arg1, %c0_i32_91 : i32
    %105 = arith.extui %104 : i1 to i32
    %c0_i32_92 = arith.constant 0 : i32
    %106 = arith.cmpi ne, %105, %c0_i32_92 : i32
    scf.if %106 {
      %c0_93 = arith.constant 0 : index
      %c0_94 = arith.constant 0 : index
      %107 = vector.load %arg15[%c0_93, %c0_94] : memref<1x32xf32, #tpu.memory_space<vmem>>, vector<1x32xf32>
      %cst_95 = arith.constant 6.250000e-02 : f32
      %108 = vector.broadcast %cst_95 : f32 to vector<1x32xf32>
      %109 = arith.mulf %107, %108 : vector<1x32xf32>
      %110 = arith.truncf %109 : vector<1x32xf32> to vector<1x32xbf16>
      %c0_96 = arith.constant 0 : index
      %c0_97 = arith.constant 0 : index
      %111 = vector.load %arg9[%c0_96, %c0_97] : memref<32x4xbf16, #tpu.memory_space<vmem>>, vector<32x4xbf16>
      %cst_98 = arith.constant dense<0.000000e+00> : vector<1x4xf32>
      %112 = tpu.matmul %110, %111, %cst_98 {dimension_numbers = #tpu.dot_dimension_numbers<[1], [0], [0], [1], [0, 0, 1, 1], [], []>} : vector<1x32xbf16>, vector<32x4xbf16>, vector<1x4xf32> -> vector<1x4xf32>
      %c0_99 = arith.constant 0 : index
      %c0_100 = arith.constant 0 : index
      %113 = vector.load %arg10[%c0_99, %c0_100] : memref<1x4xf32, #tpu.memory_space<vmem>>, vector<1x4xf32>
      %114 = arith.addf %112, %113 : vector<1x4xf32>
      %cst_101 = arith.constant 0.000000e+00 : f32
      %115 = vector.broadcast %cst_101 : f32 to vector<1x4xf32>
      %116 = arith.maximumf %114, %115 : vector<1x4xf32>
      %117 = arith.truncf %116 : vector<1x4xf32> to vector<1x4xbf16>
      %c0_102 = arith.constant 0 : index
      %c0_103 = arith.constant 0 : index
      %118 = vector.load %arg11[%c0_102, %c0_103] : memref<4x32xbf16, #tpu.memory_space<vmem>>, vector<4x32xbf16>
      %cst_104 = arith.constant dense<0.000000e+00> : vector<1x32xf32>
      %119 = tpu.matmul %117, %118, %cst_104 {dimension_numbers = #tpu.dot_dimension_numbers<[1], [0], [0], [1], [0, 0, 1, 1], [], []>} : vector<1x4xbf16>, vector<4x32xbf16>, vector<1x32xf32> -> vector<1x32xf32>
      %c0_105 = arith.constant 0 : index
      %c0_106 = arith.constant 0 : index
      %120 = vector.load %arg12[%c0_105, %c0_106] : memref<1x32xf32, #tpu.memory_space<vmem>>, vector<1x32xf32>
      %121 = arith.addf %119, %120 : vector<1x32xf32>
      %122 = arith.negf %121 : vector<1x32xf32>
      %123 = math.exp %122 : vector<1x32xf32>
      %cst_107 = arith.constant 1.000000e+00 : f32
      %124 = vector.broadcast %cst_107 : f32 to vector<1x32xf32>
      %125 = arith.addf %124, %123 : vector<1x32xf32>
      %126 = arith.divf %124, %125 : vector<1x32xf32>
      %c0_108 = arith.constant 0 : index
      %c0_109 = arith.constant 0 : index
      %c0_110 = arith.constant 0 : index
      %127 = vector.load %arg14[%c0_108, %c0_109, %c0_110] : memref<1x1x32xf32, #tpu.memory_space<vmem>>, vector<1x1x32xf32>
      %128 = vector.shape_cast %127 : vector<1x1x32xf32> to vector<1x32xf32>
      %129 = vector.shape_cast %126 : vector<1x32xf32> to vector<1x1x32xf32>
      tpu.vector_store %arg14[%c0_108, %c0_109, %c0_110], %129 {strides = array<i32>} : memref<1x1x32xf32, #tpu.memory_space<vmem>>, vector<1x1x32xf32>,
    } else {
    }
    return
  }
  func.func @transform_0(%arg0: i32, %arg1: i32) -> (i32, i32, i32, i32) {
    %c0_i32 = arith.constant 0 : i32
    %c0_i32_0 = arith.constant 0 : i32
    %c0_i32_1 = arith.constant 0 : i32
    %c0_i32_2 = arith.constant 0 : i32
    return %arg0, %c0_i32, %c0_i32_0, %c0_i32_1 : i32, i32, i32, i32
  }
  func.func @transform_1(%arg0: i32, %arg1: i32) -> (i32, i32, i32, i32) {
    %c0_i32 = arith.constant 0 : i32
    %c0_i32_0 = arith.constant 0 : i32
    %c0_i32_1 = arith.constant 0 : i32
    %c0_i32_2 = arith.constant 0 : i32
    return %arg0, %c0_i32, %c0_i32_0, %c0_i32_1 : i32, i32, i32, i32
  }
  func.func @transform_2(%arg0: i32, %arg1: i32) -> (i32, i32, i32, i32) {
    %c0_i32 = arith.constant 0 : i32
    %c0_i32_0 = arith.constant 0 : i32
    %c0_i32_1 = arith.constant 0 : i32
    %c0_i32_2 = arith.constant 0 : i32
    return %arg0, %c0_i32, %c0_i32_0, %c0_i32_1 : i32, i32, i32, i32
  }
  func.func @transform_3(%arg0: i32, %arg1: i32) -> (i32, i32, i32, i32) {
    %c0_i32 = arith.constant 0 : i32
    %c0_i32_0 = arith.constant 0 : i32
    %c0_i32_1 = arith.constant 0 : i32
    %c0_i32_2 = arith.constant 0 : i32
    return %arg0, %c0_i32, %c0_i32_0, %c0_i32_1 : i32, i32, i32, i32
  }
  func.func @transform_4(%arg0: i32, %arg1: i32) -> (i32, i32, i32, i32) {
    %c0_i32 = arith.constant 0 : i32
    %c0_i32_0 = arith.constant 0 : i32
    %c0_i32_1 = arith.constant 0 : i32
    %c0_i32_2 = arith.constant 0 : i32
    %c0_i32_3 = arith.constant 0 : i32
    return %c0_i32, %c0_i32_0, %c0_i32_1, %c0_i32_2 : i32, i32, i32, i32
  }
  func.func @transform_5(%arg0: i32, %arg1: i32) -> (i32, i32) {
    %c0_i32 = arith.constant 0 : i32
    %c0_i32_0 = arith.constant 0 : i32
    %c0_i32_1 = arith.constant 0 : i32
    return %c0_i32, %c0_i32_0 : i32, i32
  }
  func.func @transform_6(%arg0: i32, %arg1: i32) -> (i32, i32) {
    %c0_i32 = arith.constant 0 : i32
    %c0_i32_0 = arith.constant 0 : i32
    %c0_i32_1 = arith.constant 0 : i32
    return %c0_i32, %c0_i32_0 : i32, i32
  }
  func.func @transform_7(%arg0: i32, %arg1: i32) -> (i32, i32) {
    %c0_i32 = arith.constant 0 : i32
    %c0_i32_0 = arith.constant 0 : i32
    %c0_i32_1 = arith.constant 0 : i32
    return %c0_i32, %c0_i32_0 : i32, i32
  }
  func.func @transform_8(%arg0: i32, %arg1: i32) -> (i32, i32) {
    %c0_i32 = arith.constant 0 : i32
    %c0_i32_0 = arith.constant 0 : i32
    %c0_i32_1 = arith.constant 0 : i32
    return %c0_i32, %c0_i32_0 : i32, i32
  }
  func.func @transform_9(%arg0: i32, %arg1: i32) -> (i32, i32) {
    %c0_i32 = arith.constant 0 : i32
    %c0_i32_0 = arith.constant 0 : i32
    %c0_i32_1 = arith.constant 0 : i32
    return %c0_i32, %c0_i32_0 : i32, i32
  }
  func.func @transform_10(%arg0: i32, %arg1: i32) -> (i32, i32) {
    %c0_i32 = arith.constant 0 : i32
    %c0_i32_0 = arith.constant 0 : i32
    %c0_i32_1 = arith.constant 0 : i32
    return %c0_i32, %c0_i32_0 : i32, i32
  }
  func.func @transform_11(%arg0: i32, %arg1: i32) -> (i32, i32, i32) {
    %c0_i32 = arith.constant 0 : i32
    %c0_i32_0 = arith.constant 0 : i32
    return %arg0, %arg1, %c0_i32 : i32, i32, i32
  }
  func.func @transform_12(%arg0: i32, %arg1: i32) -> (i32, i32, i32) {
    %c0_i32 = arith.constant 0 : i32
    %c0_i32_0 = arith.constant 0 : i32
    %c0_i32_1 = arith.constant 0 : i32
    return %arg0, %c0_i32, %c0_i32_0 : i32, i32, i32
  }
}

module attributes {stable_mosaic.version = 11 : i64} {
  func.func @_head_kernel(%arg0: i32, %arg1: i32, %arg2: memref<1x16x32xbf16, #tpu.memory_space<vmem>>, %arg3: memref<1x1x32xf32, #tpu.memory_space<vmem>>, %arg4: memref<1x16x16xbf16, #tpu.memory_space<vmem>>, %arg5: memref<32x32xbf16, #tpu.memory_space<vmem>>, %arg6: memref<1x32xf32, #tpu.memory_space<vmem>>, %arg7: memref<1x32xf32, #tpu.memory_space<vmem>>, %arg8: memref<16x32xbf16, #tpu.memory_space<vmem>>, %arg9: memref<1x32xf32, #tpu.memory_space<vmem>>, %arg10: memref<1x32xf32, #tpu.memory_space<vmem>>, %arg11: memref<1x16x32xbf16, #tpu.memory_space<vmem>>) attributes {dimension_semantics = [#tpu.dimension_semantics<parallel>, #tpu.dimension_semantics<parallel>], iteration_bounds = array<i64: 2, 1>, scalar_prefetch = 0 : i64, scratch_operands = 0 : i64, tpu.core_type = #tpu.core_type<tc>, window_params = [{transform_indices = @transform_0, window_bounds = array<i64: 1, 16, 32>}, {transform_indices = @transform_1, window_bounds = array<i64: 1, 1, 32>}, {transform_indices = @transform_2, window_bounds = array<i64: 1, 16, 16>}, {pipeline_mode = #tpu.pipeline_mode<synchronous>, transform_indices = @transform_3, window_bounds = array<i64: 32, 32>}, {pipeline_mode = #tpu.pipeline_mode<synchronous>, transform_indices = @transform_4, window_bounds = array<i64: 1, 32>}, {pipeline_mode = #tpu.pipeline_mode<synchronous>, transform_indices = @transform_5, window_bounds = array<i64: 1, 32>}, {pipeline_mode = #tpu.pipeline_mode<synchronous>, transform_indices = @transform_6, window_bounds = array<i64: 16, 32>}, {pipeline_mode = #tpu.pipeline_mode<synchronous>, transform_indices = @transform_7, window_bounds = array<i64: 1, 32>}, {pipeline_mode = #tpu.pipeline_mode<synchronous>, transform_indices = @transform_8, window_bounds = array<i64: 1, 32>}, {transform_indices = @transform_9, window_bounds = array<i64: 1, 16, 32>}]} {
    %c0 = arith.constant 0 : index
    %c0_0 = arith.constant 0 : index
    %c0_1 = arith.constant 0 : index
    %0 = vector.load %arg2[%c0, %c0_0, %c0_1] : memref<1x16x32xbf16, #tpu.memory_space<vmem>>, vector<1x16x32xbf16>
    %1 = vector.shape_cast %0 : vector<1x16x32xbf16> to vector<16x32xbf16>
    %c0_2 = arith.constant 0 : index
    %c0_3 = arith.constant 0 : index
    %c0_4 = arith.constant 0 : index
    %2 = vector.load %arg3[%c0_2, %c0_3, %c0_4] : memref<1x1x32xf32, #tpu.memory_space<vmem>>, vector<1x1x32xf32>
    %3 = vector.shape_cast %2 : vector<1x1x32xf32> to vector<1x32xf32>
    %4 = arith.truncf %3 : vector<1x32xf32> to vector<1x32xbf16>
    %5 = vector.broadcast %4 : vector<1x32xbf16> to vector<16x32xbf16>
    %6 = arith.mulf %1, %5 : vector<16x32xbf16>
    %c0_5 = arith.constant 0 : index
    %c0_6 = arith.constant 0 : index
    %7 = vector.load %arg5[%c0_5, %c0_6] : memref<32x32xbf16, #tpu.memory_space<vmem>>, vector<32x32xbf16>
    %cst = arith.constant dense<0.000000e+00> : vector<16x32xf32>
    %8 = tpu.matmul %6, %7, %cst {dimension_numbers = #tpu.dot_dimension_numbers<[1], [0], [0], [1], [0, 0, 1, 1], [], []>} : vector<16x32xbf16>, vector<32x32xbf16>, vector<16x32xf32> -> vector<16x32xf32>
    %c0_7 = arith.constant 0 : index
    %c0_8 = arith.constant 0 : index
    %9 = vector.load %arg6[%c0_7, %c0_8] : memref<1x32xf32, #tpu.memory_space<vmem>>, vector<1x32xf32>
    %10 = vector.broadcast %9 : vector<1x32xf32> to vector<16x32xf32>
    %11 = arith.mulf %8, %10 : vector<16x32xf32>
    %c0_9 = arith.constant 0 : index
    %c0_10 = arith.constant 0 : index
    %12 = vector.load %arg7[%c0_9, %c0_10] : memref<1x32xf32, #tpu.memory_space<vmem>>, vector<1x32xf32>
    %13 = vector.broadcast %12 : vector<1x32xf32> to vector<16x32xf32>
    %14 = arith.addf %11, %13 : vector<16x32xf32>
    %c0_11 = arith.constant 0 : index
    %c0_12 = arith.constant 0 : index
    %c0_13 = arith.constant 0 : index
    %15 = vector.load %arg4[%c0_11, %c0_12, %c0_13] : memref<1x16x16xbf16, #tpu.memory_space<vmem>>, vector<1x16x16xbf16>
    %16 = vector.shape_cast %15 : vector<1x16x16xbf16> to vector<16x16xbf16>
    %c0_14 = arith.constant 0 : index
    %c0_15 = arith.constant 0 : index
    %17 = vector.load %arg8[%c0_14, %c0_15] : memref<16x32xbf16, #tpu.memory_space<vmem>>, vector<16x32xbf16>
    %cst_16 = arith.constant dense<0.000000e+00> : vector<16x32xf32>
    %18 = tpu.matmul %16, %17, %cst_16 {dimension_numbers = #tpu.dot_dimension_numbers<[1], [0], [0], [1], [0, 0, 1, 1], [], []>} : vector<16x16xbf16>, vector<16x32xbf16>, vector<16x32xf32> -> vector<16x32xf32>
    %c0_17 = arith.constant 0 : index
    %c0_18 = arith.constant 0 : index
    %19 = vector.load %arg9[%c0_17, %c0_18] : memref<1x32xf32, #tpu.memory_space<vmem>>, vector<1x32xf32>
    %20 = vector.broadcast %19 : vector<1x32xf32> to vector<16x32xf32>
    %21 = arith.mulf %18, %20 : vector<16x32xf32>
    %c0_19 = arith.constant 0 : index
    %c0_20 = arith.constant 0 : index
    %22 = vector.load %arg10[%c0_19, %c0_20] : memref<1x32xf32, #tpu.memory_space<vmem>>, vector<1x32xf32>
    %23 = vector.broadcast %22 : vector<1x32xf32> to vector<16x32xf32>
    %24 = arith.addf %21, %23 : vector<16x32xf32>
    %25 = arith.addf %14, %24 : vector<16x32xf32>
    %cst_21 = arith.constant 0.000000e+00 : f32
    %26 = vector.broadcast %cst_21 : f32 to vector<16x32xf32>
    %27 = arith.maximumf %25, %26 : vector<16x32xf32>
    %28 = arith.truncf %27 : vector<16x32xf32> to vector<16x32xbf16>
    %c0_22 = arith.constant 0 : index
    %c0_23 = arith.constant 0 : index
    %c0_24 = arith.constant 0 : index
    %29 = vector.load %arg11[%c0_22, %c0_23, %c0_24] : memref<1x16x32xbf16, #tpu.memory_space<vmem>>, vector<1x16x32xbf16>
    %30 = vector.shape_cast %29 : vector<1x16x32xbf16> to vector<16x32xbf16>
    %31 = vector.shape_cast %28 : vector<16x32xbf16> to vector<1x16x32xbf16>
    tpu.vector_store %arg11[%c0_22, %c0_23, %c0_24], %31 {strides = array<i32>} : memref<1x16x32xbf16, #tpu.memory_space<vmem>>, vector<1x16x32xbf16>,
    return
  }
  func.func @transform_0(%arg0: i32, %arg1: i32) -> (i32, i32, i32) {
    %c0_i32 = arith.constant 0 : i32
    %c0_i32_0 = arith.constant 0 : i32
    return %arg0, %arg1, %c0_i32 : i32, i32, i32
  }
  func.func @transform_1(%arg0: i32, %arg1: i32) -> (i32, i32, i32) {
    %c0_i32 = arith.constant 0 : i32
    %c0_i32_0 = arith.constant 0 : i32
    %c0_i32_1 = arith.constant 0 : i32
    return %arg0, %c0_i32, %c0_i32_0 : i32, i32, i32
  }
  func.func @transform_2(%arg0: i32, %arg1: i32) -> (i32, i32, i32) {
    %c0_i32 = arith.constant 0 : i32
    %c0_i32_0 = arith.constant 0 : i32
    return %arg0, %arg1, %c0_i32 : i32, i32, i32
  }
  func.func @transform_3(%arg0: i32, %arg1: i32) -> (i32, i32) {
    %c0_i32 = arith.constant 0 : i32
    %c0_i32_0 = arith.constant 0 : i32
    %c0_i32_1 = arith.constant 0 : i32
    return %c0_i32, %c0_i32_0 : i32, i32
  }
  func.func @transform_4(%arg0: i32, %arg1: i32) -> (i32, i32) {
    %c0_i32 = arith.constant 0 : i32
    %c0_i32_0 = arith.constant 0 : i32
    %c0_i32_1 = arith.constant 0 : i32
    return %c0_i32, %c0_i32_0 : i32, i32
  }
  func.func @transform_5(%arg0: i32, %arg1: i32) -> (i32, i32) {
    %c0_i32 = arith.constant 0 : i32
    %c0_i32_0 = arith.constant 0 : i32
    %c0_i32_1 = arith.constant 0 : i32
    return %c0_i32, %c0_i32_0 : i32, i32
  }
  func.func @transform_6(%arg0: i32, %arg1: i32) -> (i32, i32) {
    %c0_i32 = arith.constant 0 : i32
    %c0_i32_0 = arith.constant 0 : i32
    %c0_i32_1 = arith.constant 0 : i32
    return %c0_i32, %c0_i32_0 : i32, i32
  }
  func.func @transform_7(%arg0: i32, %arg1: i32) -> (i32, i32) {
    %c0_i32 = arith.constant 0 : i32
    %c0_i32_0 = arith.constant 0 : i32
    %c0_i32_1 = arith.constant 0 : i32
    return %c0_i32, %c0_i32_0 : i32, i32
  }
  func.func @transform_8(%arg0: i32, %arg1: i32) -> (i32, i32) {
    %c0_i32 = arith.constant 0 : i32
    %c0_i32_0 = arith.constant 0 : i32
    %c0_i32_1 = arith.constant 0 : i32
    return %c0_i32, %c0_i32_0 : i32, i32
  }
  func.func @transform_9(%arg0: i32, %arg1: i32) -> (i32, i32, i32) {
    %c0_i32 = arith.constant 0 : i32
    %c0_i32_0 = arith.constant 0 : i32
    return %arg0, %arg1, %c0_i32 : i32, i32, i32
  }
}

module attributes {stable_mosaic.version = 11 : i64} {
  func.func @_pointwise_kernel(%arg0: i32, %arg1: memref<32x32xbf16, #tpu.memory_space<vmem>>, %arg2: memref<32x32xbf16, #tpu.memory_space<vmem>>, %arg3: memref<1x32xf32, #tpu.memory_space<vmem>>, %arg4: memref<1x32xf32, #tpu.memory_space<vmem>>, %arg5: memref<32x32xbf16, #tpu.memory_space<vmem>>) attributes {dimension_semantics = [#tpu.dimension_semantics<parallel>], iteration_bounds = array<i64: 1>, scalar_prefetch = 0 : i64, scratch_operands = 0 : i64, tpu.core_type = #tpu.core_type<tc>, window_params = [{transform_indices = @transform_0, window_bounds = array<i64: 32, 32>}, {pipeline_mode = #tpu.pipeline_mode<synchronous>, transform_indices = @transform_1, window_bounds = array<i64: 32, 32>}, {pipeline_mode = #tpu.pipeline_mode<synchronous>, transform_indices = @transform_2, window_bounds = array<i64: 1, 32>}, {pipeline_mode = #tpu.pipeline_mode<synchronous>, transform_indices = @transform_3, window_bounds = array<i64: 1, 32>}, {transform_indices = @transform_4, window_bounds = array<i64: 32, 32>}]} {
    %c0 = arith.constant 0 : index
    %c0_0 = arith.constant 0 : index
    %0 = vector.load %arg1[%c0, %c0_0] : memref<32x32xbf16, #tpu.memory_space<vmem>>, vector<32x32xbf16>
    %c0_1 = arith.constant 0 : index
    %c0_2 = arith.constant 0 : index
    %1 = vector.load %arg2[%c0_1, %c0_2] : memref<32x32xbf16, #tpu.memory_space<vmem>>, vector<32x32xbf16>
    %cst = arith.constant dense<0.000000e+00> : vector<32x32xf32>
    %2 = tpu.matmul %0, %1, %cst {dimension_numbers = #tpu.dot_dimension_numbers<[1], [0], [0], [1], [0, 0, 1, 1], [], []>} : vector<32x32xbf16>, vector<32x32xbf16>, vector<32x32xf32> -> vector<32x32xf32>
    %c0_3 = arith.constant 0 : index
    %c0_4 = arith.constant 0 : index
    %3 = vector.load %arg3[%c0_3, %c0_4] : memref<1x32xf32, #tpu.memory_space<vmem>>, vector<1x32xf32>
    %4 = vector.broadcast %3 : vector<1x32xf32> to vector<32x32xf32>
    %5 = arith.mulf %2, %4 : vector<32x32xf32>
    %c0_5 = arith.constant 0 : index
    %c0_6 = arith.constant 0 : index
    %6 = vector.load %arg4[%c0_5, %c0_6] : memref<1x32xf32, #tpu.memory_space<vmem>>, vector<1x32xf32>
    %7 = vector.broadcast %6 : vector<1x32xf32> to vector<32x32xf32>
    %8 = arith.addf %5, %7 : vector<32x32xf32>
    %cst_7 = arith.constant 0.000000e+00 : f32
    %9 = vector.broadcast %cst_7 : f32 to vector<32x32xf32>
    %10 = arith.maximumf %8, %9 : vector<32x32xf32>
    %11 = arith.truncf %10 : vector<32x32xf32> to vector<32x32xbf16>
    %c0_8 = arith.constant 0 : index
    %c0_9 = arith.constant 0 : index
    %12 = vector.load %arg5[%c0_8, %c0_9] : memref<32x32xbf16, #tpu.memory_space<vmem>>, vector<32x32xbf16>
    tpu.vector_store %arg5[%c0_8, %c0_9], %11 {strides = array<i32>} : memref<32x32xbf16, #tpu.memory_space<vmem>>, vector<32x32xbf16>,
    return
  }
  func.func @transform_0(%arg0: i32) -> (i32, i32) {
    %c0_i32 = arith.constant 0 : i32
    %c0_i32_0 = arith.constant 0 : i32
    return %arg0, %c0_i32 : i32, i32
  }
  func.func @transform_1(%arg0: i32) -> (i32, i32) {
    %c0_i32 = arith.constant 0 : i32
    %c0_i32_0 = arith.constant 0 : i32
    %c0_i32_1 = arith.constant 0 : i32
    return %c0_i32, %c0_i32_0 : i32, i32
  }
  func.func @transform_2(%arg0: i32) -> (i32, i32) {
    %c0_i32 = arith.constant 0 : i32
    %c0_i32_0 = arith.constant 0 : i32
    %c0_i32_1 = arith.constant 0 : i32
    return %c0_i32, %c0_i32_0 : i32, i32
  }
  func.func @transform_3(%arg0: i32) -> (i32, i32) {
    %c0_i32 = arith.constant 0 : i32
    %c0_i32_0 = arith.constant 0 : i32
    %c0_i32_1 = arith.constant 0 : i32
    return %c0_i32, %c0_i32_0 : i32, i32
  }
  func.func @transform_4(%arg0: i32) -> (i32, i32) {
    %c0_i32 = arith.constant 0 : i32
    %c0_i32_0 = arith.constant 0 : i32
    return %arg0, %c0_i32 : i32, i32
  }
}

module attributes {stable_mosaic.version = 11 : i64} {
  func.func @_head_kernel(%arg0: i32, %arg1: i32, %arg2: memref<1x16x32xbf16, #tpu.memory_space<vmem>>, %arg3: memref<1x1x32xf32, #tpu.memory_space<vmem>>, %arg4: memref<1x16x32xbf16, #tpu.memory_space<vmem>>, %arg5: memref<32x32xbf16, #tpu.memory_space<vmem>>, %arg6: memref<1x32xf32, #tpu.memory_space<vmem>>, %arg7: memref<1x32xf32, #tpu.memory_space<vmem>>, %arg8: memref<1x16x32xbf16, #tpu.memory_space<vmem>>) attributes {dimension_semantics = [#tpu.dimension_semantics<parallel>, #tpu.dimension_semantics<parallel>], iteration_bounds = array<i64: 2, 1>, scalar_prefetch = 0 : i64, scratch_operands = 0 : i64, tpu.core_type = #tpu.core_type<tc>, window_params = [{transform_indices = @transform_0, window_bounds = array<i64: 1, 16, 32>}, {transform_indices = @transform_1, window_bounds = array<i64: 1, 1, 32>}, {transform_indices = @transform_2, window_bounds = array<i64: 1, 16, 32>}, {pipeline_mode = #tpu.pipeline_mode<synchronous>, transform_indices = @transform_3, window_bounds = array<i64: 32, 32>}, {pipeline_mode = #tpu.pipeline_mode<synchronous>, transform_indices = @transform_4, window_bounds = array<i64: 1, 32>}, {pipeline_mode = #tpu.pipeline_mode<synchronous>, transform_indices = @transform_5, window_bounds = array<i64: 1, 32>}, {transform_indices = @transform_6, window_bounds = array<i64: 1, 16, 32>}]} {
    %c0 = arith.constant 0 : index
    %c0_0 = arith.constant 0 : index
    %c0_1 = arith.constant 0 : index
    %0 = vector.load %arg2[%c0, %c0_0, %c0_1] : memref<1x16x32xbf16, #tpu.memory_space<vmem>>, vector<1x16x32xbf16>
    %1 = vector.shape_cast %0 : vector<1x16x32xbf16> to vector<16x32xbf16>
    %c0_2 = arith.constant 0 : index
    %c0_3 = arith.constant 0 : index
    %c0_4 = arith.constant 0 : index
    %2 = vector.load %arg3[%c0_2, %c0_3, %c0_4] : memref<1x1x32xf32, #tpu.memory_space<vmem>>, vector<1x1x32xf32>
    %3 = vector.shape_cast %2 : vector<1x1x32xf32> to vector<1x32xf32>
    %4 = arith.truncf %3 : vector<1x32xf32> to vector<1x32xbf16>
    %5 = vector.broadcast %4 : vector<1x32xbf16> to vector<16x32xbf16>
    %6 = arith.mulf %1, %5 : vector<16x32xbf16>
    %c0_5 = arith.constant 0 : index
    %c0_6 = arith.constant 0 : index
    %7 = vector.load %arg5[%c0_5, %c0_6] : memref<32x32xbf16, #tpu.memory_space<vmem>>, vector<32x32xbf16>
    %cst = arith.constant dense<0.000000e+00> : vector<16x32xf32>
    %8 = tpu.matmul %6, %7, %cst {dimension_numbers = #tpu.dot_dimension_numbers<[1], [0], [0], [1], [0, 0, 1, 1], [], []>} : vector<16x32xbf16>, vector<32x32xbf16>, vector<16x32xf32> -> vector<16x32xf32>
    %c0_7 = arith.constant 0 : index
    %c0_8 = arith.constant 0 : index
    %9 = vector.load %arg6[%c0_7, %c0_8] : memref<1x32xf32, #tpu.memory_space<vmem>>, vector<1x32xf32>
    %10 = vector.broadcast %9 : vector<1x32xf32> to vector<16x32xf32>
    %11 = arith.mulf %8, %10 : vector<16x32xf32>
    %c0_9 = arith.constant 0 : index
    %c0_10 = arith.constant 0 : index
    %12 = vector.load %arg7[%c0_9, %c0_10] : memref<1x32xf32, #tpu.memory_space<vmem>>, vector<1x32xf32>
    %13 = vector.broadcast %12 : vector<1x32xf32> to vector<16x32xf32>
    %14 = arith.addf %11, %13 : vector<16x32xf32>
    %c0_11 = arith.constant 0 : index
    %c0_12 = arith.constant 0 : index
    %c0_13 = arith.constant 0 : index
    %15 = vector.load %arg4[%c0_11, %c0_12, %c0_13] : memref<1x16x32xbf16, #tpu.memory_space<vmem>>, vector<1x16x32xbf16>
    %16 = vector.shape_cast %15 : vector<1x16x32xbf16> to vector<16x32xbf16>
    %17 = arith.extf %16 : vector<16x32xbf16> to vector<16x32xf32>
    %18 = arith.addf %14, %17 : vector<16x32xf32>
    %cst_14 = arith.constant 0.000000e+00 : f32
    %19 = vector.broadcast %cst_14 : f32 to vector<16x32xf32>
    %20 = arith.maximumf %18, %19 : vector<16x32xf32>
    %21 = arith.truncf %20 : vector<16x32xf32> to vector<16x32xbf16>
    %c0_15 = arith.constant 0 : index
    %c0_16 = arith.constant 0 : index
    %c0_17 = arith.constant 0 : index
    %22 = vector.load %arg8[%c0_15, %c0_16, %c0_17] : memref<1x16x32xbf16, #tpu.memory_space<vmem>>, vector<1x16x32xbf16>
    %23 = vector.shape_cast %22 : vector<1x16x32xbf16> to vector<16x32xbf16>
    %24 = vector.shape_cast %21 : vector<16x32xbf16> to vector<1x16x32xbf16>
    tpu.vector_store %arg8[%c0_15, %c0_16, %c0_17], %24 {strides = array<i32>} : memref<1x16x32xbf16, #tpu.memory_space<vmem>>, vector<1x16x32xbf16>,
    return
  }
  func.func @transform_0(%arg0: i32, %arg1: i32) -> (i32, i32, i32) {
    %c0_i32 = arith.constant 0 : i32
    %c0_i32_0 = arith.constant 0 : i32
    return %arg0, %arg1, %c0_i32 : i32, i32, i32
  }
  func.func @transform_1(%arg0: i32, %arg1: i32) -> (i32, i32, i32) {
    %c0_i32 = arith.constant 0 : i32
    %c0_i32_0 = arith.constant 0 : i32
    %c0_i32_1 = arith.constant 0 : i32
    return %arg0, %c0_i32, %c0_i32_0 : i32, i32, i32
  }
  func.func @transform_2(%arg0: i32, %arg1: i32) -> (i32, i32, i32) {
    %c0_i32 = arith.constant 0 : i32
    %c0_i32_0 = arith.constant 0 : i32
    return %arg0, %arg1, %c0_i32 : i32, i32, i32
  }
  func.func @transform_3(%arg0: i32, %arg1: i32) -> (i32, i32) {
    %c0_i32 = arith.constant 0 : i32
    %c0_i32_0 = arith.constant 0 : i32
    %c0_i32_1 = arith.constant 0 : i32
    return %c0_i32, %c0_i32_0 : i32, i32
  }
  func.func @transform_4(%arg0: i32, %arg1: i32) -> (i32, i32) {
    %c0_i32 = arith.constant 0 : i32
    %c0_i32_0 = arith.constant 0 : i32
    %c0_i32_1 = arith.constant 0 : i32
    return %c0_i32, %c0_i32_0 : i32, i32
  }
  func.func @transform_5(%arg0: i32, %arg1: i32) -> (i32, i32) {
    %c0_i32 = arith.constant 0 : i32
    %c0_i32_0 = arith.constant 0 : i32
    %c0_i32_1 = arith.constant 0 : i32
    return %c0_i32, %c0_i32_0 : i32, i32
  }
  func.func @transform_6(%arg0: i32, %arg1: i32) -> (i32, i32, i32) {
    %c0_i32 = arith.constant 0 : i32
    %c0_i32_0 = arith.constant 0 : i32
    return %arg0, %arg1, %c0_i32 : i32, i32, i32
  }
}

module attributes {stable_mosaic.version = 11 : i64} {
  func.func @_conv3x3_kernel(%arg0: i32, %arg1: i32, %arg2: memref<1x6x6x32xbf16, #tpu.memory_space<vmem>>, %arg3: memref<3x3x32x32xbf16, #tpu.memory_space<vmem>>, %arg4: memref<1x32xf32, #tpu.memory_space<vmem>>, %arg5: memref<1x32xf32, #tpu.memory_space<vmem>>, %arg6: memref<32x8xbf16, #tpu.memory_space<vmem>>, %arg7: memref<1x8xf32, #tpu.memory_space<vmem>>, %arg8: memref<8x32xbf16, #tpu.memory_space<vmem>>, %arg9: memref<1x32xf32, #tpu.memory_space<vmem>>, %arg10: memref<1x16x32xbf16, #tpu.memory_space<vmem>>, %arg11: memref<1x1x32xf32, #tpu.memory_space<vmem>>, %arg12: memref<1x32xf32, #tpu.memory_space<vmem>>) attributes {dimension_semantics = [#tpu.dimension_semantics<parallel>, #tpu.dimension_semantics<arbitrary>], iteration_bounds = array<i64: 2, 1>, scalar_prefetch = 0 : i64, scratch_operands = 1 : i64, tpu.core_type = #tpu.core_type<tc>, window_params = [{transform_indices = @transform_0, window_bounds = array<i64: 1, 6, 6, 32>}, {pipeline_mode = #tpu.pipeline_mode<synchronous>, transform_indices = @transform_1, window_bounds = array<i64: 3, 3, 32, 32>}, {pipeline_mode = #tpu.pipeline_mode<synchronous>, transform_indices = @transform_2, window_bounds = array<i64: 1, 32>}, {pipeline_mode = #tpu.pipeline_mode<synchronous>, transform_indices = @transform_3, window_bounds = array<i64: 1, 32>}, {pipeline_mode = #tpu.pipeline_mode<synchronous>, transform_indices = @transform_4, window_bounds = array<i64: 32, 8>}, {pipeline_mode = #tpu.pipeline_mode<synchronous>, transform_indices = @transform_5, window_bounds = array<i64: 1, 8>}, {pipeline_mode = #tpu.pipeline_mode<synchronous>, transform_indices = @transform_6, window_bounds = array<i64: 8, 32>}, {pipeline_mode = #tpu.pipeline_mode<synchronous>, transform_indices = @transform_7, window_bounds = array<i64: 1, 32>}, {transform_indices = @transform_8, window_bounds = array<i64: 1, 16, 32>}, {transform_indices = @transform_9, window_bounds = array<i64: 1, 1, 32>}]} {
    %c4_i32 = arith.constant 4 : i32
    %0 = arith.muli %arg1, %c4_i32 : i32
    %1 = tpu.assume_multiple %0, 4 : i32
    %cst = arith.constant 0.000000e+00 : f32
    %2 = vector.broadcast %cst : f32 to vector<16x32xf32>
    %c0_i32 = arith.constant 0 : i32
    %3 = arith.addi %1, %c0_i32 : i32
    %c0 = arith.constant 0 : index
    %4 = arith.index_cast %3 : i32 to index
    %c0_0 = arith.constant 0 : index
    %c0_1 = arith.constant 0 : index
    %5 = vector.load %arg2[%c0, %4, %c0_0, %c0_1] : memref<1x6x6x32xbf16, #tpu.memory_space<vmem>>, vector<1x4x4x32xbf16>
    %6 = vector.shape_cast %5 : vector<1x4x4x32xbf16> to vector<4x4x32xbf16>
    %7 = vector.shape_cast %6 : vector<4x4x32xbf16> to vector<16x32xbf16>
    %c0_2 = arith.constant 0 : index
    %c0_3 = arith.constant 0 : index
    %c0_4 = arith.constant 0 : index
    %c0_5 = arith.constant 0 : index
    %8 = vector.load %arg3[%c0_2, %c0_3, %c0_4, %c0_5] : memref<3x3x32x32xbf16, #tpu.memory_space<vmem>>, vector<1x1x32x32xbf16>
    %9 = vector.shape_cast %8 : vector<1x1x32x32xbf16> to vector<32x32xbf16>
    %cst_6 = arith.constant dense<0.000000e+00> : vector<16x32xf32>
    %10 = tpu.matmul %7, %9, %cst_6 {dimension_numbers = #tpu.dot_dimension_numbers<[1], [0], [0], [1], [0, 0, 1, 1], [], []>} : vector<16x32xbf16>, vector<32x32xbf16>, vector<16x32xf32> -> vector<16x32xf32>
    %11 = arith.addf %2, %10 : vector<16x32xf32>
    %c0_i32_7 = arith.constant 0 : i32
    %12 = arith.addi %1, %c0_i32_7 : i32
    %c0_8 = arith.constant 0 : index
    %13 = arith.index_cast %12 : i32 to index
    %c1 = arith.constant 1 : index
    %c0_9 = arith.constant 0 : index
    %14 = vector.load %arg2[%c0_8, %13, %c1, %c0_9] : memref<1x6x6x32xbf16, #tpu.memory_space<vmem>>, vector<1x4x4x32xbf16>
    %15 = vector.shape_cast %14 : vector<1x4x4x32xbf16> to vector<4x4x32xbf16>
    %16 = vector.shape_cast %15 : vector<4x4x32xbf16> to vector<16x32xbf16>
    %c0_10 = arith.constant 0 : index
    %c1_11 = arith.constant 1 : index
    %c0_12 = arith.constant 0 : index
    %c0_13 = arith.constant 0 : index
    %17 = vector.load %arg3[%c0_10, %c1_11, %c0_12, %c0_13] : memref<3x3x32x32xbf16, #tpu.memory_space<vmem>>, vector<1x1x32x32xbf16>
    %18 = vector.shape_cast %17 : vector<1x1x32x32xbf16> to vector<32x32xbf16>
    %cst_14 = arith.constant dense<0.000000e+00> : vector<16x32xf32>
    %19 = tpu.matmul %16, %18, %cst_14 {dimension_numbers = #tpu.dot_dimension_numbers<[1], [0], [0], [1], [0, 0, 1, 1], [], []>} : vector<16x32xbf16>, vector<32x32xbf16>, vector<16x32xf32> -> vector<16x32xf32>
    %20 = arith.addf %11, %19 : vector<16x32xf32>
    %c0_i32_15 = arith.constant 0 : i32
    %21 = arith.addi %1, %c0_i32_15 : i32
    %c0_16 = arith.constant 0 : index
    %22 = arith.index_cast %21 : i32 to index
    %c2 = arith.constant 2 : index
    %c0_17 = arith.constant 0 : index
    %23 = vector.load %arg2[%c0_16, %22, %c2, %c0_17] : memref<1x6x6x32xbf16, #tpu.memory_space<vmem>>, vector<1x4x4x32xbf16>
    %24 = vector.shape_cast %23 : vector<1x4x4x32xbf16> to vector<4x4x32xbf16>
    %25 = vector.shape_cast %24 : vector<4x4x32xbf16> to vector<16x32xbf16>
    %c0_18 = arith.constant 0 : index
    %c2_19 = arith.constant 2 : index
    %c0_20 = arith.constant 0 : index
    %c0_21 = arith.constant 0 : index
    %26 = vector.load %arg3[%c0_18, %c2_19, %c0_20, %c0_21] : memref<3x3x32x32xbf16, #tpu.memory_space<vmem>>, vector<1x1x32x32xbf16>
    %27 = vector.shape_cast %26 : vector<1x1x32x32xbf16> to vector<32x32xbf16>
    %cst_22 = arith.constant dense<0.000000e+00> : vector<16x32xf32>
    %28 = tpu.matmul %25, %27, %cst_22 {dimension_numbers = #tpu.dot_dimension_numbers<[1], [0], [0], [1], [0, 0, 1, 1], [], []>} : vector<16x32xbf16>, vector<32x32xbf16>, vector<16x32xf32> -> vector<16x32xf32>
    %29 = arith.addf %20, %28 : vector<16x32xf32>
    %c1_i32 = arith.constant 1 : i32
    %30 = arith.addi %1, %c1_i32 : i32
    %c0_23 = arith.constant 0 : index
    %31 = arith.index_cast %30 : i32 to index
    %c0_24 = arith.constant 0 : index
    %c0_25 = arith.constant 0 : index
    %32 = vector.load %arg2[%c0_23, %31, %c0_24, %c0_25] : memref<1x6x6x32xbf16, #tpu.memory_space<vmem>>, vector<1x4x4x32xbf16>
    %33 = vector.shape_cast %32 : vector<1x4x4x32xbf16> to vector<4x4x32xbf16>
    %34 = vector.shape_cast %33 : vector<4x4x32xbf16> to vector<16x32xbf16>
    %c1_26 = arith.constant 1 : index
    %c0_27 = arith.constant 0 : index
    %c0_28 = arith.constant 0 : index
    %c0_29 = arith.constant 0 : index
    %35 = vector.load %arg3[%c1_26, %c0_27, %c0_28, %c0_29] : memref<3x3x32x32xbf16, #tpu.memory_space<vmem>>, vector<1x1x32x32xbf16>
    %36 = vector.shape_cast %35 : vector<1x1x32x32xbf16> to vector<32x32xbf16>
    %cst_30 = arith.constant dense<0.000000e+00> : vector<16x32xf32>
    %37 = tpu.matmul %34, %36, %cst_30 {dimension_numbers = #tpu.dot_dimension_numbers<[1], [0], [0], [1], [0, 0, 1, 1], [], []>} : vector<16x32xbf16>, vector<32x32xbf16>, vector<16x32xf32> -> vector<16x32xf32>
    %38 = arith.addf %29, %37 : vector<16x32xf32>
    %c1_i32_31 = arith.constant 1 : i32
    %39 = arith.addi %1, %c1_i32_31 : i32
    %c0_32 = arith.constant 0 : index
    %40 = arith.index_cast %39 : i32 to index
    %c1_33 = arith.constant 1 : index
    %c0_34 = arith.constant 0 : index
    %41 = vector.load %arg2[%c0_32, %40, %c1_33, %c0_34] : memref<1x6x6x32xbf16, #tpu.memory_space<vmem>>, vector<1x4x4x32xbf16>
    %42 = vector.shape_cast %41 : vector<1x4x4x32xbf16> to vector<4x4x32xbf16>
    %43 = vector.shape_cast %42 : vector<4x4x32xbf16> to vector<16x32xbf16>
    %c1_35 = arith.constant 1 : index
    %c1_36 = arith.constant 1 : index
    %c0_37 = arith.constant 0 : index
    %c0_38 = arith.constant 0 : index
    %44 = vector.load %arg3[%c1_35, %c1_36, %c0_37, %c0_38] : memref<3x3x32x32xbf16, #tpu.memory_space<vmem>>, vector<1x1x32x32xbf16>
    %45 = vector.shape_cast %44 : vector<1x1x32x32xbf16> to vector<32x32xbf16>
    %cst_39 = arith.constant dense<0.000000e+00> : vector<16x32xf32>
    %46 = tpu.matmul %43, %45, %cst_39 {dimension_numbers = #tpu.dot_dimension_numbers<[1], [0], [0], [1], [0, 0, 1, 1], [], []>} : vector<16x32xbf16>, vector<32x32xbf16>, vector<16x32xf32> -> vector<16x32xf32>
    %47 = arith.addf %38, %46 : vector<16x32xf32>
    %c1_i32_40 = arith.constant 1 : i32
    %48 = arith.addi %1, %c1_i32_40 : i32
    %c0_41 = arith.constant 0 : index
    %49 = arith.index_cast %48 : i32 to index
    %c2_42 = arith.constant 2 : index
    %c0_43 = arith.constant 0 : index
    %50 = vector.load %arg2[%c0_41, %49, %c2_42, %c0_43] : memref<1x6x6x32xbf16, #tpu.memory_space<vmem>>, vector<1x4x4x32xbf16>
    %51 = vector.shape_cast %50 : vector<1x4x4x32xbf16> to vector<4x4x32xbf16>
    %52 = vector.shape_cast %51 : vector<4x4x32xbf16> to vector<16x32xbf16>
    %c1_44 = arith.constant 1 : index
    %c2_45 = arith.constant 2 : index
    %c0_46 = arith.constant 0 : index
    %c0_47 = arith.constant 0 : index
    %53 = vector.load %arg3[%c1_44, %c2_45, %c0_46, %c0_47] : memref<3x3x32x32xbf16, #tpu.memory_space<vmem>>, vector<1x1x32x32xbf16>
    %54 = vector.shape_cast %53 : vector<1x1x32x32xbf16> to vector<32x32xbf16>
    %cst_48 = arith.constant dense<0.000000e+00> : vector<16x32xf32>
    %55 = tpu.matmul %52, %54, %cst_48 {dimension_numbers = #tpu.dot_dimension_numbers<[1], [0], [0], [1], [0, 0, 1, 1], [], []>} : vector<16x32xbf16>, vector<32x32xbf16>, vector<16x32xf32> -> vector<16x32xf32>
    %56 = arith.addf %47, %55 : vector<16x32xf32>
    %c2_i32 = arith.constant 2 : i32
    %57 = arith.addi %1, %c2_i32 : i32
    %c0_49 = arith.constant 0 : index
    %58 = arith.index_cast %57 : i32 to index
    %c0_50 = arith.constant 0 : index
    %c0_51 = arith.constant 0 : index
    %59 = vector.load %arg2[%c0_49, %58, %c0_50, %c0_51] : memref<1x6x6x32xbf16, #tpu.memory_space<vmem>>, vector<1x4x4x32xbf16>
    %60 = vector.shape_cast %59 : vector<1x4x4x32xbf16> to vector<4x4x32xbf16>
    %61 = vector.shape_cast %60 : vector<4x4x32xbf16> to vector<16x32xbf16>
    %c2_52 = arith.constant 2 : index
    %c0_53 = arith.constant 0 : index
    %c0_54 = arith.constant 0 : index
    %c0_55 = arith.constant 0 : index
    %62 = vector.load %arg3[%c2_52, %c0_53, %c0_54, %c0_55] : memref<3x3x32x32xbf16, #tpu.memory_space<vmem>>, vector<1x1x32x32xbf16>
    %63 = vector.shape_cast %62 : vector<1x1x32x32xbf16> to vector<32x32xbf16>
    %cst_56 = arith.constant dense<0.000000e+00> : vector<16x32xf32>
    %64 = tpu.matmul %61, %63, %cst_56 {dimension_numbers = #tpu.dot_dimension_numbers<[1], [0], [0], [1], [0, 0, 1, 1], [], []>} : vector<16x32xbf16>, vector<32x32xbf16>, vector<16x32xf32> -> vector<16x32xf32>
    %65 = arith.addf %56, %64 : vector<16x32xf32>
    %c2_i32_57 = arith.constant 2 : i32
    %66 = arith.addi %1, %c2_i32_57 : i32
    %c0_58 = arith.constant 0 : index
    %67 = arith.index_cast %66 : i32 to index
    %c1_59 = arith.constant 1 : index
    %c0_60 = arith.constant 0 : index
    %68 = vector.load %arg2[%c0_58, %67, %c1_59, %c0_60] : memref<1x6x6x32xbf16, #tpu.memory_space<vmem>>, vector<1x4x4x32xbf16>
    %69 = vector.shape_cast %68 : vector<1x4x4x32xbf16> to vector<4x4x32xbf16>
    %70 = vector.shape_cast %69 : vector<4x4x32xbf16> to vector<16x32xbf16>
    %c2_61 = arith.constant 2 : index
    %c1_62 = arith.constant 1 : index
    %c0_63 = arith.constant 0 : index
    %c0_64 = arith.constant 0 : index
    %71 = vector.load %arg3[%c2_61, %c1_62, %c0_63, %c0_64] : memref<3x3x32x32xbf16, #tpu.memory_space<vmem>>, vector<1x1x32x32xbf16>
    %72 = vector.shape_cast %71 : vector<1x1x32x32xbf16> to vector<32x32xbf16>
    %cst_65 = arith.constant dense<0.000000e+00> : vector<16x32xf32>
    %73 = tpu.matmul %70, %72, %cst_65 {dimension_numbers = #tpu.dot_dimension_numbers<[1], [0], [0], [1], [0, 0, 1, 1], [], []>} : vector<16x32xbf16>, vector<32x32xbf16>, vector<16x32xf32> -> vector<16x32xf32>
    %74 = arith.addf %65, %73 : vector<16x32xf32>
    %c2_i32_66 = arith.constant 2 : i32
    %75 = arith.addi %1, %c2_i32_66 : i32
    %c0_67 = arith.constant 0 : index
    %76 = arith.index_cast %75 : i32 to index
    %c2_68 = arith.constant 2 : index
    %c0_69 = arith.constant 0 : index
    %77 = vector.load %arg2[%c0_67, %76, %c2_68, %c0_69] : memref<1x6x6x32xbf16, #tpu.memory_space<vmem>>, vector<1x4x4x32xbf16>
    %78 = vector.shape_cast %77 : vector<1x4x4x32xbf16> to vector<4x4x32xbf16>
    %79 = vector.shape_cast %78 : vector<4x4x32xbf16> to vector<16x32xbf16>
    %c2_70 = arith.constant 2 : index
    %c2_71 = arith.constant 2 : index
    %c0_72 = arith.constant 0 : index
    %c0_73 = arith.constant 0 : index
    %80 = vector.load %arg3[%c2_70, %c2_71, %c0_72, %c0_73] : memref<3x3x32x32xbf16, #tpu.memory_space<vmem>>, vector<1x1x32x32xbf16>
    %81 = vector.shape_cast %80 : vector<1x1x32x32xbf16> to vector<32x32xbf16>
    %cst_74 = arith.constant dense<0.000000e+00> : vector<16x32xf32>
    %82 = tpu.matmul %79, %81, %cst_74 {dimension_numbers = #tpu.dot_dimension_numbers<[1], [0], [0], [1], [0, 0, 1, 1], [], []>} : vector<16x32xbf16>, vector<32x32xbf16>, vector<16x32xf32> -> vector<16x32xf32>
    %83 = arith.addf %74, %82 : vector<16x32xf32>
    %c0_75 = arith.constant 0 : index
    %c0_76 = arith.constant 0 : index
    %84 = vector.load %arg4[%c0_75, %c0_76] : memref<1x32xf32, #tpu.memory_space<vmem>>, vector<1x32xf32>
    %85 = vector.broadcast %84 : vector<1x32xf32> to vector<16x32xf32>
    %86 = arith.mulf %83, %85 : vector<16x32xf32>
    %c0_77 = arith.constant 0 : index
    %c0_78 = arith.constant 0 : index
    %87 = vector.load %arg5[%c0_77, %c0_78] : memref<1x32xf32, #tpu.memory_space<vmem>>, vector<1x32xf32>
    %88 = vector.broadcast %87 : vector<1x32xf32> to vector<16x32xf32>
    %89 = arith.addf %86, %88 : vector<16x32xf32>
    %cst_79 = arith.constant 0.000000e+00 : f32
    %90 = vector.broadcast %cst_79 : f32 to vector<16x32xf32>
    %91 = arith.maximumf %89, %90 : vector<16x32xf32>
    %92 = arith.truncf %91 : vector<16x32xf32> to vector<16x32xbf16>
    %c0_80 = arith.constant 0 : index
    %c0_81 = arith.constant 0 : index
    %c0_82 = arith.constant 0 : index
    %93 = vector.load %arg10[%c0_80, %c0_81, %c0_82] : memref<1x16x32xbf16, #tpu.memory_space<vmem>>, vector<1x16x32xbf16>
    %94 = vector.shape_cast %93 : vector<1x16x32xbf16> to vector<16x32xbf16>
    %95 = vector.shape_cast %92 : vector<16x32xbf16> to vector<1x16x32xbf16>
    tpu.vector_store %arg10[%c0_80, %c0_81, %c0_82], %95 {strides = array<i32>} : memref<1x16x32xbf16, #tpu.memory_space<vmem>>, vector<1x16x32xbf16>,
    %c0_i32_83 = arith.constant 0 : i32
    %96 = arith.cmpi eq, %arg1, %c0_i32_83 : i32
    %97 = arith.extui %96 : i1 to i32
    %c0_i32_84 = arith.constant 0 : i32
    %98 = arith.cmpi ne, %97, %c0_i32_84 : i32
    scf.if %98 {
      %cst_92 = arith.constant 0.000000e+00 : f32
      %107 = vector.broadcast %cst_92 : f32 to vector<1x32xf32>
      %c0_93 = arith.constant 0 : index
      %c0_94 = arith.constant 0 : index
      %108 = vector.load %arg12[%c0_93, %c0_94] : memref<1x32xf32, #tpu.memory_space<vmem>>, vector<1x32xf32>
      tpu.vector_store %arg12[%c0_93, %c0_94], %107 {strides = array<i32>} : memref<1x32xf32, #tpu.memory_space<vmem>>, vector<1x32xf32>,
    } else {
    }
    %c0_85 = arith.constant 0 : index
    %c0_86 = arith.constant 0 : index
    %99 = vector.load %arg12[%c0_85, %c0_86] : memref<1x32xf32, #tpu.memory_space<vmem>>, vector<1x32xf32>
    %cst_87 = arith.constant dense<0.000000e+00> : vector<32xf32>
    %100 = vector.multi_reduction <add>, %91, %cst_87 [0] : vector<16x32xf32> to vector<32xf32>
    %101 = vector.shape_cast %100 : vector<32xf32> to vector<1x32xf32>
    %102 = arith.addf %99, %101 : vector<1x32xf32>
    %c0_88 = arith.constant 0 : index
    %c0_89 = arith.constant 0 : index
    %103 = vector.load %arg12[%c0_88, %c0_89] : memref<1x32xf32, #tpu.memory_space<vmem>>, vector<1x32xf32>
    tpu.vector_store %arg12[%c0_88, %c0_89], %102 {strides = array<i32>} : memref<1x32xf32, #tpu.memory_space<vmem>>, vector<1x32xf32>,
    %c0_i32_90 = arith.constant 0 : i32
    %104 = arith.cmpi eq, %arg1, %c0_i32_90 : i32
    %105 = arith.extui %104 : i1 to i32
    %c0_i32_91 = arith.constant 0 : i32
    %106 = arith.cmpi ne, %105, %c0_i32_91 : i32
    scf.if %106 {
      %c0_92 = arith.constant 0 : index
      %c0_93 = arith.constant 0 : index
      %107 = vector.load %arg12[%c0_92, %c0_93] : memref<1x32xf32, #tpu.memory_space<vmem>>, vector<1x32xf32>
      %cst_94 = arith.constant 6.250000e-02 : f32
      %108 = vector.broadcast %cst_94 : f32 to vector<1x32xf32>
      %109 = arith.mulf %107, %108 : vector<1x32xf32>
      %110 = arith.truncf %109 : vector<1x32xf32> to vector<1x32xbf16>
      %c0_95 = arith.constant 0 : index
      %c0_96 = arith.constant 0 : index
      %111 = vector.load %arg6[%c0_95, %c0_96] : memref<32x8xbf16, #tpu.memory_space<vmem>>, vector<32x8xbf16>
      %cst_97 = arith.constant dense<0.000000e+00> : vector<1x8xf32>
      %112 = tpu.matmul %110, %111, %cst_97 {dimension_numbers = #tpu.dot_dimension_numbers<[1], [0], [0], [1], [0, 0, 1, 1], [], []>} : vector<1x32xbf16>, vector<32x8xbf16>, vector<1x8xf32> -> vector<1x8xf32>
      %c0_98 = arith.constant 0 : index
      %c0_99 = arith.constant 0 : index
      %113 = vector.load %arg7[%c0_98, %c0_99] : memref<1x8xf32, #tpu.memory_space<vmem>>, vector<1x8xf32>
      %114 = arith.addf %112, %113 : vector<1x8xf32>
      %cst_100 = arith.constant 0.000000e+00 : f32
      %115 = vector.broadcast %cst_100 : f32 to vector<1x8xf32>
      %116 = arith.maximumf %114, %115 : vector<1x8xf32>
      %117 = arith.truncf %116 : vector<1x8xf32> to vector<1x8xbf16>
      %c0_101 = arith.constant 0 : index
      %c0_102 = arith.constant 0 : index
      %118 = vector.load %arg8[%c0_101, %c0_102] : memref<8x32xbf16, #tpu.memory_space<vmem>>, vector<8x32xbf16>
      %cst_103 = arith.constant dense<0.000000e+00> : vector<1x32xf32>
      %119 = tpu.matmul %117, %118, %cst_103 {dimension_numbers = #tpu.dot_dimension_numbers<[1], [0], [0], [1], [0, 0, 1, 1], [], []>} : vector<1x8xbf16>, vector<8x32xbf16>, vector<1x32xf32> -> vector<1x32xf32>
      %c0_104 = arith.constant 0 : index
      %c0_105 = arith.constant 0 : index
      %120 = vector.load %arg9[%c0_104, %c0_105] : memref<1x32xf32, #tpu.memory_space<vmem>>, vector<1x32xf32>
      %121 = arith.addf %119, %120 : vector<1x32xf32>
      %122 = arith.negf %121 : vector<1x32xf32>
      %123 = math.exp %122 : vector<1x32xf32>
      %cst_106 = arith.constant 1.000000e+00 : f32
      %124 = vector.broadcast %cst_106 : f32 to vector<1x32xf32>
      %125 = arith.addf %124, %123 : vector<1x32xf32>
      %126 = arith.divf %124, %125 : vector<1x32xf32>
      %c0_107 = arith.constant 0 : index
      %c0_108 = arith.constant 0 : index
      %c0_109 = arith.constant 0 : index
      %127 = vector.load %arg11[%c0_107, %c0_108, %c0_109] : memref<1x1x32xf32, #tpu.memory_space<vmem>>, vector<1x1x32xf32>
      %128 = vector.shape_cast %127 : vector<1x1x32xf32> to vector<1x32xf32>
      %129 = vector.shape_cast %126 : vector<1x32xf32> to vector<1x1x32xf32>
      tpu.vector_store %arg11[%c0_107, %c0_108, %c0_109], %129 {strides = array<i32>} : memref<1x1x32xf32, #tpu.memory_space<vmem>>, vector<1x1x32xf32>,
    } else {
    }
    return
  }
  func.func @transform_0(%arg0: i32, %arg1: i32) -> (i32, i32, i32, i32) {
    %c0_i32 = arith.constant 0 : i32
    %c0_i32_0 = arith.constant 0 : i32
    %c0_i32_1 = arith.constant 0 : i32
    %c0_i32_2 = arith.constant 0 : i32
    return %arg0, %c0_i32, %c0_i32_0, %c0_i32_1 : i32, i32, i32, i32
  }
  func.func @transform_1(%arg0: i32, %arg1: i32) -> (i32, i32, i32, i32) {
    %c0_i32 = arith.constant 0 : i32
    %c0_i32_0 = arith.constant 0 : i32
    %c0_i32_1 = arith.constant 0 : i32
    %c0_i32_2 = arith.constant 0 : i32
    %c0_i32_3 = arith.constant 0 : i32
    return %c0_i32, %c0_i32_0, %c0_i32_1, %c0_i32_2 : i32, i32, i32, i32
  }
  func.func @transform_2(%arg0: i32, %arg1: i32) -> (i32, i32) {
    %c0_i32 = arith.constant 0 : i32
    %c0_i32_0 = arith.constant 0 : i32
    %c0_i32_1 = arith.constant 0 : i32
    return %c0_i32, %c0_i32_0 : i32, i32
  }
  func.func @transform_3(%arg0: i32, %arg1: i32) -> (i32, i32) {
    %c0_i32 = arith.constant 0 : i32
    %c0_i32_0 = arith.constant 0 : i32
    %c0_i32_1 = arith.constant 0 : i32
    return %c0_i32, %c0_i32_0 : i32, i32
  }
  func.func @transform_4(%arg0: i32, %arg1: i32) -> (i32, i32) {
    %c0_i32 = arith.constant 0 : i32
    %c0_i32_0 = arith.constant 0 : i32
    %c0_i32_1 = arith.constant 0 : i32
    return %c0_i32, %c0_i32_0 : i32, i32
  }
  func.func @transform_5(%arg0: i32, %arg1: i32) -> (i32, i32) {
    %c0_i32 = arith.constant 0 : i32
    %c0_i32_0 = arith.constant 0 : i32
    %c0_i32_1 = arith.constant 0 : i32
    return %c0_i32, %c0_i32_0 : i32, i32
  }
  func.func @transform_6(%arg0: i32, %arg1: i32) -> (i32, i32) {
    %c0_i32 = arith.constant 0 : i32
    %c0_i32_0 = arith.constant 0 : i32
    %c0_i32_1 = arith.constant 0 : i32
    return %c0_i32, %c0_i32_0 : i32, i32
  }
  func.func @transform_7(%arg0: i32, %arg1: i32) -> (i32, i32) {
    %c0_i32 = arith.constant 0 : i32
    %c0_i32_0 = arith.constant 0 : i32
    %c0_i32_1 = arith.constant 0 : i32
    return %c0_i32, %c0_i32_0 : i32, i32
  }
  func.func @transform_8(%arg0: i32, %arg1: i32) -> (i32, i32, i32) {
    %c0_i32 = arith.constant 0 : i32
    %c0_i32_0 = arith.constant 0 : i32
    return %arg0, %arg1, %c0_i32 : i32, i32, i32
  }
  func.func @transform_9(%arg0: i32, %arg1: i32) -> (i32, i32, i32) {
    %c0_i32 = arith.constant 0 : i32
    %c0_i32_0 = arith.constant 0 : i32
    %c0_i32_1 = arith.constant 0 : i32
    return %arg0, %c0_i32, %c0_i32_0 : i32, i32, i32
  }
}

</mosaic_0001>

<bundles_post_ra>
// kernel: stage_forward.6
= control target key start
LH: loop header
LB: loop body
LE: loop exit
PB: predicated region body
PF: predicated region fallthrough
CT: control target
= control target key end

     0   :  { %vm82_vm0 = vcmask 130048   ;;  %vm330_vm1 = vcmask 257024   ;;  %s606_s1 = inlined_call_operand.vmem [shape: bf16[16,32], index: 1, kind: input, shape index: {}]   ;;  %s607_s0 = inlined_call_operand.vmem [shape: bf16[128,16], index: 0, kind: input, shape index: {}]   ;;  %s608_s2 = inlined_call_operand.vmem [shape: f32[1,32], index: 2, kind: input, shape index: {}]   ;;  %s609_s3 = inlined_call_operand.vmem [shape: f32[1,32], index: 3, kind: input, shape index: {}]   ;;  %s610_s4 = inlined_call_operand.vmem [shape: bf16[128,32], index: 4, kind: output, shape index: {}]  }
   0x1   :  { %v431_v0 = vld [vmem:[%s606_s1] sm:$0xff]   ;;  %v434_v3 = vld [vmem:[%s607_s0 + $0x8] sm:$0xff]   ;;  %v436_v5 = vld [vmem:[%s607_s0 + $0x10] sm:$0xff]  }
   0x2   :  { %v432_v1 = vld [vmem:[%s607_s0] sm:$0xff]   ;;  %411 = vmatprep.subr.bf16.mxu0 %v431_v0  ;;  %429 = vmatprep.subr.bf16.mxu1 %v431_v0  ;;  %v435_v4 = vld [vmem:[%s607_s0 + $0x28] sm:$0xff]   ;;  %v437_v6 = vld [vmem:[%s607_s0 + $0x30] sm:$0xff]  }
   0x3   :  { %v433_v2 = vld [vmem:[%s607_s0 + $0x20] sm:$0xff]   ;;  %412 = vmatpush3.bf16.msra.mxu0 %v431_v0  ;;  %430 = vmatpush3.bf16.msra.mxu1 %v431_v0  ;;  %v438_v7 = vld [vmem:[%s607_s0 + $0x18] sm:$0xff]  }
   0x4   :  { %413 = vmatprep.mubr.msk.bf16.mxu0 %vm82_vm0, %v432_v1  ;;  %421 = vmatprep.mubr.msk.bf16.mxu1 %vm82_vm0, %v433_v2  ;;  %v439_v8 = vld [vmem:[%s607_s0 + $0x38] sm:$0xff]   ;;  %v503_v9 = vld [vmem:[%s608_s2] ss:$0 sm:$0xff] }
   0x5   :  { %v508_v11 = vld [vmem:[%s609_s3] ss:$0 sm:$0xff] }
   0x6   :  { %414 = vmatmul.mubr.msk.bf16.vlgmr.msra.gmra.mrb[0].mxu0 %vm82_vm0, %v434_v3  ;;  %422 = vmatmul.mubr.msk.bf16.vlgmr.msra.gmra.mrb[0].mxu1 %vm82_vm0, %v435_v4 }
   0x7   :  { %417 = vmatprep.mubr.msk.bf16.mxu0 %vm82_vm0, %v436_v5  ;;  %425 = vmatprep.mubr.msk.bf16.mxu1 %vm82_vm0, %v437_v6 }
   0xe   :  { %418 = vmatmul.mubr.msk.bf16.gmra.mrb[4].mxu0 %vm82_vm0, %v438_v7  ;;  %426 = vmatmul.mubr.msk.bf16.gmra.mrb[4].mxu1 %vm82_vm0, %v439_v8 }
  0xd9   :  { %v415_v10 = vpop.f32.mrb[0].mxu0  ;;  %v423_v12 = vpop.f32.mrb[0].mxu1 }
  0xda   :  { %v213_v13 = vmul.f32 %v415_v10, %v503_v9  ;;  %v221_v14 = vmul.f32 %v423_v12, %v503_v9  ;;  %v141_v15 = vpop.f32.mrb[1].mxu0  ;;  %v173_v16 = vpop.f32.mrb[1].mxu1 }
  0xdb   :  { %v211_v17 = vmul.f32 %v503_v9, %v141_v15  ;;  %v219_v18 = vmul.f32 %v503_v9, %v173_v16  ;;  %v416_v19 = vpop.f32.mrb[2].mxu0  ;;  %v424_v20 = vpop.f32.mrb[2].mxu1 }
  0xdc   :  { %v236_v21 = vadd.f32 %v508_v11, %v213_v13  ;;  %v244_v22 = vadd.f32 %v508_v11, %v221_v14  ;;  %v214_v23 = vmul.f32 %v416_v19, %v503_v9  ;;  %v222_v24 = vmul.f32 %v424_v20, %v503_v9  ;;  %v144_v25 = vpop.f32.mrb[3].mxu0  ;;  %v176_v26 = vpop.f32.mrb[3].mxu1 }
  0xdd   :  { %v234_v27 = vadd.f32 %v508_v11, %v211_v17  ;;  %v242_v28 = vadd.f32 %v508_v11, %v219_v18  ;;  %v212_v29 = vmul.f32 %v503_v9, %v144_v25  ;;  %v220_v30 = vmul.f32 %v503_v9, %v176_v26 }
  0xde   :  { %v252_v31 = vmax.f32 %v236_v21, 0.0  ;;  %v260_v32 = vmax.f32 %v244_v22, 0.0  ;;  %v237_v33 = vadd.f32 %v508_v11, %v214_v23  ;;  %v245_v34 = vadd.f32 %v508_v11, %v222_v24 }
  0xdf   :  { %v250_v35 = vmax.f32 %v234_v27, 0.0  ;;  %v258_v36 = vmax.f32 %v242_v28, 0.0  ;;  %v235_v37 = vadd.f32 %v508_v11, %v212_v29  ;;  %v243_v38 = vadd.f32 %v508_v11, %v220_v30 }
  0xe0   :  { %v388_v39 = vpack.c.bf16 %v252_v31, %v252_v31  ;;  %v396_v40 = vpack.c.bf16 %v260_v32, %v260_v32  ;;  %v253_v41 = vmax.f32 %v237_v33, 0.0  ;;  %v261_v42 = vmax.f32 %v245_v34, 0.0 }
  0xe1   :  { %v386_v43 = vpack.c.bf16 %v250_v35, %v250_v35  ;;  %v394_v44 = vpack.c.bf16 %v258_v36, %v258_v36  ;;  %v251_v45 = vmax.f32 %v235_v37, 0.0  ;;  %v259_v46 = vmax.f32 %v243_v38, 0.0  ;;  %v419_v47 = vpop.f32.mrb[4].mxu0  ;;  %v427_v48 = vpop.f32.mrb[4].mxu1 }
  0xe2   :  { %333 = vst.msk [vmem:[%s610_s4 + $0x8] sm:$0xf] %vm330_vm1, %v388_v39  ;;  %341 = vst.msk [vmem:[%s610_s4 + $0x28] sm:$0xf] %vm330_vm1, %v396_v40  ;;  %v389_v49 = vpack.c.bf16 %v253_v41, %v253_v41  ;;  %v397_v50 = vpack.c.bf16 %v261_v42, %v261_v42  ;;  %v217_v51 = vmul.f32 %v419_v47, %v503_v9  ;;  %v157_v53 = vpop.f32.mrb[5].mxu0  ;;  %v189_v54 = vpop.f32.mrb[5].mxu1 }
  0xe3   :  { %v225_v52 = vmul.f32 %v427_v48, %v503_v9  ;;  %331 = vst.msk [vmem:[%s610_s4] sm:$0xf] %vm330_vm1, %v386_v43  ;;  %339 = vst.msk [vmem:[%s610_s4 + $0x20] sm:$0xf] %vm330_vm1, %v394_v44  ;;  %v387_v55 = vpack.c.bf16 %v251_v45, %v251_v45  ;;  %v395_v56 = vpack.c.bf16 %v259_v46, %v259_v46  ;;  %v420_v59 = vpop.f32.mrb[6].mxu0  ;;  %v428_v60 = vpop.f32.mrb[6].mxu1 }
  0xe4   :  { %v215_v57 = vmul.f32 %v503_v9, %v157_v53  ;;  %v223_v58 = vmul.f32 %v503_v9, %v189_v54  ;;  %334 = vst.msk [vmem:[%s610_s4 + $0xc] sm:$0xf] %vm330_vm1, %v389_v49  ;;  %342 = vst.msk [vmem:[%s610_s4 + $0x2c] sm:$0xf] %vm330_vm1, %v397_v50  ;;  %v240_v61 = vadd.f32 %v508_v11, %v217_v51  ;;  %v160_v1 = vpop.f32.mrb[7].mxu0  ;;  %v192_v2 = vpop.f32.mrb[7].mxu1 }
  0xe5   :  { %v248_v62 = vadd.f32 %v508_v11, %v225_v52  ;;  %v218_v63 = vmul.f32 %v420_v59, %v503_v9  ;;  %v226_v0 = vmul.f32 %v428_v60, %v503_v9  ;;  %332 = vst.msk [vmem:[%s610_s4 + $0x4] sm:$0xf] %vm330_vm1, %v387_v55  ;;  %340 = vst.msk [vmem:[%s610_s4 + $0x24] sm:$0xf] %vm330_vm1, %v395_v56 }
  0xe6   :  { %v238_v3 = vadd.f32 %v508_v11, %v215_v57  ;;  %v246_v4 = vadd.f32 %v508_v11, %v223_v58  ;;  %v216_v5 = vmul.f32 %v503_v9, %v160_v1  ;;  %v224_v6 = vmul.f32 %v503_v9, %v192_v2 }
  0xe7   :  { %v256_v7 = vmax.f32 %v240_v61, 0.0  ;;  %v264_v8 = vmax.f32 %v248_v62, 0.0  ;;  %v241_v10 = vadd.f32 %v508_v11, %v218_v63  ;;  %v249_v12 = vadd.f32 %v508_v11, %v226_v0 }
  0xe8   :  { %v254_v13 = vmax.f32 %v238_v3, 0.0  ;;  %v262_v14 = vmax.f32 %v246_v4, 0.0  ;;  %v239_v15 = vadd.f32 %v508_v11, %v216_v5  ;;  %v247_v16 = vadd.f32 %v508_v11, %v224_v6 }
  0xe9   :  { %v392_v17 = vpack.c.bf16 %v256_v7, %v256_v7  ;;  %v400_v18 = vpack.c.bf16 %v264_v8, %v264_v8  ;;  %v257_v19 = vmax.f32 %v241_v10, 0.0  ;;  %v265_v20 = vmax.f32 %v249_v12, 0.0 }
  0xea   :  { %v390_v21 = vpack.c.bf16 %v254_v13, %v254_v13  ;;  %v398_v22 = vpack.c.bf16 %v262_v14, %v262_v14  ;;  %v255_v23 = vmax.f32 %v239_v15, 0.0  ;;  %v263_v9 = vmax.f32 %v247_v16, 0.0 }
  0xeb   :  { %337 = vst.msk [vmem:[%s610_s4 + $0x18] sm:$0xf] %vm330_vm1, %v392_v17  ;;  %345 = vst.msk [vmem:[%s610_s4 + $0x38] sm:$0xf] %vm330_vm1, %v400_v18  ;;  %v393_v24 = vpack.c.bf16 %v257_v19, %v257_v19  ;;  %v401_v11 = vpack.c.bf16 %v265_v20, %v265_v20 }
  0xec   :  { %335 = vst.msk [vmem:[%s610_s4 + $0x10] sm:$0xf] %vm330_vm1, %v390_v21  ;;  %343 = vst.msk [vmem:[%s610_s4 + $0x30] sm:$0xf] %vm330_vm1, %v398_v22  ;;  %v391_v25 = vpack.c.bf16 %v255_v23, %v255_v23  ;;  %v399_v26 = vpack.c.bf16 %v263_v9, %v263_v9 }
  0xed   :  { %338 = vst.msk [vmem:[%s610_s4 + $0x1c] sm:$0xf] %vm330_vm1, %v393_v24  ;;  %346 = vst.msk [vmem:[%s610_s4 + $0x3c] sm:$0xf] %vm330_vm1, %v401_v11 }
  0xee   :  { %336 = vst.msk [vmem:[%s610_s4 + $0x14] sm:$0xf] %vm330_vm1, %v391_v25  ;;  %344 = vst.msk [vmem:[%s610_s4 + $0x34] sm:$0xf] %vm330_vm1, %v399_v26 }

// kernel: stage_forward.9
= control target key start
LH: loop header
LB: loop body
LE: loop exit
PB: predicated region body
PF: predicated region fallthrough
CT: control target
= control target key end

     0   :  { %vm48_vm0 = vcmask 261120   ;;  %vm146_vm1 = vcmask 257024   ;;  %s242_s1 = inlined_call_operand.vmem [shape: bf16[32,32], index: 1, kind: input, shape index: {}]   ;;  %s243_s0 = inlined_call_operand.vmem [shape: bf16[32,32], index: 0, kind: input, shape index: {}]   ;;  %s244_s2 = inlined_call_operand.vmem [shape: f32[1,32], index: 2, kind: input, shape index: {}]   ;;  %s245_s3 = inlined_call_operand.vmem [shape: f32[1,32], index: 3, kind: input, shape index: {}]   ;;  %s246_s4 = inlined_call_operand.vmem [shape: bf16[32,32], index: 4, kind: output, shape index: {}]  }
   0x1   :  { %v183_v0 = vld [vmem:[%s242_s1] sm:$0xff]   ;;  %v184_v1 = vld [vmem:[%s242_s1 + $0x8] sm:$0xff]  }
   0x2   :  { %175 = vmatprep.subr.bf16.mxu0 %v183_v0  ;;  %v185_v2 = vld [vmem:[%s243_s0] sm:$0xff]   ;;  %v186_v3 = vld [vmem:[%s243_s0 + $0x8] sm:$0xff]  }
   0x3   :  { %176 = vmatpush3.bf16.msra.mxu0 %v183_v0  ;;  %179 = vmatprep.mubr.msk.bf16.mxu0 %vm48_vm0, %v185_v2  ;;  %v161_v4 = vld [vmem:[%s244_s2] ss:$0 sm:$0xff] }
   0x4   :  { %177 = vmatprep.subr.bf16.mxu0 %v184_v1  ;;  %v162_v6 = vld [vmem:[%s245_s3] ss:$0 sm:$0xff] }
   0x7   :  { %178 = vmatpush3.bf16.msra.mxu0 %v184_v1 }
   0xa   :  { %180 = vmatmul.mubr.msk.bf16.vlgmr.msra.gmra.mrb[0].mxu0 %vm48_vm0, %v186_v3 }
  0xdd   :  { %v181_v5 = vpop.f32.mrb[0].mxu0 }
  0xde   :  { %v113_v7 = vmul.f32 %v181_v5, %v161_v4  ;;  %v89_v8 = vpop.f32.mrb[1].mxu0 }
  0xdf   :  { %v111_v9 = vmul.f32 %v161_v4, %v89_v8  ;;  %v182_v10 = vpop.f32.mrb[2].mxu0 }
  0xe0   :  { %v124_v11 = vadd.f32 %v162_v6, %v113_v7  ;;  %v114_v12 = vmul.f32 %v182_v10, %v161_v4  ;;  %v92_v13 = vpop.f32.mrb[3].mxu0 }
  0xe1   :  { %v122_v14 = vadd.f32 %v162_v6, %v111_v9  ;;  %v112_v15 = vmul.f32 %v161_v4, %v92_v13 }
  0xe2   :  { %v128_v16 = vmax.f32 %v124_v11, 0.0  ;;  %v125_v17 = vadd.f32 %v162_v6, %v114_v12 }
  0xe3   :  { %v126_v18 = vmax.f32 %v122_v14, 0.0  ;;  %v123_v19 = vadd.f32 %v162_v6, %v112_v15 }
  0xe4   :  { %v169_v20 = vpack.c.bf16 %v128_v16, %v128_v16  ;;  %v129_v21 = vmax.f32 %v125_v17, 0.0 }
  0xe5   :  { %v167_v22 = vpack.c.bf16 %v126_v18, %v126_v18  ;;  %v127_v23 = vmax.f32 %v123_v19, 0.0 }
  0xe6   :  { %149 = vst.msk [vmem:[%s246_s4 + $0x8] sm:$0xf] %vm146_vm1, %v169_v20  ;;  %v170_v24 = vpack.c.bf16 %v129_v21, %v129_v21 }
  0xe7   :  { %147 = vst.msk [vmem:[%s246_s4] sm:$0xf] %vm146_vm1, %v167_v22  ;;  %v168_v25 = vpack.c.bf16 %v127_v23, %v127_v23 }
  0xe8   :  { %150 = vst.msk [vmem:[%s246_s4 + $0xc] sm:$0xf] %vm146_vm1, %v170_v24 }
  0xe9   :  { %148 = vst.msk [vmem:[%s246_s4 + $0x4] sm:$0xf] %vm146_vm1, %v168_v25 }

// kernel: stage_forward.8
= control target key start
LH: loop header
LB: loop body
LE: loop exit
PB: predicated region body
PF: predicated region fallthrough
CT: control target
= control target key end

     0   :  { %s888_s30 = smov 0   ;;  %s890_s10 = smov 0   ;;  %s953_s0 = inlined_call_operand.vmem [shape: bf16[2,16,32], index: 0, kind: input, shape index: {}]   ;;  %s954_s1 = inlined_call_operand.vmem [shape: f32[2,1,32], index: 1, kind: input, shape index: {}]   ;;  %s955_s2 = inlined_call_operand.vmem [shape: bf16[2,16,16], index: 2, kind: input, shape index: {}]   ;;  %s956_s3 = inlined_call_operand.vmem [shape: bf16[32,32], index: 3, kind: input, shape index: {}]   ;;  %s957_s4 = inlined_call_operand.vmem [shape: f32[1,32], index: 4, kind: input, shape index: {}]   ;;  %s958_s5 = inlined_call_operand.vmem [shape: f32[1,32], index: 5, kind: input, shape index: {}]   ;;  %s959_s6 = inlined_call_operand.vmem [shape: bf16[16,32], index: 6, kind: input, shape index: {}]   ;;  %s960_s7 = inlined_call_operand.vmem [shape: f32[1,32], index: 7, kind: input, shape index: {}]   ;;  %s961_s8 = inlined_call_operand.vmem [shape: f32[1,32], index: 8, kind: input, shape index: {}]   ;;  %s962_s9 = inlined_call_operand.vmem [shape: bf16[2,16,32], index: 9, kind: output, shape index: {}]  }
   0x1   :  { %s892_s11 = smov 0  }
   0x2 LB: > { %s31_s12 = sadd.s32 1, %s830_s10  ;;  %p735_p0 = scmp.ge.s32.totalorder %s834_s11, 1  ;;  %s834_s11 = sphi %s892_s11, %s19_s11   ;;  %s830_s10 = sphi %s890_s10, %s964_s10   ;;  %s826_s30 = sphi %s888_s30, %s963_s30  }
   0x3   : > { %p33_p1 = scmp.ge.s32.totalorder %s31_s12, 2  ;;  %p333_p2 = scmp.lt.s32.totalorder %s834_s11, 3 }
   0x5   : > { %s966_s12 = smov (%p33_p1, %s31_s12), 0  ;;  %p334_p3 = pnand %p735_p0, %p333_p2 }
   0x6   : > { %v808_v0 = vld [vmem:[%s956_s3] sm:$0xff] (!%p334_p3)   ;;  %v430_v1 = vlaneseq (!%p334_p3)  ;;  %v836_v2 = vmov (!%p334_p3), 0.0   ;;  %vm837_vm0 = vmmov (!%p334_p3), 0   ;;  %v810_v4 = vld [vmem:[%s956_s3 + $0x8] sm:$0xff] (!%p334_p3)   ;;  %p390_p4 = scmp.lt.s32.totalorder (!%p334_p3), %s826_s30, 1  ;;  %vm539_vm1 = vcmask (!%p334_p3), 130048  }
   0x7   : > { %337 = sbr.rel (%p334_p3) target bundleno = 254 (0xfe), region = 56  ;;  %768 = vmatprep.subr.bf16.mxu0 (!%p334_p3), %v836_v2  ;;  %776 = vmatprep.subr.bf16.mxu1 (!%p334_p3), %v836_v2  ;;  %v809_v3 = vld [vmem:[%s959_s6] sm:$0xff] (!%p334_p3)   ;;  %vm461_vm2 = vcmask (!%p334_p3), 261120   ;;  %vm614_vm3 = vcmask (!%p334_p3), 257024  }
   0x8   : > { %769 = vmatpush3.bf16.msra.mxu0 (!%p334_p3), %v808_v0  ;;  %778 = vmatprep.mubr.msk.bf16.mxu1 (!%p334_p3), %vm837_vm0, %v836_v2  ;;  %v431_v5 = vshrl.u32 (!%p334_p3), %v430_v1, 7  ;;  %v752_v22 = vld [vmem:[%s960_s7] ss:$0 sm:$0xff] (!%p334_p3) }
   0x9   : > { %777 = vmatpush3.bf16.msra.mxu1 (!%p334_p3), %v809_v3  ;;  %770 = vmatprep.subr.bf16.mxu0 (!%p334_p3), %v836_v2  ;;  %v753_v24 = vld [vmem:[%s961_s8] ss:$0 sm:$0xff] (!%p334_p3) }
   0xa   : > { %772 = vmatprep.mubr.msk.bf16.mxu0 (!%p334_p3), %vm837_vm0, %v836_v2  ;;  %v432_v9 = vsub.s32 (!%p334_p3), 0, %v431_v5  ;;  %v747_v25 = vld [vmem:[%s957_s4] ss:$0 sm:$0xff] (!%p334_p3) }
   0xb   : > { %v748_v27 = vld [vmem:[%s958_s5] ss:$0 sm:$0xff] (!%p334_p3) }
   0xc   : > { %771 = vmatpush3.bf16.msra.mxu0 (!%p334_p3), %v810_v4 }
   0xe   : > { %s968_s30 = smov (!%p390_p4, %s826_s30), 1 }
   0xf   : > { %s915_s19 = sshll.u32 %s968_s30, 3  ;;  %s401_s22 = scalar_lea.vmem %s954_s1, %s968_s30 }
  0x10   : > { %s410_s25 = scalar_lea.vmem %s955_s2, %s915_s19  ;;  %v425_v6 = vld [vmem:[%s401_s22] sm:$0x1]  ;;  %s397_s28 = scalar_lea.vmem %s953_s0, %s915_s19 }
  0x11   : > { %v811_v7 = vld [vmem:[%s410_s25] sm:$0xff]   ;;  %v426_v8 = vpack.c.bf16 %v425_v6, %v425_v6  ;;  %s420_s22 = scalar_lea.vmem %s962_s9, %s915_s19 }
  0x12   : > { %779 = vmatmul.mubr.msk.bf16.vlgmr.msra.gmra.mrb[0].mxu1 %vm539_vm1, %v811_v7  ;;  %v423_v12 = vld [vmem:[%s397_s28] sm:$0xf]  ;;  %v424_v13 = vld [vmem:[%s397_s28 + $0x4] sm:$0xf] }
  0x13   : > { %v428_v10 = vpack.i.b16 %v426_v8, %v426_v8 }
  0x15   : > { %v433_v11 = vrot.slane %v428_v10, %v432_v9 }
  0x17   : > { %v742_v14 = vcombine.low %v433_v11, %v433_v11 }
  0x19   : > { %v438_v15 = vmul.bf16 %v742_v14, %v423_v12  ;;  %v439_v16 = vmul.bf16 %v742_v14, %v424_v13 }
  0x1b   : > { %v743_v17 = vcombine.low %v438_v15, %v439_v16 }
  0x1d   : > { %773 = vmatmul.mubr.msk.bf16.vlgmr.msra.gmra.mrb[0].mxu0 %vm461_vm2, %v743_v17 }
  0xe5   : > { %v577_v18 = vpop.f32.mrb[0].mxu1 }
  0xe6   : > { %v780_v19 = vpop.f32.mrb[1].mxu1  ;;  %v591_v23 = vmul.f32 %v752_v22, %v577_v18 }
  0xe7   : > { %v580_v20 = vpop.f32.mrb[2].mxu1 }
  0xe8   : > { %v781_v21 = vpop.f32.mrb[3].mxu1  ;;  %v600_v28 = vadd.f32 %v753_v24, %v591_v23  ;;  %v592_v29 = vmul.f32 %v752_v22, %v580_v20 }
  0xea   : > { %v601_v36 = vadd.f32 %v753_v24, %v592_v29 }
  0xf0   : > { %v499_v26 = vpop.f32.mrb[0].mxu0 }
  0xf1   : > { %v513_v30 = vmul.f32 %v747_v25, %v499_v26  ;;  %v774_v31 = vpop.f32.mrb[1].mxu0 }
  0xf2   : > { %v502_v32 = vpop.f32.mrb[2].mxu0 }
  0xf3   : > { %v522_v33 = vadd.f32 %v748_v27, %v513_v30  ;;  %v514_v34 = vmul.f32 %v747_v25, %v502_v32  ;;  %v775_v35 = vpop.f32.mrb[3].mxu0 }
  0xf5   : > { %v602_v37 = vadd.f32 %v600_v28, %v522_v33  ;;  %v523_v38 = vadd.f32 %v748_v27, %v514_v34 }
  0xf7   : > { %v604_v39 = vmax.f32 %v602_v37, 0.0  ;;  %v603_v40 = vadd.f32 %v601_v36, %v523_v38 }
  0xf9   : > { %v761_v41 = vpack.c.bf16 %v604_v39, %v604_v39  ;;  %v605_v42 = vmax.f32 %v603_v40, 0.0 }
  0xfb   : > { %615 = vst.msk [vmem:[%s420_s22] sm:$0xf] %vm614_vm3, %v761_v41  ;;  %v762_v43 = vpack.c.bf16 %v605_v42, %v605_v42 }
  0xfd   : > { %616 = vst.msk [vmem:[%s420_s22 + $0x4] sm:$0xf] %vm614_vm3, %v762_v43 }
  0xfe PF: > { %s19_s11 = sadd.s32 1, %s834_s11   ;;  %s963_s30 = smov %s830_s10 }
  0xff   : > { %p16_p5 = scmp.ge.s32.totalorder %s19_s11, 4   ;;  %s964_s10 = smov %s966_s12 }
 0x101   :  { %18 = sbr.rel (!%p16_p5) target bundleno = 2 (0x2), region = 92 }

// kernel: stage_forward.7
= control target key start
LH: loop header
LB: loop body
LE: loop exit
PB: predicated region body
PF: predicated region fallthrough
CT: control target
= control target key end

     0   :  { %s2337_s21 = smov 0   ;;  %s2339_s22 = smov 0   ;;  %s2590_s0 = inlined_call_operand.vmem [shape: bf16[2,5,5,32], index: 0, kind: input, shape index: {}]   ;;  %s2591_s1 = inlined_call_operand.vmem [shape: bf16[2,5,5,32], index: 1, kind: input, shape index: {}]   ;;  %s2592_s2 = inlined_call_operand.vmem [shape: bf16[2,5,5,32], index: 2, kind: input, shape index: {}]   ;;  %s2593_s3 = inlined_call_operand.vmem [shape: bf16[2,5,5,32], index: 3, kind: input, shape index: {}]   ;;  %s2594_s4 = inlined_call_operand.vmem [shape: bf16[3,3,32,32], index: 4, kind: input, shape index: {}]   ;;  %s2595_s5 = inlined_call_operand.vmem [shape: f32[1,32], index: 5, kind: input, shape index: {}]   ;;  %s2596_s6 = inlined_call_operand.vmem [shape: f32[1,32], index: 6, kind: input, shape index: {}]   ;;  %s2597_s7 = inlined_call_operand.vmem [shape: bf16[32,4], index: 7, kind: input, shape index: {}]   ;;  %s2598_s8 = inlined_call_operand.vmem [shape: f32[1,4], index: 8, kind: input, shape index: {}]   ;;  %s2599_s9 = inlined_call_operand.vmem [shape: bf16[4,32], index: 9, kind: input, shape index: {}]   ;;  %s2600_s10 = inlined_call_operand.vmem [shape: f32[1,32], index: 10, kind: input, shape index: {}]   ;;  %s2601_s11 = inlined_call_operand.vmem [shape: bf16[2,16,32], index: 11, kind: output, shape index: {0}]   ;;  %s2602_s12 = inlined_call_operand.vmem [shape: f32[2,1,32], index: 12, kind: output, shape index: {1}]  }
   0x1   :  { %s2341_s23 = smov 0  }
   0x2 LB: > { %s35_s24 = sadd.s32 1, %s2263_s22  ;;  %p1917_p0 = scmp.ge.s32.totalorder %s2267_s23, 1  ;;  %s2267_s23 = sphi %s2341_s23, %s23_s23   ;;  %s2263_s22 = sphi %s2339_s22, %s2610_s22   ;;  %s2259_s21 = sphi %s2337_s21, %s2609_s21  }
   0x3   : > { %p37_p1 = scmp.ge.s32.totalorder %s35_s24, 2  ;;  %p409_p2 = scmp.lt.s32.totalorder %s2267_s23, 3 }
   0x5   : > { %s2612_s24 = smov (%p37_p1, %s35_s24), 0  ;;  %p410_p3 = pnand %p1917_p0, %p409_p2 }
   0x6   : > { %v2197_v0 = vld [vmem:[%s2594_s4 + $0x30] sm:$0xff] (!%p410_p3)   ;;  %v538_v1 = vlaneseq (!%p410_p3)  ;;  %v2269_v2 = vmov (!%p410_p3), 0.0   ;;  %v2198_v3 = vld [vmem:[%s2594_s4 + $0x38] sm:$0xff] (!%p410_p3)   ;;  %vm2270_vm0 = vmmov (!%p410_p3), 0   ;;  %p473_p4 = scmp.lt.s32.totalorder (!%p410_p3), %s2259_s21, 1  ;;  %vm562_vm1 = vcmask (!%p410_p3), 261120  }
   0x7   : > { %413 = sbr.rel (%p410_p3) target bundleno = 795 (0x31b), region = 64  ;;  %2077 = vmatprep.subr.bf16.mxu0 (!%p410_p3), %v2269_v2  ;;  %2053 = vmatprep.subr.bf16.mxu1 (!%p410_p3), %v2269_v2  ;;  %v2271_v5 = vmov (!%p410_p3), 1983009808   ;;  %v2202_v7 = vld [vmem:[%s2594_s4 + $0x10] sm:$0xff] (!%p410_p3)   ;;  %v2203_v9 = vld [vmem:[%s2594_s4 + $0x18] sm:$0xff] (!%p410_p3)   ;;  %v2201_v13 = vld [vmem:[%s2594_s4 + $0x40] sm:$0xff] (!%p410_p3)  }
   0x8   : > { %2078 = vmatpush3.bf16.msra.mxu0 (!%p410_p3), %v2197_v0  ;;  %2081 = vmatprep.mubr.msk.bf16.mxu0 (!%p410_p3), %vm2270_vm0, %v2269_v2  ;;  %v539_v4 = vshrl.u32 (!%p410_p3), %v538_v1, 7  ;;  %v536_v6 = vunpack.c.l.s4 (!%p410_p3), %v2271_v5  ;;  %v2210_v19 = vld [vmem:[%s2594_s4] sm:$0xff] (!%p410_p3)   ;;  %v2204_v20 = vld [vmem:[%s2594_s4 + $0x48] sm:$0xff] (!%p410_p3)   ;;  %vm724_vm2 = vsmask.f32 (!%p410_p3), 1280  ;;  %v2209_v46 = vld [vmem:[%s2594_s4 + $0x50] sm:$0xff] (!%p410_p3)  }
   0x9   : > { %2079 = vmatprep.subr.bf16.mxu0 (!%p410_p3), %v2269_v2  ;;  %2057 = vmatprep.mubr.msk.bf16.mxu1 (!%p410_p3), %vm2270_vm0, %v2269_v2  ;;  %v2211_v22 = vld [vmem:[%s2594_s4 + $0x8] sm:$0xff] (!%p410_p3)   ;;  %vm725_vm3 = vsmask.f32 (!%p410_p3), 3336  ;;  %vm727_vm4 = vsmask.f32 (!%p410_p3), 5392  ;;  %v2216_v56 = vld [vmem:[%s2594_s4 + $0x20] sm:$0xff] (!%p410_p3)  }
   0xa   : > { %v537_v8 = vunpack.c.0.s8 (!%p410_p3), %v536_v6  ;;  %2054 = vmatpush3.bf16.msra.mxu1 (!%p410_p3), %v2202_v7  ;;  %vm729_vm5 = vsmask.f32 (!%p410_p3), 7448  ;;  %vm2426_vm6 = vmor (!%p410_p3), %vm724_vm2, %vm725_vm3  ;;  %v2212_v61 = vld [vmem:[%s2594_s4 + $0x58] sm:$0xff] (!%p410_p3)   ;;  %vm1615_vm9 = vcmask (!%p410_p3), 253952   ;;  %vm1608_vm10 = vcmask (!%p410_p3), 257024  }
   0xb   : > { %2055 = vmatprep.subr.bf16.mxu1 (!%p410_p3), %v2269_v2  ;;  %vm2437_vm7 = vmor (!%p410_p3), %vm2426_vm6, %vm727_vm4  ;;  %1616 = vst.msk [vmem:[#allocation2] sm:$0x1] (!%p410_p3), %vm1615_vm9, %v2269_v2  ;;  %vm1704_vm11 = vcmask (!%p410_p3), 1041408   ;;  %vm1700_vm12 = vcmask (!%p410_p3), 31744  }
   0xc   : > { %2080 = vmatpush3.bf16.msra.mxu0 (!%p410_p3), %v2198_v3  ;;  %v2384_v10 = vsub.s32 (!%p410_p3), %v537_v8, %v539_v4  ;;  %vm2449_vm8 = vmor (!%p410_p3), %vm2437_vm7, %vm729_vm5  ;;  %v2217_v8 = vld [vmem:[%s2594_s4 + $0x28] sm:$0xff] (!%p410_p3)  }
   0xd   : > { %2085 = vmatprep.subr.bf16.mxu0 (!%p410_p3), %v2269_v2 }
   0xe   : > { %s2614_s21 = smov (!%p473_p4, %s2259_s21), 1  ;;  %2056 = vmatpush3.bf16.msra.mxu1 %v2203_v9 }
   0xf   : > { %s2169_s13 = smul.u32 20, %s2614_s21  ;;  %2061 = vmatprep.subr.bf16.mxu1 %v2269_v2  ;;  %s505_s28 = scalar_lea.vmem %s2602_s12, %s2614_s21 }
  0x11   : > { %s2382_s18 = scalar_lea.vmem %s2592_s2, %s2169_s13  ;;  %s2389_s25 = scalar_lea.vmem %s2591_s1, %s2169_s13 }
  0x12   : > { %v2233_v11 = vld.sshfl [vmem:[%s2382_s18] sm:$0xf pattern:$0x76325410]  ;;  %s492_s30 = scalar_lea.vmem %s2593_s3, %s2169_s13  ;;  %s2405_s16 = scalar_lea.vmem %s2590_s0, %s2169_s13 }
  0x13   : > { %v2234_v12 = vld.sshfl [vmem:[%s2382_s18 + $0x8] sm:$0xf pattern:$0x76325410] }
  0x14   : > { %v2235_v14 = vld.sshfl [vmem:[%s2389_s25] sm:$0xf pattern:$0x76325410]  ;;  %v898_v16 = vcombine.low %v2233_v11, %v2234_v12 }
  0x15   : > { %v2236_v15 = vld.sshfl [vmem:[%s2389_s25 + $0x8] sm:$0xf pattern:$0x76325410] }
  0x16   : > { %v2237_v17 = vld.sshfl [vmem:[%s492_s30] sm:$0xf pattern:$0x76325410]  ;;  %2082 = vmatmul.mubr.msk.bf16.vlgmr.msra.gmra.mrb[0].mxu0 %vm562_vm1, %v898_v16  ;;  %v549_v21 = vcombine.low %v2235_v14, %v2236_v15 }
  0x17   : > { %v2238_v18 = vld.sshfl [vmem:[%s492_s30 + $0x8] sm:$0xf pattern:$0x76325410]  ;;  %2086 = vmatpush3.bf16.msra.mxu0 %v2201_v13  ;;  %2089 = vmatprep.mubr.msk.bf16.mxu0 %vm2270_vm0, %v2269_v2 }
  0x18   : > { %2087 = vmatprep.subr.bf16.mxu0 %v2269_v2  ;;  %2058 = vmatmul.mubr.msk.bf16.vlgmr.msra.gmra.mrb[0].mxu1 %vm562_vm1, %v549_v21  ;;  %v2239_v23 = vld.sshfl [vmem:[%s2405_s16] sm:$0xf pattern:$0x76325410]  ;;  %v988_v31 = vcombine.low %v2237_v17, %v2238_v18 }
  0x19   : > { %v2240_v24 = vld.sshfl [vmem:[%s2405_s16 + $0x8] sm:$0xf pattern:$0x76325410]  ;;  %2062 = vmatpush3.bf16.msra.mxu1 %v2210_v19  ;;  %2065 = vmatprep.mubr.msk.bf16.mxu1 %vm2270_vm0, %v2269_v2 }
  0x1a   : > { %2063 = vmatprep.subr.bf16.mxu1 %v2269_v2  ;;  %v1959_v26 = vld.sshfl [vmem:[%s2382_s18] sm:$0x13 pattern:$0x76325410]  ;;  %v627_v36 = vcombine.low %v2239_v23, %v2240_v24 }
  0x1b   : > { %2088 = vmatpush3.bf16.msra.mxu0 %v2204_v20  ;;  %v1960_v27 = vld.sshfl [vmem:[%s2382_s18 + $0x4] sm:$0x13 pattern:$0x76325410]  ;;  %v1062_v28 = vcombine.high %v1959_v26, %v1959_v26  ;;  %v1088_v29 = vshrl.u32 %v1959_v26, 16  ;;  %v1091_v30 = vshll.u32 %v1959_v26, 16 }
  0x1c   : > { %2093 = vmatprep.subr.bf16.mxu0 %v2269_v2  ;;  %v1961_v32 = vld.sshfl [vmem:[%s2382_s18 + $0x8] sm:$0x13 pattern:$0x76325410]  ;;  %v1070_v33 = vcombine.high %v1960_v27, %v1960_v27  ;;  %v1102_v34 = vshrl.u32 %v1960_v27, 16  ;;  %v1105_v35 = vshll.u32 %v1960_v27, 16 }
  0x1d   : > { %2064 = vmatpush3.bf16.msra.mxu1 %v2211_v22  ;;  %v1962_v38 = vld.sshfl [vmem:[%s2382_s18 + $0xc] sm:$0x13 pattern:$0x76325410]  ;;  %v1078_v39 = vcombine.high %v1961_v32, %v1961_v32  ;;  %v1090_v40 = vrot.slane %v1088_v29, 6  ;;  %v1093_v41 = vrot.slane %v1091_v30, 7 }
  0x1e   : > { %v1086_v42 = vcombine.high %v1962_v38, %v1962_v38  ;;  %v1097_v43 = vshll.u32 %v1062_v28, 16  ;;  %v1104_v44 = vrot.slane %v1102_v34, 6  ;;  %v1107_v45 = vrot.slane %v1105_v35, 7  ;;  %2069 = vmatprep.subr.bf16.mxu1 %v2269_v2 }
  0x1f   : > { %v1094_v47 = vor.u32 %v1093_v41, %v1090_v40  ;;  %v1111_v48 = vshll.u32 %v1070_v33, 16  ;;  %v1116_v49 = vshrl.u32 %v1961_v32, 16  ;;  %v1119_v50 = vshll.u32 %v1961_v32, 16 }
  0x20   : > { %v1099_v52 = vrot.slane %v1097_v43, 7  ;;  %v1108_v53 = vor.u32 %v1107_v45, %v1104_v44  ;;  %v1125_v54 = vshll.u32 %v1078_v39, 16  ;;  %v1130_v55 = vshrl.u32 %v1962_v38, 16 }
  0x21   : > { %v1095_v57 = vrot.slane %v1094_v47, 2  ;;  %v1113_v58 = vrot.slane %v1111_v48, 7  ;;  %v1118_v59 = vrot.slane %v1116_v49, 6  ;;  %v1121_v60 = vrot.slane %v1119_v50, 7 }
  0x22   : > { %2090 = vmatmul.mubr.msk.bf16.vlgmr.msra.gmra.mrb[0].mxu0 %vm562_vm1, %v988_v31  ;;  %v1109_v62 = vrot.slane %v1108_v53, 2  ;;  %v1132_v63 = vrot.slane %v1130_v55, 6  ;;  %v1133_v0 = vshll.u32 %v1962_v38, 16  ;;  %v1127_v4 = vrot.slane %v1125_v54, 7 }
  0x23   : > { %2094 = vmatpush3.bf16.msra.mxu0 %v2209_v46  ;;  %2097 = vmatprep.mubr.msk.bf16.mxu0 %vm2270_vm0, %v2269_v2  ;;  %v1100_v1 = vsel %vm2449_vm8, %v1095_v57, %v1099_v52  ;;  %v1122_v3 = vor.u32 %v1121_v60, %v1118_v59  ;;  %v1139_v5 = vshll.u32 %v1086_v42, 16  ;;  %v1934_v9 = vld.sshfl [vmem:[%s2405_s16] sm:$0x13 pattern:$0x76325410] }
  0x24   : > { %2095 = vmatprep.subr.bf16.mxu0 %v2269_v2  ;;  %2066 = vmatmul.mubr.msk.bf16.vlgmr.msra.gmra.mrb[0].mxu1 %vm562_vm1, %v627_v36  ;;  %v1114_v6 = vsel %vm2449_vm8, %v1109_v62, %v1113_v58  ;;  %v1135_v7 = vrot.slane %v1133_v0, 7  ;;  %v1935_v14 = vld.sshfl [vmem:[%s2405_s16 + $0x4] sm:$0x13 pattern:$0x76325410]  ;;  %v699_v15 = vcombine.high %v1934_v9, %v1934_v9  ;;  %v732_v19 = vshrl.u32 %v1934_v9, 16 }
  0x25   : > { %v1123_v11 = vrot.slane %v1122_v3, 2  ;;  %v1141_v12 = vrot.slane %v1139_v5, 7  ;;  %v1148_v13 = vcombine.low %v1100_v1, %v1114_v6  ;;  %2070 = vmatpush3.bf16.msra.mxu1 %v2216_v56  ;;  %2073 = vmatprep.mubr.msk.bf16.mxu1 %vm2270_vm0, %v2269_v2  ;;  %v1936_v17 = vld.sshfl [vmem:[%s2405_s16 + $0x8] sm:$0x13 pattern:$0x76325410]  ;;  %v707_v18 = vcombine.high %v1935_v14, %v1935_v14 }
  0x26   : > { %v1136_v16 = vor.u32 %v1135_v7, %v1132_v63  ;;  %2071 = vmatprep.subr.bf16.mxu1 %v2269_v2  ;;  %v735_v20 = vshll.u32 %v1934_v9, 16  ;;  %v1937_v23 = vld.sshfl [vmem:[%s2405_s16 + $0xc] sm:$0x13 pattern:$0x76325410]  ;;  %v715_v24 = vcombine.high %v1936_v17, %v1936_v17  ;;  %v741_v25 = vshll.u32 %v699_v15, 16 }
  0x27   : > { %2096 = vmatpush3.bf16.msra.mxu0 %v2212_v61  ;;  %v1128_v21 = vsel %vm2449_vm8, %v1123_v11, %v1127_v4  ;;  %v1156_v22 = vrot.slane %v1148_v13, %v2384_v10  ;;  %v723_v27 = vcombine.high %v1937_v23, %v1937_v23  ;;  %v734_v28 = vrot.slane %v732_v19, 6  ;;  %v2215_v42 = vld [vmem:[%s2594_s4 + $0x60] sm:$0xff]   ;;  %v2218_v62 = vld [vmem:[%s2594_s4 + $0x68] sm:$0xff]  }
  0x28   : > { %2101 = vmatprep.subr.bf16.mxu0 %v2269_v2  ;;  %v1137_v26 = vrot.slane %v1136_v16, 2  ;;  %v737_v29 = vrot.slane %v735_v20, 7  ;;  %v743_v30 = vrot.slane %v741_v25, 7  ;;  %v746_v31 = vshrl.u32 %v1935_v14, 16 }
  0x29   : > { %2072 = vmatpush3.bf16.msra.mxu1 %v2217_v8  ;;  %v749_v32 = vshll.u32 %v1935_v14, 16  ;;  %v755_v33 = vshll.u32 %v707_v18, 16  ;;  %v760_v36 = vshrl.u32 %v1936_v17, 16  ;;  %v763_v37 = vshll.u32 %v1936_v17, 16  ;;  %v2221_v17 = vld [vmem:[%s2594_s4 + $0x70] sm:$0xff]  }
  0x2a   : > { %v1142_v34 = vsel %vm2449_vm8, %v1137_v26, %v1141_v12  ;;  %v738_v35 = vor.u32 %v737_v29, %v734_v28  ;;  %2125 = vmatprep.subr.bf16.mxu1 %v2269_v2  ;;  %v748_v39 = vrot.slane %v746_v31, 6  ;;  %v769_v46 = vshll.u32 %v715_v24, 16  ;;  %v2241_v60 = vld.sshfl [vmem:[%s2405_s16 + $0x4] sm:$0xf pattern:$0x76325410] }
  0x2b   : > { %v1149_v38 = vcombine.low %v1128_v21, %v1142_v34  ;;  %v751_v40 = vrot.slane %v749_v32, 7  ;;  %v757_v41 = vrot.slane %v755_v33, 7  ;;  %v762_v44 = vrot.slane %v760_v36, 6  ;;  %v2225_v29 = vld [vmem:[%s2594_s4 + $0x80] sm:$0xff]   ;;  %v2226_v33 = vld [vmem:[%s2594_s4 + $0x88] sm:$0xff]  }
  0x2c   : > { %v739_v43 = vrot.slane %v738_v35, 2  ;;  %v765_v45 = vrot.slane %v763_v37, 7  ;;  %v774_v49 = vshrl.u32 %v1937_v23, 16  ;;  %v777_v50 = vshll.u32 %v1937_v23, 16  ;;  %v2222_v23 = vld [vmem:[%s2594_s4 + $0x78] sm:$0xff]   ;;  %v2227_v36 = vld [vmem:[%s2597_s7] sm:$0xff]  }
  0x2d   : > { %v1163_v47 = vrot.slane %v1149_v38, %v2384_v10  ;;  %v752_v48 = vor.u32 %v751_v40, %v748_v39  ;;  %v771_v54 = vrot.slane %v769_v46, 7  ;;  %v783_v55 = vshll.u32 %v723_v27, 16  ;;  %v2242_v3 = vld.sshfl [vmem:[%s2405_s16 + $0xc] sm:$0xf pattern:$0x76325410] }
  0x2e   : > { %v744_v52 = vsel %vm2449_vm8, %v739_v43, %v743_v30  ;;  %v766_v53 = vor.u32 %v765_v45, %v762_v44  ;;  %v776_v58 = vrot.slane %v774_v49, 6  ;;  %v779_v59 = vrot.slane %v777_v50, 7  ;;  %v1999_v7 = vld.sshfl [vmem:[%s2405_s16 + $0x10] sm:$0x13 pattern:$0x76325410] }
  0x2f   : > { %v1164_v56 = vcombine.low %v1156_v22, %v1163_v47  ;;  %v753_v57 = vrot.slane %v752_v48, 2  ;;  %v785_v1 = vrot.slane %v783_v55, 7  ;;  %v1487_v12 = vshrl.u32 %v1999_v7, 16  ;;  %v2228_v37 = vld [vmem:[%s2597_s7 + $0x8] sm:$0xff]   ;;  %v2008_v45 = vld [vmem:[%s2596_s6] ss:$0 sm:$0xff] }
  0x30   : > { %v767_v61 = vrot.slane %v766_v53, 2  ;;  %v780_v0 = vor.u32 %v779_v59, %v776_v58  ;;  %v1490_v13 = vshll.u32 %v1999_v7, 16  ;;  %v1255_v15 = vcombine.low %v2241_v60, %v2242_v3  ;;  %v2243_v21 = vld.sshfl [vmem:[%s2389_s25 + $0x4] sm:$0xf pattern:$0x76325410] }
  0x31   : > { %2098 = vmatmul.mubr.msk.bf16.vlgmr.msra.gmra.mrb[0].mxu0 %vm562_vm1, %v1164_v56  ;;  %v758_v63 = vsel %vm2449_vm8, %v753_v57, %v757_v41  ;;  %v1443_v18 = vcombine.high %v1999_v7, %v1999_v7  ;;  %v1489_v19 = vrot.slane %v1487_v12, 6  ;;  %v2244_v22 = vld.sshfl [vmem:[%s2389_s25 + $0xc] sm:$0xf pattern:$0x76325410]  ;;  %s2018_s16 = sshll.u32 %s2614_s21, 3 }
  0x32   : > { %2102 = vmatpush3.bf16.msra.mxu0 %v2215_v42  ;;  %v792_v4 = vcombine.low %v744_v52, %v758_v63  ;;  %2105 = vmatprep.mubr.msk.bf16.mxu0 %vm2270_vm0, %v2269_v2  ;;  %v772_v5 = vsel %vm2449_vm8, %v767_v61, %v771_v54  ;;  %v781_v6 = vrot.slane %v780_v0, 2  ;;  %v1492_v20 = vrot.slane %v1490_v13, 7  ;;  %v2007_v42 = vld [vmem:[%s2595_s5] ss:$0 sm:$0xff]  ;;  %s501_s30 = scalar_lea.vmem %s2601_s11, %s2018_s16 }
  0x33   : > { %2103 = vmatprep.subr.bf16.mxu0 %v2269_v2  ;;  %v1496_v25 = vshll.u32 %v1443_v18, 16  ;;  %v1345_v28 = vcombine.low %v2243_v21, %v2244_v22  ;;  %v1505_v31 = vcombine.low %v758_v63, %v772_v5  ;;  %v1617_v3 = vld [vmem:[#allocation2] sm:$0x1] }
  0x34   : > { %v786_v8 = vsel %vm2449_vm8, %v781_v6, %v785_v1  ;;  %v800_v11 = vrot.slane %v792_v4, %v2384_v10  ;;  %v1493_v24 = vor.u32 %v1492_v20, %v1489_v19  ;;  %v1698_v7 = vld [vmem:[%s2599_s9] sm:$0x3] }
  0x35   : > { %v793_v9 = vcombine.low %v772_v5, %v786_v8  ;;  %v1498_v27 = vrot.slane %v1496_v25, 7  ;;  %v1513_v34 = vrot.slane %v1505_v31, %v2384_v10  ;;  %v1640_v12 = vld [vmem:[%s2598_s8] sm:$0x1] }
  0x36   : > { %2104 = vmatpush3.bf16.msra.mxu0 %v2218_v62  ;;  %v1494_v26 = vrot.slane %v1493_v24, 2  ;;  %v1699_v20 = vld [vmem:[%s2600_s10] sm:$0x1] }
  0x37   : > { %2109 = vmatprep.subr.bf16.mxu0 %v2269_v2  ;;  %v807_v14 = vrot.slane %v793_v9, %v2384_v10 }
  0x38   : > { %v1499_v30 = vsel %vm2449_vm8, %v1494_v26, %v1498_v27 }
  0x39   : > { %v808_v16 = vcombine.low %v800_v11, %v807_v14  ;;  %v1506_v32 = vcombine.low %v786_v8, %v1499_v30  ;;  %v1706_v11 = vsel %vm1704_vm11, %v1698_v7, 0 }
  0x3b   : > { %2074 = vmatmul.mubr.msk.bf16.vlgmr.msra.gmra.mrb[0].mxu1 %vm562_vm1, %v808_v16  ;;  %v1520_v35 = vrot.slane %v1506_v32, %v2384_v10 }
  0x3c   : > { %2129 = vmatprep.mubr.msk.bf16.mxu1 %vm2270_vm0, %v2269_v2  ;;  %2126 = vmatpush3.bf16.msra.mxu1 %v2227_v36 }
  0x3d   : > { %2106 = vmatmul.mubr.msk.bf16.vlgmr.msra.gmra.mrb[0].mxu0 %vm562_vm1, %v1255_v15  ;;  %v1521_v51 = vcombine.low %v1513_v34, %v1520_v35  ;;  %2127 = vmatprep.subr.bf16.mxu1 %v2269_v2 }
  0x3e   : > { %2110 = vmatpush3.bf16.msra.mxu0 %v2221_v17  ;;  %2113 = vmatprep.mubr.msk.bf16.mxu0 %vm2270_vm0, %v2269_v2 }
  0x3f   : > { %2111 = vmatprep.subr.bf16.mxu0 %v2269_v2 }
  0x40   : > { %2128 = vmatpush3.bf16.msra.mxu1 %v2228_v37 }
  0x41   : > { %2133 = vmatprep.subr.bf16.mxu1 %v2269_v2 }
  0x42   : > { %2112 = vmatpush3.bf16.msra.mxu0 %v2222_v23 }
  0x43   : > { %2117 = vmatprep.subr.bf16.mxu0 %v2269_v2 }
  0x49   : > { %2114 = vmatmul.mubr.msk.bf16.vlgmr.msra.gmra.mrb[0].mxu0 %vm562_vm1, %v1345_v28 }
  0x4a   : > { %2118 = vmatpush3.bf16.msra.mxu0 %v2225_v29  ;;  %2121 = vmatprep.mubr.msk.bf16.mxu0 %vm2270_vm0, %v2269_v2 }
  0x4b   : > { %2119 = vmatprep.subr.bf16.mxu0 %v2269_v2 }
  0x4e   : > { %2120 = vmatpush3.bf16.msra.mxu0 %v2226_v33 }
  0x55   : > { %2122 = vmatmul.mubr.msk.bf16.vlgmr.msra.gmra.mrb[0].mxu0 %vm562_vm1, %v1521_v51 }
 0x10e   : > { %v858_v10 = vpop.f32.mrb[0].mxu1 }
 0x10f   : > { %v2075_v38 = vpop.f32.mrb[1].mxu1 }
 0x110   : > { %v861_v39 = vpop.f32.mrb[2].mxu1 }
 0x111   : > { %v2076_v40 = vpop.f32.mrb[3].mxu1 }
 0x128   : > { %v1571_v41 = vpop.f32.mrb[0].mxu0 }
 0x129   : > { %v2139_v43 = vadd.f32 %v1571_v41, %v858_v10  ;;  %v2123_v44 = vpop.f32.mrb[1].mxu0 }
 0x12a   : > { %v1574_v46 = vpop.f32.mrb[2].mxu0 }
 0x12b   : > { %v1587_v47 = vmul.f32 %v2139_v43, %v2007_v42  ;;  %v2140_v48 = vadd.f32 %v1574_v46, %v861_v39  ;;  %v2124_v49 = vpop.f32.mrb[3].mxu0 }
 0x12d   : > { %v1596_v50 = vadd.f32 %v2008_v45, %v1587_v47  ;;  %v1588_v52 = vmul.f32 %v2140_v48, %v2007_v42 }
 0x12f   : > { %v1598_v53 = vmax.f32 %v1596_v50, 0.0  ;;  %v1597_v54 = vadd.f32 %v2008_v45, %v1588_v52 }
 0x131   : > { %v2019_v55 = vpack.c.bf16 %v1598_v53, %v1598_v53  ;;  %v1599_v56 = vmax.f32 %v1597_v54, 0.0  ;;  %v1618_v57 = vsel %vm562_vm1, %v1598_v53, 0.0 }
 0x133   : > { %1609 = vst.msk [vmem:[%s501_s30] sm:$0xf] %vm1608_vm10, %v2019_v55  ;;  %v2020_v58 = vpack.c.bf16 %v1599_v56, %v1599_v56  ;;  %v1619_v59 = vsel %vm562_vm1, %v1599_v56, 0.0 }
 0x134   : > { %v1620_v60 = vadd.f32 %v1619_v59, %v1618_v57 }
 0x135   : > { %1610 = vst.msk [vmem:[%s501_s30 + $0x4] sm:$0xf] %vm1608_vm10, %v2020_v58 }
 0x136   : > { %v1621_v61 = vrot.slane %v1620_v60, 4 }
 0x138   : > { %v1622_v62 = vadd.f32 %v1621_v61, %v1620_v60 }
 0x13a   : > { %v1623_v63 = vrot.slane %v1622_v62, 2 }
 0x13c   : > { %v1624_v0 = vadd.f32 %v1623_v63, %v1622_v62 }
 0x13e   : > { %v1625_v1 = vrot.slane %v1624_v0, 1 }
 0x140   : > { %v1626_v4 = vadd.f32 %v1625_v1, %v1624_v0 }
 0x142   : > { %v1627_v5 = vadd.f32 %v1626_v4, %v1617_v3 }
 0x144   : > { %1629 = vst.msk [vmem:[#allocation2] sm:$0x1] %vm1615_vm9, %v1627_v5 }
 0x14b   : > { %v1633_v6 = vld [vmem:[#allocation2] sm:$0x1] }
 0x14c   : > { %v1634_v8 = vmul.f32 0.0625, %v1633_v6 }
 0x14e   : > { %v1635_v9 = vpack.c.bf16 %v1634_v8, %v1634_v8 }
 0x150   : > { %2130 = vmatmul.mubr.msk.bf16.vlgmr.msra.gmra.mrb[4].mxu1 %vm562_vm1, %v1635_v9 }
 0x151   : > { %2134 = vmatpush3.bf16.msra.mxu1 %v1706_v11  ;;  %2135 = vmatprep.mubr.msk.bf16.mxu1 %vm2270_vm0, %v2269_v2 }
 0x223   : > { %v1690_v13 = vpop.f32.mrb[4].mxu1 }
 0x224   : > { %v1691_v14 = vadd.f32 %v1690_v13, %v1640_v12  ;;  %v2131_v15 = vpop.f32.mrb[5].mxu1 }
 0x225   : > { %v1693_v16 = vpop.f32.mrb[6].mxu1 }
 0x226   : > { %v1696_v17 = vmax.f32 %v1691_v14, 0.0  ;;  %v2132_v18 = vpop.f32.mrb[7].mxu1 }
 0x228   : > { %v1697_v19 = vpack.c.bf16 %v1696_v17, %v1696_v17 }
 0x22a   : > { %2136 = vmatmul.mubr.msk.bf16.vlgmr.msra.gmra.mrb[8].mxu1 %vm1700_vm12, %v1697_v19 }
 0x2fd   : > { %v1742_v21 = vpop.f32.mrb[8].mxu1 }
 0x2fe   : > { %v1743_v2 = vadd.f32 %v1742_v21, %v1699_v20  ;;  %v2137_v22 = vpop.f32.mrb[9].mxu1 }
 0x2ff   : > { %v1745_v23 = vpop.f32.mrb[10].mxu1 }
 0x300   : > { %v2015_v24 = vmul.f32 -1.442695, %v1743_v2  ;;  %v2138_v25 = vpop.f32.mrb[11].mxu1 }
 0x302   : > { %2229 = vpow2.f32 %v2015_v24 }
 0x30c   : > { %v2230_v26 = vpop.eup %2229 }
 0x30d   : > { %v1751_v27 = vadd.f32 1.0, %v2230_v26 }
 0x30f   : > { %2231 = vrcp.f32 %v1751_v27 }
 0x319   : > { %v2232_v28 = vpop.eup %2231 }
 0x31a   : > { %1754 = vst.msk [vmem:[%s505_s28] sm:$0x1] %vm1615_vm9, %v2232_v28 }
 0x31b PF: > { %s23_s23 = sadd.s32 1, %s2267_s23   ;;  %s2609_s21 = smov %s2263_s22 }
 0x31c   : > { %p20_p5 = scmp.ge.s32.totalorder %s23_s23, 4   ;;  %s2610_s22 = smov %s2612_s24 }
 0x31e   :  { %22 = sbr.rel (!%p20_p5) target bundleno = 2 (0x2), region = 137 }

// kernel: stage_forward.11
= control target key start
LH: loop header
LB: loop body
LE: loop exit
PB: predicated region body
PF: predicated region fallthrough
CT: control target
= control target key end

     0   :  { %s707_s21 = smov 0   ;;  %s709_s22 = smov 0   ;;  %s763_s0 = inlined_call_operand.vmem [shape: bf16[2,16,32], index: 0, kind: input, shape index: {}]   ;;  %s764_s1 = inlined_call_operand.vmem [shape: f32[2,1,32], index: 1, kind: input, shape index: {}]   ;;  %s765_s2 = inlined_call_operand.vmem [shape: bf16[2,16,32], index: 2, kind: input, shape index: {}]   ;;  %s766_s3 = inlined_call_operand.vmem [shape: bf16[32,32], index: 3, kind: input, shape index: {}]   ;;  %s767_s4 = inlined_call_operand.vmem [shape: f32[1,32], index: 4, kind: input, shape index: {}]   ;;  %s768_s5 = inlined_call_operand.vmem [shape: f32[1,32], index: 5, kind: input, shape index: {}]   ;;  %s769_s6 = inlined_call_operand.vmem [shape: bf16[2,16,32], index: 6, kind: output, shape index: {}]  }
   0x1   :  { %s711_s23 = smov 0  }
   0x2 LB: > { %s28_s24 = sadd.s32 1, %s664_s22  ;;  %p580_p0 = scmp.ge.s32.totalorder %s668_s23, 1  ;;  %s668_s23 = sphi %s711_s23, %s16_s23   ;;  %s664_s22 = sphi %s709_s22, %s771_s22   ;;  %s660_s21 = sphi %s707_s21, %s770_s21  }
   0x3   : > { %p30_p1 = scmp.ge.s32.totalorder %s28_s24, 2  ;;  %p258_p2 = scmp.lt.s32.totalorder %s668_s23, 3 }
   0x5   : > { %s773_s24 = smov (%p30_p1, %s28_s24), 0  ;;  %p259_p3 = pnand %p580_p0, %p258_p2 }
   0x6   : > { %v644_v0 = vld [vmem:[%s766_s3] sm:$0xff] (!%p259_p3)   ;;  %v349_v1 = vlaneseq (!%p259_p3)  ;;  %v670_v2 = vmov (!%p259_p3), 0.0   ;;  %v645_v3 = vld [vmem:[%s766_s3 + $0x8] sm:$0xff] (!%p259_p3)   ;;  %vm671_vm0 = vmmov (!%p259_p3), 0   ;;  %p309_p4 = scmp.lt.s32.totalorder (!%p259_p3), %s660_s21, 1  ;;  %vm380_vm1 = vcmask (!%p259_p3), 261120  }
   0x7   : > { %262 = sbr.rel (%p259_p3) target bundleno = 254 (0xfe), region = 44  ;;  %610 = vmatprep.subr.bf16.mxu0 (!%p259_p3), %v670_v2  ;;  %614 = vmatprep.mubr.msk.bf16.mxu0 (!%p259_p3), %vm671_vm0, %v670_v2  ;;  %v592_v16 = vld [vmem:[%s767_s4] ss:$0 sm:$0xff] (!%p259_p3)  ;;  %vm459_vm2 = vcmask (!%p259_p3), 257024  }
   0x8   : > { %611 = vmatpush3.bf16.msra.mxu0 (!%p259_p3), %v644_v0  ;;  %v350_v4 = vshrl.u32 (!%p259_p3), %v349_v1, 7  ;;  %v593_v19 = vld [vmem:[%s768_s5] ss:$0 sm:$0xff] (!%p259_p3) }
   0x9   : > { %612 = vmatprep.subr.bf16.mxu0 (!%p259_p3), %v670_v2 }
   0xa   : > { %v351_v7 = vsub.s32 (!%p259_p3), 0, %v350_v4 }
   0xc   : > { %613 = vmatpush3.bf16.msra.mxu0 (!%p259_p3), %v645_v3 }
   0xe   : > { %s775_s21 = smov (!%p309_p4, %s660_s21), 1 }
   0xf   : > { %s320_s7 = scalar_lea.vmem %s764_s1, %s775_s21  ;;  %s734_s8 = sshll.u32 %s775_s21, 3 }
  0x10   : > { %v344_v5 = vld [vmem:[%s320_s7] sm:$0x1]  ;;  %s316_s11 = scalar_lea.vmem %s763_s0, %s734_s8  ;;  %s329_s14 = scalar_lea.vmem %s765_s2, %s734_s8 }
  0x11   : > { %v345_v6 = vpack.c.bf16 %v344_v5, %v344_v5  ;;  %v342_v10 = vld [vmem:[%s316_s11] sm:$0xf]  ;;  %v343_v11 = vld [vmem:[%s316_s11 + $0x4] sm:$0xf]  ;;  %s339_s21 = scalar_lea.vmem %s769_s6, %s734_s8 }
  0x12   : > { %v604_v17 = vld [vmem:[%s329_s14] sm:$0xff]  }
  0x13   : > { %v347_v8 = vpack.i.b16 %v345_v6, %v345_v6  ;;  %v605_v21 = vunpack.c.l.bf16 %v604_v17  ;;  %v606_v26 = vunpack.c.h.bf16 %v604_v17 }
  0x15   : > { %v352_v9 = vrot.slane %v347_v8, %v351_v7 }
  0x17   : > { %v587_v12 = vcombine.low %v352_v9, %v352_v9 }
  0x19   : > { %v357_v13 = vmul.bf16 %v587_v12, %v342_v10  ;;  %v358_v14 = vmul.bf16 %v587_v12, %v343_v11 }
  0x1b   : > { %v588_v15 = vcombine.low %v357_v13, %v358_v14 }
  0x1d   : > { %615 = vmatmul.mubr.msk.bf16.vlgmr.msra.gmra.mrb[0].mxu0 %vm380_vm1, %v588_v15 }
  0xf0   : > { %v418_v18 = vpop.f32.mrb[0].mxu0 }
  0xf1   : > { %v432_v20 = vmul.f32 %v592_v16, %v418_v18  ;;  %v616_v22 = vpop.f32.mrb[1].mxu0 }
  0xf2   : > { %v421_v23 = vpop.f32.mrb[2].mxu0 }
  0xf3   : > { %v441_v24 = vadd.f32 %v593_v19, %v432_v20  ;;  %v433_v25 = vmul.f32 %v592_v16, %v421_v23  ;;  %v617_v27 = vpop.f32.mrb[3].mxu0 }
  0xf5   : > { %v447_v28 = vadd.f32 %v605_v21, %v441_v24  ;;  %v442_v29 = vadd.f32 %v593_v19, %v433_v25 }
  0xf7   : > { %v449_v30 = vmax.f32 %v447_v28, 0.0  ;;  %v448_v31 = vadd.f32 %v606_v26, %v442_v29 }
  0xf9   : > { %v601_v32 = vpack.c.bf16 %v449_v30, %v449_v30  ;;  %v450_v33 = vmax.f32 %v448_v31, 0.0 }
  0xfb   : > { %460 = vst.msk [vmem:[%s339_s21] sm:$0xf] %vm459_vm2, %v601_v32  ;;  %v602_v34 = vpack.c.bf16 %v450_v33, %v450_v33 }
  0xfd   : > { %461 = vst.msk [vmem:[%s339_s21 + $0x4] sm:$0xf] %vm459_vm2, %v602_v34 }
  0xfe PF: > { %s16_s23 = sadd.s32 1, %s668_s23   ;;  %s770_s21 = smov %s664_s22 }
  0xff   : > { %p13_p5 = scmp.ge.s32.totalorder %s16_s23, 4   ;;  %s771_s22 = smov %s773_s24 }
 0x101   :  { %15 = sbr.rel (!%p13_p5) target bundleno = 2 (0x2), region = 80 }

// kernel: stage_forward.10
= control target key start
LH: loop header
LB: loop body
LE: loop exit
PB: predicated region body
PF: predicated region fallthrough
CT: control target
= control target key end

     0   :  { %s2306_s30 = smov 0   ;;  %s2308_s10 = smov 0   ;;  %s2565_s0 = inlined_call_operand.vmem [shape: bf16[2,6,6,32], index: 0, kind: input, shape index: {}]   ;;  %s2566_s1 = inlined_call_operand.vmem [shape: bf16[3,3,32,32], index: 1, kind: input, shape index: {}]   ;;  %s2567_s2 = inlined_call_operand.vmem [shape: f32[1,32], index: 2, kind: input, shape index: {}]   ;;  %s2568_s3 = inlined_call_operand.vmem [shape: f32[1,32], index: 3, kind: input, shape index: {}]   ;;  %s2569_s4 = inlined_call_operand.vmem [shape: bf16[32,8], index: 4, kind: input, shape index: {}]   ;;  %s2570_s5 = inlined_call_operand.vmem [shape: f32[1,8], index: 5, kind: input, shape index: {}]   ;;  %s2571_s6 = inlined_call_operand.vmem [shape: bf16[8,32], index: 6, kind: input, shape index: {}]   ;;  %s2572_s7 = inlined_call_operand.vmem [shape: f32[1,32], index: 7, kind: input, shape index: {}]   ;;  %s2573_s8 = inlined_call_operand.vmem [shape: bf16[2,16,32], index: 8, kind: output, shape index: {0}]   ;;  %s2574_s9 = inlined_call_operand.vmem [shape: f32[2,1,32], index: 9, kind: output, shape index: {1}]  }
   0x1   :  { %s2310_s11 = smov 0  }
   0x2 LB: > { %s32_s12 = sadd.s32 1, %s2247_s10  ;;  %p1880_p0 = scmp.ge.s32.totalorder %s2251_s11, 1  ;;  %s2251_s11 = sphi %s2310_s11, %s20_s11   ;;  %s2247_s10 = sphi %s2308_s10, %s2582_s10   ;;  %s2243_s30 = sphi %s2306_s30, %s2581_s30  }
   0x3   : > { %p34_p1 = scmp.ge.s32.totalorder %s32_s12, 2  ;;  %p304_p2 = scmp.lt.s32.totalorder %s2251_s11, 3 }
   0x5   : > { %s2584_s12 = smov (%p34_p1, %s32_s12), 0  ;;  %p305_p3 = pnand %p1880_p0, %p304_p2 }
   0x6   : > { %v2193_v0 = vld [vmem:[%s2566_s1 + $0x30] sm:$0xff] (!%p305_p3)   ;;  %v490_v1 = vlaneseq (!%p305_p3)  ;;  %v2253_v2 = vmov (!%p305_p3), 0.0   ;;  %v2194_v3 = vld [vmem:[%s2566_s1 + $0x38] sm:$0xff] (!%p305_p3)   ;;  %vm2254_vm0 = vmmov (!%p305_p3), 0   ;;  %p347_p4 = scmp.lt.s32.totalorder (!%p305_p3), %s2243_s30, 1  ;;  %vm514_vm1 = vcmask (!%p305_p3), 261120  }
   0x7   : > { %308 = sbr.rel (%p305_p3) target bundleno = 804 (0x324), region = 52  ;;  %2073 = vmatprep.subr.bf16.mxu0 (!%p305_p3), %v2253_v2  ;;  %2049 = vmatprep.subr.bf16.mxu1 (!%p305_p3), %v2253_v2  ;;  %v2255_v5 = vmov (!%p305_p3), 1983009808   ;;  %v2198_v7 = vld [vmem:[%s2566_s1 + $0x10] sm:$0xff] (!%p305_p3)   ;;  %v2199_v9 = vld [vmem:[%s2566_s1 + $0x18] sm:$0xff] (!%p305_p3)   ;;  %v2197_v14 = vld [vmem:[%s2566_s1 + $0x40] sm:$0xff] (!%p305_p3)  }
   0x8   : > { %2074 = vmatpush3.bf16.msra.mxu0 (!%p305_p3), %v2193_v0  ;;  %2077 = vmatprep.mubr.msk.bf16.mxu0 (!%p305_p3), %vm2254_vm0, %v2253_v2  ;;  %v491_v4 = vshrl.u32 (!%p305_p3), %v490_v1, 7  ;;  %v488_v6 = vunpack.c.l.s4 (!%p305_p3), %v2255_v5  ;;  %vm417_vm2 = vsmask.f32 (!%p305_p3), 1280  ;;  %vm418_vm3 = vsmask.f32 (!%p305_p3), 3336  ;;  %v2200_v36 = vld [vmem:[%s2566_s1 + $0x48] sm:$0xff] (!%p305_p3)  }
   0x9   : > { %2075 = vmatprep.subr.bf16.mxu0 (!%p305_p3), %v2253_v2  ;;  %2053 = vmatprep.mubr.msk.bf16.mxu1 (!%p305_p3), %vm2254_vm0, %v2253_v2  ;;  %vm420_vm4 = vsmask.f32 (!%p305_p3), 5392  ;;  %vm422_vm5 = vsmask.f32 (!%p305_p3), 7448  ;;  %vm419_vm6 = vmor (!%p305_p3), %vm417_vm2, %vm418_vm3  ;;  %vm676_vm7 = vcmask (!%p305_p3), 1040384   ;;  %vm677_vm8 = vcmask (!%p305_p3), 1042434  }
   0xa   : > { %v489_v8 = vunpack.c.0.s8 (!%p305_p3), %v488_v6  ;;  %2050 = vmatpush3.bf16.msra.mxu1 (!%p305_p3), %v2198_v7  ;;  %vm2366_vm9 = vmor (!%p305_p3), %vm419_vm6, %vm420_vm4  ;;  %vm679_vm10 = vcmask (!%p305_p3), 1044484   ;;  %vm681_vm13 = vcmask (!%p305_p3), 1046534   ;;  %vm1620_vm2 = vcmask (!%p305_p3), 253952  }
   0xb   : > { %2051 = vmatprep.subr.bf16.mxu1 (!%p305_p3), %v2253_v2  ;;  %vm2380_vm11 = vmor (!%p305_p3), %vm2366_vm9, %vm422_vm5  ;;  %1621 = vst.msk [vmem:[#allocation2] sm:$0x1] (!%p305_p3), %vm1620_vm2, %v2253_v2  ;;  %vm1613_vm3 = vcmask (!%p305_p3), 257024   ;;  %vm1709_vm4 = vcmask (!%p305_p3), 1043456   ;;  %vm1705_vm5 = vcmask (!%p305_p3), 64512  }
   0xc   : > { %2076 = vmatpush3.bf16.msra.mxu0 (!%p305_p3), %v2194_v3  ;;  %v2353_v10 = vsub.s32 (!%p305_p3), %v489_v8, %v491_v4  ;;  %vm678_vm12 = vmor (!%p305_p3), %vm676_vm7, %vm677_vm8 }
   0xd   : > { %2081 = vmatprep.subr.bf16.mxu0 (!%p305_p3), %v2253_v2  ;;  %vm680_vm14 = vmor (!%p305_p3), %vm678_vm12, %vm679_vm10 }
   0xe   : > { %s2586_s30 = smov (!%p347_p4, %s2243_s30), 1  ;;  %2052 = vmatpush3.bf16.msra.mxu1 %v2199_v9  ;;  %vm2413_vm15 = vmor %vm680_vm14, %vm681_vm13 }
   0xf   : > { %s2165_s19 = smul.u32 24, %s2586_s30  ;;  %2057 = vmatprep.subr.bf16.mxu1 %v2253_v2  ;;  %s2014_s28 = sshll.u32 %s2586_s30, 3 }
  0x10   : > { %s360_s13 = scalar_lea.vmem %s2573_s8, %s2014_s28  ;;  %s364_s22 = scalar_lea.vmem %s2574_s9, %s2586_s30 }
  0x11   : > { %s2351_s24 = scalar_lea.vmem %s2565_s0, %s2165_s19 }
  0x12   : > { %v2223_v11 = vld.sshfl [vmem:[%s2351_s24 + $0x4] sm:$0xf pattern:$0x76325410] }
  0x13   : > { %v2224_v12 = vld.sshfl [vmem:[%s2351_s24 + $0xc] sm:$0xf pattern:$0x76325410] }
  0x14   : > { %v1884_v13 = vld.sshfl [vmem:[%s2351_s24] sm:$0x13 pattern:$0x76325410]  ;;  %v811_v22 = vcombine.low %v2223_v11, %v2224_v12 }
  0x15   : > { %v1885_v15 = vld.sshfl [vmem:[%s2351_s24 + $0x4] sm:$0x13 pattern:$0x76325410]  ;;  %v392_v16 = vcombine.high %v1884_v13, %v1884_v13  ;;  %v425_v17 = vshrl.u32 %v1884_v13, 16  ;;  %v428_v20 = vshll.u32 %v1884_v13, 16 }
  0x16   : > { %v1886_v18 = vld.sshfl [vmem:[%s2351_s24 + $0x8] sm:$0x13 pattern:$0x76325410]  ;;  %v400_v19 = vcombine.high %v1885_v15, %v1885_v15  ;;  %v439_v21 = vshrl.u32 %v1885_v15, 16  ;;  %v442_v31 = vshll.u32 %v1885_v15, 16  ;;  %2078 = vmatmul.mubr.msk.bf16.vlgmr.msra.gmra.mrb[0].mxu0 %vm514_vm1, %v811_v22 }
  0x17   : > { %v1887_v23 = vld.sshfl [vmem:[%s2351_s24 + $0xc] sm:$0x13 pattern:$0x76325410]  ;;  %v408_v24 = vcombine.high %v1886_v18, %v1886_v18  ;;  %v427_v25 = vrot.slane %v425_v17, 6  ;;  %v434_v26 = vshll.u32 %v392_v16, 16  ;;  %2082 = vmatpush3.bf16.msra.mxu0 %v2197_v14  ;;  %2085 = vmatprep.mubr.msk.bf16.mxu0 %vm2254_vm0, %v2253_v2 }
  0x18   : > { %v416_v27 = vcombine.high %v1887_v23, %v1887_v23  ;;  %v430_v29 = vrot.slane %v428_v20, 7  ;;  %v441_v30 = vrot.slane %v439_v21, 6  ;;  %v448_v33 = vshll.u32 %v400_v19, 16  ;;  %2083 = vmatprep.subr.bf16.mxu0 %v2253_v2 }
  0x19   : > { %v436_v32 = vrot.slane %v434_v26, 7  ;;  %v453_v34 = vshrl.u32 %v1886_v18, 16  ;;  %v456_v35 = vshll.u32 %v1886_v18, 16  ;;  %v444_v38 = vrot.slane %v442_v31, 7  ;;  %v2202_v26 = vld [vmem:[%s2566_s1] sm:$0xff]  }
  0x1a   : > { %v431_v37 = vor.u32 %v430_v29, %v427_v25  ;;  %v462_v39 = vshll.u32 %v408_v24, 16  ;;  %v467_v40 = vshrl.u32 %v1887_v23, 16  ;;  %v450_v42 = vrot.slane %v448_v33, 7 }
  0x1b   : > { %v455_v43 = vrot.slane %v453_v34, 6  ;;  %v458_v44 = vrot.slane %v456_v35, 7  ;;  %v470_v45 = vshll.u32 %v1887_v23, 16  ;;  %v445_v47 = vor.u32 %v444_v38, %v441_v30  ;;  %2084 = vmatpush3.bf16.msra.mxu0 %v2200_v36 }
  0x1c   : > { %v432_v46 = vrot.slane %v431_v37, 2  ;;  %v464_v48 = vrot.slane %v462_v39, 7  ;;  %v469_v49 = vrot.slane %v467_v40, 6  ;;  %v476_v52 = vshll.u32 %v416_v27, 16  ;;  %2089 = vmatprep.subr.bf16.mxu0 %v2253_v2  ;;  %v2201_v37 = vld [vmem:[%s2566_s1 + $0x50] sm:$0xff]  }
  0x1d   : > { %v459_v50 = vor.u32 %v458_v44, %v455_v43  ;;  %v472_v51 = vrot.slane %v470_v45, 7  ;;  %v1931_v53 = vld.sshfl [vmem:[%s2351_s24 + $0x10] sm:$0x13 pattern:$0x76325410]  ;;  %v446_v55 = vrot.slane %v445_v47, 2 }
  0x1e   : > { %v437_v54 = vsel %vm2380_vm11, %v432_v46, %v436_v32  ;;  %v909_v56 = vcombine.high %v1931_v53, %v1931_v53  ;;  %v953_v57 = vshrl.u32 %v1931_v53, 16  ;;  %v478_v60 = vrot.slane %v476_v52, 7  ;;  %v1943_v7 = vld.sshfl [vmem:[%s2351_s24 + $0x4] sm:$0x12 pattern:$0x76325410] }
  0x1f   : > { %v460_v58 = vrot.slane %v459_v50, 2  ;;  %v473_v59 = vor.u32 %v472_v51, %v469_v49  ;;  %v956_v61 = vshll.u32 %v1931_v53, 16  ;;  %v451_v62 = vsel %vm2380_vm11, %v446_v55, %v450_v42  ;;  %v1944_v11 = vld.sshfl [vmem:[%s2351_s24 + $0x8] sm:$0x12 pattern:$0x76325410] }
  0x20   : > { %v955_v63 = vrot.slane %v953_v57, 6  ;;  %v962_v0 = vshll.u32 %v909_v56, 16  ;;  %v485_v4 = vcombine.low %v437_v54, %v451_v62  ;;  %v1945_v15 = vld.sshfl [vmem:[%s2351_s24 + $0xc] sm:$0x12 pattern:$0x76325410]  ;;  %v1061_v16 = vcombine.high %v1943_v7, %v1943_v7 }
  0x21   : > { %v465_v1 = vsel %vm2380_vm11, %v460_v58, %v464_v48  ;;  %v474_v3 = vrot.slane %v473_v59, 2  ;;  %v958_v5 = vrot.slane %v956_v61, 7  ;;  %v1946_v18 = vld.sshfl [vmem:[%s2351_s24 + $0x10] sm:$0x12 pattern:$0x76325410]  ;;  %v1069_v19 = vcombine.high %v1944_v11, %v1944_v11 }
  0x22   : > { %v964_v6 = vrot.slane %v962_v0, 7  ;;  %v493_v13 = vrot.slane %v485_v4, %v2353_v10  ;;  %v971_v14 = vcombine.low %v451_v62, %v465_v1  ;;  %v1077_v20 = vcombine.high %v1945_v15, %v1945_v15  ;;  %v2225_v34 = vld.sshfl [vmem:[%s2351_s24] sm:$0xf pattern:$0x76325410]  ;;  %v2203_v45 = vld [vmem:[%s2566_s1 + $0x8] sm:$0xff]  }
  0x23   : > { %v479_v8 = vsel %vm2380_vm11, %v474_v3, %v478_v60  ;;  %v959_v9 = vor.u32 %v958_v5, %v955_v63  ;;  %v1085_v22 = vcombine.high %v1946_v18, %v1946_v18  ;;  %v1947_v23 = vrot.slane %v1943_v7, 9  ;;  %v2226_v35 = vld.sshfl [vmem:[%s2351_s24 + $0x8] sm:$0xf pattern:$0x76325410]  ;;  %v2204_v55 = vld [vmem:[%s2566_s1 + $0x58] sm:$0xff]  }
  0x24   : > { %v486_v12 = vcombine.low %v465_v1, %v479_v8  ;;  %v1088_v24 = vrot.slane %v1061_v16, 7  ;;  %v1948_v28 = vrot.slane %v1944_v11, 9  ;;  %v1092_v29 = vrot.slane %v1069_v19, 7  ;;  %v2208_v61 = vld [vmem:[%s2566_s1 + $0x20] sm:$0xff]  }
  0x25   : > { %v960_v17 = vrot.slane %v959_v9, 2  ;;  %v1949_v30 = vrot.slane %v1945_v15, 9  ;;  %v979_v33 = vrot.slane %v971_v14, %v2353_v10  ;;  %v1096_v36 = vrot.slane %v1077_v20, 7  ;;  %v2207_v7 = vld [vmem:[%s2566_s1 + $0x60] sm:$0xff]   ;;  %v2210_v20 = vld [vmem:[%s2566_s1 + $0x68] sm:$0xff]  }
  0x26   : > { %v2403_v21 = vrot.slane %v486_v12, %v2353_v10  ;;  %v1950_v38 = vrot.slane %v1946_v18, 9  ;;  %v1100_v39 = vrot.slane %v1085_v22, 7  ;;  %v1089_v42 = vsel %vm2413_vm15, %v1947_v23, %v1088_v24  ;;  %v1898_v44 = vld.sshfl [vmem:[%s2351_s24] sm:$0x12 pattern:$0x76325410] }
  0x27   : > { %v2407_v25 = vsel %vm2380_vm11, %v960_v17, %v964_v6  ;;  %v1093_v43 = vsel %vm2413_vm15, %v1948_v28, %v1092_v29  ;;  %v1097_v46 = vsel %vm2413_vm15, %v1949_v30, %v1096_v36  ;;  %v651_v48 = vcombine.high %v1898_v44, %v1898_v44  ;;  %v1976_v54 = vld.sshfl [vmem:[%s2351_s24 + $0x14] sm:$0x13 pattern:$0x76325410] }
  0x28   : > { %v501_v31 = vcombine.low %v493_v13, %v2403_v21  ;;  %v972_v32 = vcombine.low %v479_v8, %v2407_v25  ;;  %v1101_v47 = vsel %vm2413_vm15, %v1950_v38, %v1100_v39  ;;  %v1902_v50 = vrot.slane %v1898_v44, 9  ;;  %v1991_v60 = vld.sshfl [vmem:[%s2351_s24 + $0x14] sm:$0x12 pattern:$0x76325410]  ;;  %v2209_v8 = vld [vmem:[%s2566_s1 + $0x28] sm:$0xff]  }
  0x29   : > { %v685_v51 = vrot.slane %v651_v48, 7  ;;  %v1107_v52 = vcombine.low %v1089_v42, %v1093_v43  ;;  %v1108_v53 = vcombine.low %v1097_v46, %v1101_v47  ;;  %v579_v56 = vcombine.low %v2225_v34, %v2226_v35  ;;  %v2227_v17 = vld.sshfl [vmem:[%s2351_s24 + $0x8] sm:$0xf pattern:$0x76325410]  ;;  %v2213_v30 = vld [vmem:[%s2566_s1 + $0x70] sm:$0xff]  }
  0x2a   : > { %2054 = vmatmul.mubr.msk.bf16.vlgmr.msra.gmra.mrb[0].mxu1 %vm514_vm1, %v501_v31  ;;  %v986_v40 = vrot.slane %v972_v32, %v2353_v10  ;;  %v1356_v62 = vshrl.u32 %v1976_v54, 16  ;;  %v1359_v63 = vshll.u32 %v1976_v54, 16  ;;  %v1488_v0 = vcombine.high %v1991_v60, %v1991_v60  ;;  %v2228_v18 = vld.sshfl [vmem:[%s2351_s24 + $0x10] sm:$0xf pattern:$0x76325410] }
  0x2b   : > { %2058 = vmatpush3.bf16.msra.mxu1 %v2202_v26  ;;  %2061 = vmatprep.mubr.msk.bf16.mxu1 %vm2254_vm0, %v2253_v2  ;;  %v1115_v57 = vrot.slane %v1107_v52, %v2353_v10  ;;  %v1122_v58 = vrot.slane %v1108_v53, %v2353_v10  ;;  %v686_v59 = vsel %vm2413_vm15, %v1902_v50, %v685_v51  ;;  %v1995_v1 = vrot.slane %v1991_v60, 9  ;;  %v2216_v35 = vld [vmem:[%s2566_s1 + $0x88] sm:$0xff]  }
  0x2c   : > { %v987_v49 = vcombine.low %v979_v33, %v986_v40  ;;  %2059 = vmatprep.subr.bf16.mxu1 %v2253_v2  ;;  %v1510_v3 = vcombine.low %v1093_v43, %v1097_v46  ;;  %v1503_v4 = vrot.slane %v1488_v0, 7  ;;  %v704_v6 = vcombine.low %v686_v59, %v1089_v42  ;;  %v2214_v33 = vld [vmem:[%s2566_s1 + $0x78] sm:$0xff]   ;;  %v2003_v42 = vld [vmem:[%s2567_s2] ss:$0 sm:$0xff] }
  0x2d   : > { %v1123_v5 = vcombine.low %v1115_v57, %v1122_v58  ;;  %v1312_v9 = vcombine.high %v1976_v54, %v1976_v54  ;;  %v1358_v11 = vrot.slane %v1356_v62, 6  ;;  %v1361_v12 = vrot.slane %v1359_v63, 7 }
  0x2e   : > { %2086 = vmatmul.mubr.msk.bf16.vlgmr.msra.gmra.mrb[0].mxu0 %vm514_vm1, %v987_v49  ;;  %v1504_v13 = vsel %vm2413_vm15, %v1995_v1, %v1503_v4  ;;  %v1518_v15 = vrot.slane %v1510_v3, %v2353_v10  ;;  %v712_v16 = vrot.slane %v704_v6, %v2353_v10  ;;  %v1214_v29 = vcombine.low %v2227_v17, %v2228_v18  ;;  %v1622_v1 = vld [vmem:[#allocation2] sm:$0x1] }
  0x2f   : > { %2090 = vmatpush3.bf16.msra.mxu0 %v2201_v37  ;;  %2060 = vmatpush3.bf16.msra.mxu1 %v2203_v45  ;;  %v1511_v14 = vcombine.low %v1101_v47, %v1504_v13  ;;  %v1362_v22 = vor.u32 %v1361_v12, %v1358_v11  ;;  %v1365_v23 = vshll.u32 %v1312_v9, 16  ;;  %v2004_v45 = vld [vmem:[%s2568_s3] ss:$0 sm:$0xff] }
  0x30   : > { %2091 = vmatprep.subr.bf16.mxu0 %v2253_v2  ;;  %2093 = vmatprep.mubr.msk.bf16.mxu0 %vm2254_vm0, %v2253_v2  ;;  %v720_v26 = vcombine.low %v712_v16, %v1518_v15  ;;  %v1703_v6 = vld [vmem:[%s2571_s6] sm:$0xf] }
  0x31   : > { %2065 = vmatprep.subr.bf16.mxu1 %v2253_v2  ;;  %v1525_v19 = vrot.slane %v1511_v14, %v2353_v10  ;;  %v1363_v27 = vrot.slane %v1362_v22, 2  ;;  %v1367_v28 = vrot.slane %v1365_v23, 7  ;;  %v1711_v9 = vsel %vm1709_vm4, %v1703_v6, 0  ;;  %v1645_v11 = vld [vmem:[%s2570_s5] sm:$0x1] }
  0x33   : > { %2092 = vmatpush3.bf16.msra.mxu0 %v2204_v55  ;;  %v1526_v24 = vcombine.low %v1518_v15, %v1525_v19  ;;  %v1368_v31 = vsel %vm2380_vm11, %v1363_v27, %v1367_v28  ;;  %v1704_v19 = vld [vmem:[%s2572_s7] sm:$0x1] }
  0x34   : > { %2097 = vmatprep.subr.bf16.mxu0 %v2253_v2  ;;  %v1375_v32 = vcombine.low %v2407_v25, %v1368_v31  ;;  %v2215_v25 = vld [vmem:[%s2566_s1 + $0x80] sm:$0xff]  }
  0x36   : > { %2062 = vmatmul.mubr.msk.bf16.vlgmr.msra.gmra.mrb[0].mxu1 %vm514_vm1, %v579_v56  ;;  %v1389_v41 = vrot.slane %v1375_v32, %v2353_v10  ;;  %v2217_v10 = vld [vmem:[%s2569_s4] sm:$0xff]  }
  0x37   : > { %2066 = vmatpush3.bf16.msra.mxu1 %v2208_v61  ;;  %2069 = vmatprep.mubr.msk.bf16.mxu1 %vm2254_vm0, %v2253_v2 }
  0x38   : > { %2067 = vmatprep.subr.bf16.mxu1 %v2253_v2  ;;  %v1390_v34 = vcombine.low %v2403_v21, %v1389_v41  ;;  %v2218_v21 = vld [vmem:[%s2569_s4 + $0x8] sm:$0xff]  }
  0x3a   : > { %2094 = vmatmul.mubr.msk.bf16.vlgmr.msra.gmra.mrb[0].mxu0 %vm514_vm1, %v1123_v5 }
  0x3b   : > { %2098 = vmatpush3.bf16.msra.mxu0 %v2207_v7  ;;  %2068 = vmatpush3.bf16.msra.mxu1 %v2209_v8 }
  0x3c   : > { %2099 = vmatprep.subr.bf16.mxu0 %v2253_v2  ;;  %2101 = vmatprep.mubr.msk.bf16.mxu0 %vm2254_vm0, %v2253_v2 }
  0x3d   : > { %2121 = vmatprep.subr.bf16.mxu1 %v2253_v2 }
  0x3f   : > { %2100 = vmatpush3.bf16.msra.mxu0 %v2210_v20 }
  0x40   : > { %2105 = vmatprep.subr.bf16.mxu0 %v2253_v2 }
  0x42   : > { %2070 = vmatmul.mubr.msk.bf16.vlgmr.msra.gmra.mrb[0].mxu1 %vm514_vm1, %v720_v26 }
  0x43   : > { %2125 = vmatprep.mubr.msk.bf16.mxu1 %vm2254_vm0, %v2253_v2  ;;  %2122 = vmatpush3.bf16.msra.mxu1 %v2217_v10 }
  0x44   : > { %2123 = vmatprep.subr.bf16.mxu1 %v2253_v2 }
  0x46   : > { %2102 = vmatmul.mubr.msk.bf16.vlgmr.msra.gmra.mrb[0].mxu0 %vm514_vm1, %v1214_v29 }
  0x47   : > { %2106 = vmatpush3.bf16.msra.mxu0 %v2213_v30  ;;  %2109 = vmatprep.mubr.msk.bf16.mxu0 %vm2254_vm0, %v2253_v2 }
  0x48   : > { %2107 = vmatprep.subr.bf16.mxu0 %v2253_v2  ;;  %2124 = vmatpush3.bf16.msra.mxu1 %v2218_v21 }
  0x49   : > { %2129 = vmatprep.subr.bf16.mxu1 %v2253_v2 }
  0x4b   : > { %2108 = vmatpush3.bf16.msra.mxu0 %v2214_v33 }
  0x4c   : > { %2113 = vmatprep.subr.bf16.mxu0 %v2253_v2 }
  0x52   : > { %2110 = vmatmul.mubr.msk.bf16.vlgmr.msra.gmra.mrb[0].mxu0 %vm514_vm1, %v1390_v34 }
  0x53   : > { %2114 = vmatpush3.bf16.msra.mxu0 %v2215_v25  ;;  %2117 = vmatprep.mubr.msk.bf16.mxu0 %vm2254_vm0, %v2253_v2 }
  0x54   : > { %2115 = vmatprep.subr.bf16.mxu0 %v2253_v2 }
  0x57   : > { %2116 = vmatpush3.bf16.msra.mxu0 %v2216_v35 }
  0x5e   : > { %2118 = vmatmul.mubr.msk.bf16.vlgmr.msra.gmra.mrb[0].mxu0 %vm514_vm1, %v1526_v24 }
 0x115   : > { %v770_v36 = vpop.f32.mrb[0].mxu1 }
 0x116   : > { %v2071_v37 = vpop.f32.mrb[1].mxu1 }
 0x117   : > { %v773_v38 = vpop.f32.mrb[2].mxu1 }
 0x118   : > { %v2072_v39 = vpop.f32.mrb[3].mxu1 }
 0x131   : > { %v1576_v40 = vpop.f32.mrb[0].mxu0 }
 0x132   : > { %v2135_v43 = vadd.f32 %v1576_v40, %v770_v36  ;;  %v2119_v44 = vpop.f32.mrb[1].mxu0 }
 0x133   : > { %v1579_v46 = vpop.f32.mrb[2].mxu0 }
 0x134   : > { %v1592_v47 = vmul.f32 %v2135_v43, %v2003_v42  ;;  %v2136_v48 = vadd.f32 %v1579_v46, %v773_v38  ;;  %v2120_v49 = vpop.f32.mrb[3].mxu0 }
 0x136   : > { %v1601_v50 = vadd.f32 %v2004_v45, %v1592_v47  ;;  %v1593_v51 = vmul.f32 %v2136_v48, %v2003_v42 }
 0x138   : > { %v1603_v52 = vmax.f32 %v1601_v50, 0.0  ;;  %v1602_v53 = vadd.f32 %v2004_v45, %v1593_v51 }
 0x13a   : > { %v2015_v54 = vpack.c.bf16 %v1603_v52, %v1603_v52  ;;  %v1604_v55 = vmax.f32 %v1602_v53, 0.0  ;;  %v1623_v56 = vsel %vm514_vm1, %v1603_v52, 0.0 }
 0x13c   : > { %1614 = vst.msk [vmem:[%s360_s13] sm:$0xf] %vm1613_vm3, %v2015_v54  ;;  %v2016_v57 = vpack.c.bf16 %v1604_v55, %v1604_v55  ;;  %v1624_v58 = vsel %vm514_vm1, %v1604_v55, 0.0 }
 0x13d   : > { %v1625_v59 = vadd.f32 %v1624_v58, %v1623_v56 }
 0x13e   : > { %1615 = vst.msk [vmem:[%s360_s13 + $0x4] sm:$0xf] %vm1613_vm3, %v2016_v57 }
 0x13f   : > { %v1626_v60 = vrot.slane %v1625_v59, 4 }
 0x141   : > { %v1627_v61 = vadd.f32 %v1626_v60, %v1625_v59 }
 0x143   : > { %v1628_v62 = vrot.slane %v1627_v61, 2 }
 0x145   : > { %v1629_v63 = vadd.f32 %v1628_v62, %v1627_v61 }
 0x147   : > { %v1630_v0 = vrot.slane %v1629_v63, 1 }
 0x149   : > { %v1631_v3 = vadd.f32 %v1630_v0, %v1629_v63 }
 0x14b   : > { %v1632_v4 = vadd.f32 %v1631_v3, %v1622_v1 }
 0x14d   : > { %1634 = vst.msk [vmem:[#allocation2] sm:$0x1] %vm1620_vm2, %v1632_v4 }
 0x154   : > { %v1638_v5 = vld [vmem:[#allocation2] sm:$0x1] }
 0x155   : > { %v1639_v7 = vmul.f32 0.0625, %v1638_v5 }
 0x157   : > { %v1640_v8 = vpack.c.bf16 %v1639_v7, %v1639_v7 }
 0x159   : > { %2126 = vmatmul.mubr.msk.bf16.vlgmr.msra.gmra.mrb[4].mxu1 %vm514_vm1, %v1640_v8 }
 0x15a   : > { %2130 = vmatpush3.bf16.msra.mxu1 %v1711_v9  ;;  %2131 = vmatprep.mubr.msk.bf16.mxu1 %vm2254_vm0, %v2253_v2 }
 0x22c   : > { %v1695_v12 = vpop.f32.mrb[4].mxu1 }
 0x22d   : > { %v1696_v13 = vadd.f32 %v1695_v12, %v1645_v11  ;;  %v2127_v14 = vpop.f32.mrb[5].mxu1 }
 0x22e   : > { %v1698_v15 = vpop.f32.mrb[6].mxu1 }
 0x22f   : > { %v1701_v16 = vmax.f32 %v1696_v13, 0.0  ;;  %v2128_v17 = vpop.f32.mrb[7].mxu1 }
 0x231   : > { %v1702_v18 = vpack.c.bf16 %v1701_v16, %v1701_v16 }
 0x233   : > { %2132 = vmatmul.mubr.msk.bf16.vlgmr.msra.gmra.mrb[8].mxu1 %vm1705_vm5, %v1702_v18 }
 0x306   : > { %v1747_v20 = vpop.f32.mrb[8].mxu1 }
 0x307   : > { %v1748_v2 = vadd.f32 %v1747_v20, %v1704_v19  ;;  %v2133_v22 = vpop.f32.mrb[9].mxu1 }
 0x308   : > { %v1750_v23 = vpop.f32.mrb[10].mxu1 }
 0x309   : > { %v2011_v24 = vmul.f32 -1.442695, %v1748_v2  ;;  %v2134_v26 = vpop.f32.mrb[11].mxu1 }
 0x30b   : > { %2219 = vpow2.f32 %v2011_v24 }
 0x315   : > { %v2220_v27 = vpop.eup %2219 }
 0x316   : > { %v1756_v28 = vadd.f32 1.0, %v2220_v27 }
 0x318   : > { %2221 = vrcp.f32 %v1756_v28 }
 0x322   : > { %v2222_v29 = vpop.eup %2221 }
 0x323   : > { %1759 = vst.msk [vmem:[%s364_s22] sm:$0x1] %vm1620_vm2, %v2222_v29 }
 0x324 PF: > { %s20_s11 = sadd.s32 1, %s2251_s11   ;;  %s2581_s30 = smov %s2247_s10 }
 0x325   : > { %p17_p5 = scmp.ge.s32.totalorder %s20_s11, 4   ;;  %s2582_s10 = smov %s2584_s12 }
 0x327   :  { %19 = sbr.rel (!%p17_p5) target bundleno = 2 (0x2), region = 113 }

</bundles_post_ra>
